<compile_context>
chip_gen: v6e
topology: v6e:2x2x1
jax: 0.10.0
libtpu: 0.0.40
codegen_flags: <defaults>
</compile_context>

<pallas_src>
import math

import jax
import jax.numpy as jnp
from jax.experimental import pallas as pl
from jax.experimental.pallas import tpu as pltpu

HIDDEN = 128
INPUT = 32
NUM_CLASSES = 10
HEAD_PAD = 128  # lane-dense padding for the MLP head


def char_rnn_kernel(x_ref,                        # (T*Bp, D) time-major, bf16
                    wih1_ref, whh1_ref, b1_ref,   # layer-1 LSTM weights
                    w2f_ref, b2_ref,              # layer-2 fused [wih2; whh2] weight
                    wf1_ref, bf1_ref,             # fc1 (padded to 128 lanes)
                    wf2_ref, bf2_ref,             # fc2
                    wf3_ref, bf3_ref,             # fc3
                    wfo_ref, bfo_ref,             # fc_out
                    out_ref,                      # (Bp, 128) f32 padded logits
                    gx_ref):                      # VMEM scratch (T*Bp, 4H) f32
    Bp = out_ref.shape[0]
    T = x_ref.shape[0] // Bp
    H = whh1_ref.shape[0]
    f32 = jnp.float32
    bf16 = jnp.bfloat16

    # (1) Hoisted layer-1 input projection: one big matmul, bias folded in.
    #     Parked in VMEM scratch to keep vreg pressure low inside the loop.
    gx_ref[...] = (jnp.dot(x_ref[...], wih1_ref[...], preferred_element_type=f32)
                   + b1_ref[...])

    # (2) Hoisted layer-2 bias broadcast (JAX does not CSE broadcast_in_dim).
    b2 = jnp.broadcast_to(b2_ref[...], (Bp, 4 * H))

    def gates_to_hc(gates, c):
        i = jax.nn.sigmoid(gates[:, 0 * H:1 * H])
        f = jax.nn.sigmoid(gates[:, 1 * H:2 * H])
        g = jnp.tanh(gates[:, 2 * H:3 * H])
        o = jax.nn.sigmoid(gates[:, 3 * H:4 * H])
        c_new = f * c + i * g
        return o * jnp.tanh(c_new), c_new

    zeros = jnp.zeros((Bp, H), f32)
    h1, c1, h2, c2 = zeros, zeros, zeros, zeros

    # (3) Static unroll over T (compile-time constant, T=8) for cross-step overlap.
    for t in range(T):
        # Layer 1: only the recurrent matmul remains on the per-step chain.
        g1 = (gx_ref[t * Bp:(t + 1) * Bp, :]
              + jnp.dot(h1.astype(bf16), whh1_ref[...], preferred_element_type=f32))
        h1, c1 = gates_to_hc(g1, c1)
        # (4) Layer 2: single fused K=256 matmul on concat([h1, h2]).
        hcat = jnp.concatenate([h1, h2], axis=-1).astype(bf16)
        g2 = jnp.dot(hcat, w2f_ref[...], preferred_element_type=f32) + b2
        h2, c2 = gates_to_hc(g2, c2)

    # MLP head on the last hidden state of the top LSTM layer.
    # Weights zero-padded to 128 lanes -> lane-dense matmuls and a full-vreg store.
    y = jnp.maximum(
        jnp.dot(h2.astype(bf16), wf1_ref[...], preferred_element_type=f32)
        + bf1_ref[...], 0.0)
    y = jnp.maximum(
        jnp.dot(y.astype(bf16), wf2_ref[...], preferred_element_type=f32)
        + bf2_ref[...], 0.0)
    y = jnp.maximum(
        jnp.dot(y.astype(bf16), wf3_ref[...], preferred_element_type=f32)
        + bf3_ref[...], 0.0)
    out_ref[...] = (
        jnp.dot(y.astype(bf16), wfo_ref[...], preferred_element_type=f32)
        + bfo_ref[...])


def init_params(key):
    """Deterministic init mirroring PyTorch shapes (weights pre-transposed to (in, out))."""
    H, D = HIDDEN, INPUT
    ks = jax.random.split(key, 16)
    bound = 1.0 / math.sqrt(H)

    def u(k, shape, b):
        return jax.random.uniform(k, shape, jnp.float32, -b, b)

    params = {
        # LSTM layer 1: PyTorch weight_ih_l0 (4H, D) -> (D, 4H), etc.
        "wih1": u(ks[0], (D, 4 * H), bound),
        "whh1": u(ks[1], (H, 4 * H), bound),
        "b1":   u(ks[2], (1, 4 * H), bound) + u(ks[3], (1, 4 * H), bound),
        # LSTM layer 2
        "wih2": u(ks[4], (H, 4 * H), bound),
        "whh2": u(ks[5], (H, 4 * H), bound),
        "b2":   u(ks[6], (1, 4 * H), bound) + u(ks[7], (1, 4 * H), bound),
        # Linear layers (in, out)
        "wf1": u(ks[8], (H, 64), 1.0 / math.sqrt(H)),
        "bf1": u(ks[9], (1, 64), 1.0 / math.sqrt(H)),
        "wf2": u(ks[10], (64, 32), 1.0 / math.sqrt(64)),
        "bf2": u(ks[11], (1, 32), 1.0 / math.sqrt(64)),
        "wf3": u(ks[12], (32, 16), 1.0 / math.sqrt(32)),
        "bf3": u(ks[13], (1, 16), 1.0 / math.sqrt(32)),
        "wfo": u(ks[14], (16, NUM_CLASSES), 1.0 / math.sqrt(16)),
        "bfo": u(ks[15], (1, NUM_CLASSES), 1.0 / math.sqrt(16)),
    }
    return params


def _pack_params(p):
    """Fuse/pad/cast weights for the kernel: bf16 matmul operands, f32 biases."""
    bf16 = jnp.bfloat16
    f32 = jnp.float32

    def pad_w(w, rows, cols):
        return jnp.pad(w, ((0, rows - w.shape[0]), (0, cols - w.shape[1]))).astype(bf16)

    def pad_b(b, cols):
        return jnp.pad(b, ((0, 0), (0, cols - b.shape[1]))).astype(f32)

    return dict(
        wih1=p["wih1"].astype(bf16),
        whh1=p["whh1"].astype(bf16),
        b1=p["b1"].astype(f32),
        # Fused layer-2 weight: [wih2; whh2] -> (2H, 4H), one K=256 matmul per step.
        w2f=jnp.concatenate([p["wih2"], p["whh2"]], axis=0).astype(bf16),
        b2=p["b2"].astype(f32),
        wf1=pad_w(p["wf1"], HIDDEN, HEAD_PAD),   bf1=pad_b(p["bf1"], HEAD_PAD),
        wf2=pad_w(p["wf2"], HEAD_PAD, HEAD_PAD), bf2=pad_b(p["bf2"], HEAD_PAD),
        wf3=pad_w(p["wf3"], HEAD_PAD, HEAD_PAD), bf3=pad_b(p["bf3"], HEAD_PAD),
        wfo=pad_w(p["wfo"], HEAD_PAD, HEAD_PAD), bfo=pad_b(p["bfo"], HEAD_PAD),
    )


def char_rnn_forward(x, p):
    """x: (B, 1, T, INPUT) float32 -> logits (B, 10)."""
    B = x.shape[0]
    x3 = jnp.squeeze(x, axis=1)                       # (B, T, D) batch-first
    T = x3.shape[1]

    # Pad batch to a full sublane tile so matmuls / vregs are not 75% padding.
    Bp = max(8, ((B + 7) // 8) * 8)
    if Bp != B:
        x3 = jnp.pad(x3, ((0, Bp - B), (0, 0), (0, 0)))

    # Time-major, flattened to (T*Bp, D): row = t*Bp + b. The layer-1 input
    # projection is hoisted out of the recurrence and done as one matmul on this.
    x2d = jnp.transpose(x3, (1, 0, 2)).reshape(T * Bp, INPUT).astype(jnp.bfloat16)

    q = _pack_params(p)
    args = (x2d,
            q["wih1"], q["whh1"], q["b1"],
            q["w2f"], q["b2"],
            q["wf1"], q["bf1"], q["wf2"], q["bf2"],
            q["wf3"], q["bf3"], q["wfo"], q["bfo"])

    vmem = pl.BlockSpec(memory_space=pltpu.MemorySpace.VMEM)
    out_padded = pl.pallas_call(
        char_rnn_kernel,
        out_shape=jax.ShapeDtypeStruct((Bp, HEAD_PAD), jnp.float32),
        in_specs=[vmem] * len(args),
        out_specs=vmem,
        scratch_shapes=[pltpu.VMEM((T * Bp, 4 * HIDDEN), jnp.float32)],
    )(*args)
    return out_padded[:B, :NUM_CLASSES]


def char_rnn_reference(x, p):
    """Pure-JAX f32 reference of the same forward pass (inference mode)."""
    H = HIDDEN
    x = jnp.squeeze(x, axis=1)
    B, T, _ = x.shape

    def cell(x_t, h, c, wih, whh, b):
        g = x_t @ wih + h @ whh + b
        i = jax.nn.sigmoid(g[:, 0 * H:1 * H])
        f = jax.nn.sigmoid(g[:, 1 * H:2 * H])
        gg = jnp.tanh(g[:, 2 * H:3 * H])
        o = jax.nn.sigmoid(g[:, 3 * H:4 * H])
        c = f * c + i * gg
        return o * jnp.tanh(c), c

    h1 = c1 = h2 = c2 = jnp.zeros((B, H), jnp.float32)
    for t in range(T):
        h1, c1 = cell(x[:, t, :], h1, c1, p["wih1"], p["whh1"], p["b1"])
        h2, c2 = cell(h1, h2, c2, p["wih2"], p["whh2"], p["b2"])
    y = jnp.maximum(h2 @ p["wf1"] + p["bf1"], 0.0)
    y = jnp.maximum(y @ p["wf2"] + p["bf2"], 0.0)
    y = jnp.maximum(y @ p["wf3"] + p["bf3"], 0.0)
    return y @ p["wfo"] + p["bfo"]


if __name__ == "__main__":
    key = jax.random.PRNGKey(0)
    k_x, k_p = jax.random.split(key)

    B, T = 2, 8
    x = jax.random.normal(k_x, (B, 1, T, INPUT), dtype=jnp.float32)
    params = init_params(k_p)

    out = jax.block_until_ready(char_rnn_forward(x, params))
    ref = jax.block_until_ready(char_rnn_reference(x, params))

    assert out.shape == (B, NUM_CLASSES)
    # Kernel uses bf16 matmul operands (f32 accumulation / f32 gate math), so
    # compare against the f32 reference with a correspondingly loosened tolerance.
    assert jnp.allclose(out, ref, atol=2e-2, rtol=2e-2), "mismatch vs JAX reference"
    print("KERNEL_OK")
</pallas_src>

<mosaic_0001>
module attributes {stable_mosaic.version = 11 : i64} {
  func.func @char_rnn_kernel(%arg0: memref<64x32xbf16, #tpu.memory_space<vmem>>, %arg1: memref<32x512xbf16, #tpu.memory_space<vmem>>, %arg2: memref<128x512xbf16, #tpu.memory_space<vmem>>, %arg3: memref<1x512xf32, #tpu.memory_space<vmem>>, %arg4: memref<256x512xbf16, #tpu.memory_space<vmem>>, %arg5: memref<1x512xf32, #tpu.memory_space<vmem>>, %arg6: memref<128x128xbf16, #tpu.memory_space<vmem>>, %arg7: memref<1x128xf32, #tpu.memory_space<vmem>>, %arg8: memref<128x128xbf16, #tpu.memory_space<vmem>>, %arg9: memref<1x128xf32, #tpu.memory_space<vmem>>, %arg10: memref<128x128xbf16, #tpu.memory_space<vmem>>, %arg11: memref<1x128xf32, #tpu.memory_space<vmem>>, %arg12: memref<128x128xbf16, #tpu.memory_space<vmem>>, %arg13: memref<1x128xf32, #tpu.memory_space<vmem>>, %arg14: memref<8x128xf32, #tpu.memory_space<vmem>>, %arg15: memref<64x512xf32, #tpu.memory_space<vmem>>) attributes {dimension_semantics = [], scalar_prefetch = 0 : i64, scratch_operands = 1 : i64, tpu.core_type = #tpu.core_type<tc>} {
    %c0 = arith.constant 0 : index
    %c0_0 = arith.constant 0 : index
    %0 = vector.load %arg0[%c0, %c0_0] : memref<64x32xbf16, #tpu.memory_space<vmem>>, vector<64x32xbf16>
    %c0_1 = arith.constant 0 : index
    %c0_2 = arith.constant 0 : index
    %1 = vector.load %arg1[%c0_1, %c0_2] : memref<32x512xbf16, #tpu.memory_space<vmem>>, vector<32x512xbf16>
    %cst = arith.constant dense<0.000000e+00> : vector<64x512xf32>
    %2 = tpu.matmul %0, %1, %cst {dimension_numbers = #tpu.dot_dimension_numbers<[1], [0], [0], [1], [0, 0, 1, 1], [], []>} : vector<64x32xbf16>, vector<32x512xbf16>, vector<64x512xf32> -> vector<64x512xf32>
    %c0_3 = arith.constant 0 : index
    %c0_4 = arith.constant 0 : index
    %3 = vector.load %arg3[%c0_3, %c0_4] : memref<1x512xf32, #tpu.memory_space<vmem>>, vector<1x512xf32>
    %4 = vector.broadcast %3 : vector<1x512xf32> to vector<64x512xf32>
    %5 = arith.addf %2, %4 : vector<64x512xf32>
    %c0_5 = arith.constant 0 : index
    %c0_6 = arith.constant 0 : index
    %6 = vector.load %arg15[%c0_5, %c0_6] : memref<64x512xf32, #tpu.memory_space<vmem>>, vector<64x512xf32>
    tpu.vector_store %arg15[%c0_5, %c0_6], %5 {strides = array<i32>} : memref<64x512xf32, #tpu.memory_space<vmem>>, vector<64x512xf32>,
    %c0_7 = arith.constant 0 : index
    %c0_8 = arith.constant 0 : index
    %7 = vector.load %arg5[%c0_7, %c0_8] : memref<1x512xf32, #tpu.memory_space<vmem>>, vector<1x512xf32>
    %8 = vector.shape_cast %7 : vector<1x512xf32> to vector<1x512xf32>
    %9 = vector.broadcast %8 : vector<1x512xf32> to vector<8x512xf32>
    %cst_9 = arith.constant 0.000000e+00 : f32
    %10 = vector.broadcast %cst_9 : f32 to vector<8x128xf32>
    %c0_10 = arith.constant 0 : index
    %c0_11 = arith.constant 0 : index
    %11 = vector.load %arg15[%c0_10, %c0_11] : memref<64x512xf32, #tpu.memory_space<vmem>>, vector<8x512xf32>
    %12 = arith.truncf %10 : vector<8x128xf32> to vector<8x128xbf16>
    %c0_12 = arith.constant 0 : index
    %c0_13 = arith.constant 0 : index
    %13 = vector.load %arg2[%c0_12, %c0_13] : memref<128x512xbf16, #tpu.memory_space<vmem>>, vector<128x512xbf16>
    %cst_14 = arith.constant dense<0.000000e+00> : vector<8x512xf32>
    %14 = tpu.matmul %12, %13, %cst_14 {dimension_numbers = #tpu.dot_dimension_numbers<[1], [0], [0], [1], [0, 0, 1, 1], [], []>} : vector<8x128xbf16>, vector<128x512xbf16>, vector<8x512xf32> -> vector<8x512xf32>
    %15 = arith.addf %11, %14 : vector<8x512xf32>
    %16 = vector.extract_strided_slice %15 {offsets = [0, 0], sizes = [8, 128], strides = [1, 1]} : vector<8x512xf32> to vector<8x128xf32>
    %17 = arith.negf %16 : vector<8x128xf32>
    %18 = math.exp %17 : vector<8x128xf32>
    %cst_15 = arith.constant 1.000000e+00 : f32
    %19 = vector.broadcast %cst_15 : f32 to vector<8x128xf32>
    %20 = arith.addf %19, %18 : vector<8x128xf32>
    %21 = arith.divf %19, %20 : vector<8x128xf32>
    %22 = vector.extract_strided_slice %15 {offsets = [0, 128], sizes = [8, 128], strides = [1, 1]} : vector<8x512xf32> to vector<8x128xf32>
    %23 = arith.negf %22 : vector<8x128xf32>
    %24 = math.exp %23 : vector<8x128xf32>
    %cst_16 = arith.constant 1.000000e+00 : f32
    %25 = vector.broadcast %cst_16 : f32 to vector<8x128xf32>
    %26 = arith.addf %25, %24 : vector<8x128xf32>
    %27 = arith.divf %25, %26 : vector<8x128xf32>
    %28 = vector.extract_strided_slice %15 {offsets = [0, 256], sizes = [8, 128], strides = [1, 1]} : vector<8x512xf32> to vector<8x128xf32>
    %29 = math.tanh %28 : vector<8x128xf32>
    %30 = vector.extract_strided_slice %15 {offsets = [0, 384], sizes = [8, 128], strides = [1, 1]} : vector<8x512xf32> to vector<8x128xf32>
    %31 = arith.negf %30 : vector<8x128xf32>
    %32 = math.exp %31 : vector<8x128xf32>
    %cst_17 = arith.constant 1.000000e+00 : f32
    %33 = vector.broadcast %cst_17 : f32 to vector<8x128xf32>
    %34 = arith.addf %33, %32 : vector<8x128xf32>
    %35 = arith.divf %33, %34 : vector<8x128xf32>
    %36 = arith.mulf %27, %10 : vector<8x128xf32>
    %37 = arith.mulf %21, %29 : vector<8x128xf32>
    %38 = arith.addf %36, %37 : vector<8x128xf32>
    %39 = math.tanh %38 : vector<8x128xf32>
    %40 = arith.mulf %35, %39 : vector<8x128xf32>
    %41 = tpu.concatenate %40, %10 in 1 : vector<8x128xf32>, vector<8x128xf32> -> vector<8x256xf32>
    %42 = arith.truncf %41 : vector<8x256xf32> to vector<8x256xbf16>
    %c0_18 = arith.constant 0 : index
    %c0_19 = arith.constant 0 : index
    %43 = vector.load %arg4[%c0_18, %c0_19] : memref<256x512xbf16, #tpu.memory_space<vmem>>, vector<256x512xbf16>
    %cst_20 = arith.constant dense<0.000000e+00> : vector<8x512xf32>
    %44 = tpu.matmul %42, %43, %cst_20 {dimension_numbers = #tpu.dot_dimension_numbers<[1], [0], [0], [1], [0, 0, 1, 1], [], []>} : vector<8x256xbf16>, vector<256x512xbf16>, vector<8x512xf32> -> vector<8x512xf32>
    %45 = arith.addf %44, %9 : vector<8x512xf32>
    %46 = vector.extract_strided_slice %45 {offsets = [0, 0], sizes = [8, 128], strides = [1, 1]} : vector<8x512xf32> to vector<8x128xf32>
    %47 = arith.negf %46 : vector<8x128xf32>
    %48 = math.exp %47 : vector<8x128xf32>
    %cst_21 = arith.constant 1.000000e+00 : f32
    %49 = vector.broadcast %cst_21 : f32 to vector<8x128xf32>
    %50 = arith.addf %49, %48 : vector<8x128xf32>
    %51 = arith.divf %49, %50 : vector<8x128xf32>
    %52 = vector.extract_strided_slice %45 {offsets = [0, 128], sizes = [8, 128], strides = [1, 1]} : vector<8x512xf32> to vector<8x128xf32>
    %53 = arith.negf %52 : vector<8x128xf32>
    %54 = math.exp %53 : vector<8x128xf32>
    %cst_22 = arith.constant 1.000000e+00 : f32
    %55 = vector.broadcast %cst_22 : f32 to vector<8x128xf32>
    %56 = arith.addf %55, %54 : vector<8x128xf32>
    %57 = arith.divf %55, %56 : vector<8x128xf32>
    %58 = vector.extract_strided_slice %45 {offsets = [0, 256], sizes = [8, 128], strides = [1, 1]} : vector<8x512xf32> to vector<8x128xf32>
    %59 = math.tanh %58 : vector<8x128xf32>
    %60 = vector.extract_strided_slice %45 {offsets = [0, 384], sizes = [8, 128], strides = [1, 1]} : vector<8x512xf32> to vector<8x128xf32>
    %61 = arith.negf %60 : vector<8x128xf32>
    %62 = math.exp %61 : vector<8x128xf32>
    %cst_23 = arith.constant 1.000000e+00 : f32
    %63 = vector.broadcast %cst_23 : f32 to vector<8x128xf32>
    %64 = arith.addf %63, %62 : vector<8x128xf32>
    %65 = arith.divf %63, %64 : vector<8x128xf32>
    %66 = arith.mulf %57, %10 : vector<8x128xf32>
    %67 = arith.mulf %51, %59 : vector<8x128xf32>
    %68 = arith.addf %66, %67 : vector<8x128xf32>
    %69 = math.tanh %68 : vector<8x128xf32>
    %70 = arith.mulf %65, %69 : vector<8x128xf32>
    %c8 = arith.constant 8 : index
    %c0_24 = arith.constant 0 : index
    %71 = vector.load %arg15[%c8, %c0_24] : memref<64x512xf32, #tpu.memory_space<vmem>>, vector<8x512xf32>
    %72 = arith.truncf %40 : vector<8x128xf32> to vector<8x128xbf16>
    %c0_25 = arith.constant 0 : index
    %c0_26 = arith.constant 0 : index
    %73 = vector.load %arg2[%c0_25, %c0_26] : memref<128x512xbf16, #tpu.memory_space<vmem>>, vector<128x512xbf16>
    %cst_27 = arith.constant dense<0.000000e+00> : vector<8x512xf32>
    %74 = tpu.matmul %72, %73, %cst_27 {dimension_numbers = #tpu.dot_dimension_numbers<[1], [0], [0], [1], [0, 0, 1, 1], [], []>} : vector<8x128xbf16>, vector<128x512xbf16>, vector<8x512xf32> -> vector<8x512xf32>
    %75 = arith.addf %71, %74 : vector<8x512xf32>
    %76 = vector.extract_strided_slice %75 {offsets = [0, 0], sizes = [8, 128], strides = [1, 1]} : vector<8x512xf32> to vector<8x128xf32>
    %77 = arith.negf %76 : vector<8x128xf32>
    %78 = math.exp %77 : vector<8x128xf32>
    %cst_28 = arith.constant 1.000000e+00 : f32
    %79 = vector.broadcast %cst_28 : f32 to vector<8x128xf32>
    %80 = arith.addf %79, %78 : vector<8x128xf32>
    %81 = arith.divf %79, %80 : vector<8x128xf32>
    %82 = vector.extract_strided_slice %75 {offsets = [0, 128], sizes = [8, 128], strides = [1, 1]} : vector<8x512xf32> to vector<8x128xf32>
    %83 = arith.negf %82 : vector<8x128xf32>
    %84 = math.exp %83 : vector<8x128xf32>
    %cst_29 = arith.constant 1.000000e+00 : f32
    %85 = vector.broadcast %cst_29 : f32 to vector<8x128xf32>
    %86 = arith.addf %85, %84 : vector<8x128xf32>
    %87 = arith.divf %85, %86 : vector<8x128xf32>
    %88 = vector.extract_strided_slice %75 {offsets = [0, 256], sizes = [8, 128], strides = [1, 1]} : vector<8x512xf32> to vector<8x128xf32>
    %89 = math.tanh %88 : vector<8x128xf32>
    %90 = vector.extract_strided_slice %75 {offsets = [0, 384], sizes = [8, 128], strides = [1, 1]} : vector<8x512xf32> to vector<8x128xf32>
    %91 = arith.negf %90 : vector<8x128xf32>
    %92 = math.exp %91 : vector<8x128xf32>
    %cst_30 = arith.constant 1.000000e+00 : f32
    %93 = vector.broadcast %cst_30 : f32 to vector<8x128xf32>
    %94 = arith.addf %93, %92 : vector<8x128xf32>
    %95 = arith.divf %93, %94 : vector<8x128xf32>
    %96 = arith.mulf %87, %38 : vector<8x128xf32>
    %97 = arith.mulf %81, %89 : vector<8x128xf32>
    %98 = arith.addf %96, %97 : vector<8x128xf32>
    %99 = math.tanh %98 : vector<8x128xf32>
    %100 = arith.mulf %95, %99 : vector<8x128xf32>
    %101 = tpu.concatenate %100, %70 in 1 : vector<8x128xf32>, vector<8x128xf32> -> vector<8x256xf32>
    %102 = arith.truncf %101 : vector<8x256xf32> to vector<8x256xbf16>
    %c0_31 = arith.constant 0 : index
    %c0_32 = arith.constant 0 : index
    %103 = vector.load %arg4[%c0_31, %c0_32] : memref<256x512xbf16, #tpu.memory_space<vmem>>, vector<256x512xbf16>
    %cst_33 = arith.constant dense<0.000000e+00> : vector<8x512xf32>
    %104 = tpu.matmul %102, %103, %cst_33 {dimension_numbers = #tpu.dot_dimension_numbers<[1], [0], [0], [1], [0, 0, 1, 1], [], []>} : vector<8x256xbf16>, vector<256x512xbf16>, vector<8x512xf32> -> vector<8x512xf32>
    %105 = arith.addf %104, %9 : vector<8x512xf32>
    %106 = vector.extract_strided_slice %105 {offsets = [0, 0], sizes = [8, 128], strides = [1, 1]} : vector<8x512xf32> to vector<8x128xf32>
    %107 = arith.negf %106 : vector<8x128xf32>
    %108 = math.exp %107 : vector<8x128xf32>
    %cst_34 = arith.constant 1.000000e+00 : f32
    %109 = vector.broadcast %cst_34 : f32 to vector<8x128xf32>
    %110 = arith.addf %109, %108 : vector<8x128xf32>
    %111 = arith.divf %109, %110 : vector<8x128xf32>
    %112 = vector.extract_strided_slice %105 {offsets = [0, 128], sizes = [8, 128], strides = [1, 1]} : vector<8x512xf32> to vector<8x128xf32>
    %113 = arith.negf %112 : vector<8x128xf32>
    %114 = math.exp %113 : vector<8x128xf32>
    %cst_35 = arith.constant 1.000000e+00 : f32
    %115 = vector.broadcast %cst_35 : f32 to vector<8x128xf32>
    %116 = arith.addf %115, %114 : vector<8x128xf32>
    %117 = arith.divf %115, %116 : vector<8x128xf32>
    %118 = vector.extract_strided_slice %105 {offsets = [0, 256], sizes = [8, 128], strides = [1, 1]} : vector<8x512xf32> to vector<8x128xf32>
    %119 = math.tanh %118 : vector<8x128xf32>
    %120 = vector.extract_strided_slice %105 {offsets = [0, 384], sizes = [8, 128], strides = [1, 1]} : vector<8x512xf32> to vector<8x128xf32>
    %121 = arith.negf %120 : vector<8x128xf32>
    %122 = math.exp %121 : vector<8x128xf32>
    %cst_36 = arith.constant 1.000000e+00 : f32
    %123 = vector.broadcast %cst_36 : f32 to vector<8x128xf32>
    %124 = arith.addf %123, %122 : vector<8x128xf32>
    %125 = arith.divf %123, %124 : vector<8x128xf32>
    %126 = arith.mulf %117, %68 : vector<8x128xf32>
    %127 = arith.mulf %111, %119 : vector<8x128xf32>
    %128 = arith.addf %126, %127 : vector<8x128xf32>
    %129 = math.tanh %128 : vector<8x128xf32>
    %130 = arith.mulf %125, %129 : vector<8x128xf32>
    %c16 = arith.constant 16 : index
    %c0_37 = arith.constant 0 : index
    %131 = vector.load %arg15[%c16, %c0_37] : memref<64x512xf32, #tpu.memory_space<vmem>>, vector<8x512xf32>
    %132 = arith.truncf %100 : vector<8x128xf32> to vector<8x128xbf16>
    %c0_38 = arith.constant 0 : index
    %c0_39 = arith.constant 0 : index
    %133 = vector.load %arg2[%c0_38, %c0_39] : memref<128x512xbf16, #tpu.memory_space<vmem>>, vector<128x512xbf16>
    %cst_40 = arith.constant dense<0.000000e+00> : vector<8x512xf32>
    %134 = tpu.matmul %132, %133, %cst_40 {dimension_numbers = #tpu.dot_dimension_numbers<[1], [0], [0], [1], [0, 0, 1, 1], [], []>} : vector<8x128xbf16>, vector<128x512xbf16>, vector<8x512xf32> -> vector<8x512xf32>
    %135 = arith.addf %131, %134 : vector<8x512xf32>
    %136 = vector.extract_strided_slice %135 {offsets = [0, 0], sizes = [8, 128], strides = [1, 1]} : vector<8x512xf32> to vector<8x128xf32>
    %137 = arith.negf %136 : vector<8x128xf32>
    %138 = math.exp %137 : vector<8x128xf32>
    %cst_41 = arith.constant 1.000000e+00 : f32
    %139 = vector.broadcast %cst_41 : f32 to vector<8x128xf32>
    %140 = arith.addf %139, %138 : vector<8x128xf32>
    %141 = arith.divf %139, %140 : vector<8x128xf32>
    %142 = vector.extract_strided_slice %135 {offsets = [0, 128], sizes = [8, 128], strides = [1, 1]} : vector<8x512xf32> to vector<8x128xf32>
    %143 = arith.negf %142 : vector<8x128xf32>
    %144 = math.exp %143 : vector<8x128xf32>
    %cst_42 = arith.constant 1.000000e+00 : f32
    %145 = vector.broadcast %cst_42 : f32 to vector<8x128xf32>
    %146 = arith.addf %145, %144 : vector<8x128xf32>
    %147 = arith.divf %145, %146 : vector<8x128xf32>
    %148 = vector.extract_strided_slice %135 {offsets = [0, 256], sizes = [8, 128], strides = [1, 1]} : vector<8x512xf32> to vector<8x128xf32>
    %149 = math.tanh %148 : vector<8x128xf32>
    %150 = vector.extract_strided_slice %135 {offsets = [0, 384], sizes = [8, 128], strides = [1, 1]} : vector<8x512xf32> to vector<8x128xf32>
    %151 = arith.negf %150 : vector<8x128xf32>
    %152 = math.exp %151 : vector<8x128xf32>
    %cst_43 = arith.constant 1.000000e+00 : f32
    %153 = vector.broadcast %cst_43 : f32 to vector<8x128xf32>
    %154 = arith.addf %153, %152 : vector<8x128xf32>
    %155 = arith.divf %153, %154 : vector<8x128xf32>
    %156 = arith.mulf %147, %98 : vector<8x128xf32>
    %157 = arith.mulf %141, %149 : vector<8x128xf32>
    %158 = arith.addf %156, %157 : vector<8x128xf32>
    %159 = math.tanh %158 : vector<8x128xf32>
    %160 = arith.mulf %155, %159 : vector<8x128xf32>
    %161 = tpu.concatenate %160, %130 in 1 : vector<8x128xf32>, vector<8x128xf32> -> vector<8x256xf32>
    %162 = arith.truncf %161 : vector<8x256xf32> to vector<8x256xbf16>
    %c0_44 = arith.constant 0 : index
    %c0_45 = arith.constant 0 : index
    %163 = vector.load %arg4[%c0_44, %c0_45] : memref<256x512xbf16, #tpu.memory_space<vmem>>, vector<256x512xbf16>
    %cst_46 = arith.constant dense<0.000000e+00> : vector<8x512xf32>
    %164 = tpu.matmul %162, %163, %cst_46 {dimension_numbers = #tpu.dot_dimension_numbers<[1], [0], [0], [1], [0, 0, 1, 1], [], []>} : vector<8x256xbf16>, vector<256x512xbf16>, vector<8x512xf32> -> vector<8x512xf32>
    %165 = arith.addf %164, %9 : vector<8x512xf32>
    %166 = vector.extract_strided_slice %165 {offsets = [0, 0], sizes = [8, 128], strides = [1, 1]} : vector<8x512xf32> to vector<8x128xf32>
    %167 = arith.negf %166 : vector<8x128xf32>
    %168 = math.exp %167 : vector<8x128xf32>
    %cst_47 = arith.constant 1.000000e+00 : f32
    %169 = vector.broadcast %cst_47 : f32 to vector<8x128xf32>
    %170 = arith.addf %169, %168 : vector<8x128xf32>
    %171 = arith.divf %169, %170 : vector<8x128xf32>
    %172 = vector.extract_strided_slice %165 {offsets = [0, 128], sizes = [8, 128], strides = [1, 1]} : vector<8x512xf32> to vector<8x128xf32>
    %173 = arith.negf %172 : vector<8x128xf32>
    %174 = math.exp %173 : vector<8x128xf32>
    %cst_48 = arith.constant 1.000000e+00 : f32
    %175 = vector.broadcast %cst_48 : f32 to vector<8x128xf32>
    %176 = arith.addf %175, %174 : vector<8x128xf32>
    %177 = arith.divf %175, %176 : vector<8x128xf32>
    %178 = vector.extract_strided_slice %165 {offsets = [0, 256], sizes = [8, 128], strides = [1, 1]} : vector<8x512xf32> to vector<8x128xf32>
    %179 = math.tanh %178 : vector<8x128xf32>
    %180 = vector.extract_strided_slice %165 {offsets = [0, 384], sizes = [8, 128], strides = [1, 1]} : vector<8x512xf32> to vector<8x128xf32>
    %181 = arith.negf %180 : vector<8x128xf32>
    %182 = math.exp %181 : vector<8x128xf32>
    %cst_49 = arith.constant 1.000000e+00 : f32
    %183 = vector.broadcast %cst_49 : f32 to vector<8x128xf32>
    %184 = arith.addf %183, %182 : vector<8x128xf32>
    %185 = arith.divf %183, %184 : vector<8x128xf32>
    %186 = arith.mulf %177, %128 : vector<8x128xf32>
    %187 = arith.mulf %171, %179 : vector<8x128xf32>
    %188 = arith.addf %186, %187 : vector<8x128xf32>
    %189 = math.tanh %188 : vector<8x128xf32>
    %190 = arith.mulf %185, %189 : vector<8x128xf32>
    %c24 = arith.constant 24 : index
    %c0_50 = arith.constant 0 : index
    %191 = vector.load %arg15[%c24, %c0_50] : memref<64x512xf32, #tpu.memory_space<vmem>>, vector<8x512xf32>
    %192 = arith.truncf %160 : vector<8x128xf32> to vector<8x128xbf16>
    %c0_51 = arith.constant 0 : index
    %c0_52 = arith.constant 0 : index
    %193 = vector.load %arg2[%c0_51, %c0_52] : memref<128x512xbf16, #tpu.memory_space<vmem>>, vector<128x512xbf16>
    %cst_53 = arith.constant dense<0.000000e+00> : vector<8x512xf32>
    %194 = tpu.matmul %192, %193, %cst_53 {dimension_numbers = #tpu.dot_dimension_numbers<[1], [0], [0], [1], [0, 0, 1, 1], [], []>} : vector<8x128xbf16>, vector<128x512xbf16>, vector<8x512xf32> -> vector<8x512xf32>
    %195 = arith.addf %191, %194 : vector<8x512xf32>
    %196 = vector.extract_strided_slice %195 {offsets = [0, 0], sizes = [8, 128], strides = [1, 1]} : vector<8x512xf32> to vector<8x128xf32>
    %197 = arith.negf %196 : vector<8x128xf32>
    %198 = math.exp %197 : vector<8x128xf32>
    %cst_54 = arith.constant 1.000000e+00 : f32
    %199 = vector.broadcast %cst_54 : f32 to vector<8x128xf32>
    %200 = arith.addf %199, %198 : vector<8x128xf32>
    %201 = arith.divf %199, %200 : vector<8x128xf32>
    %202 = vector.extract_strided_slice %195 {offsets = [0, 128], sizes = [8, 128], strides = [1, 1]} : vector<8x512xf32> to vector<8x128xf32>
    %203 = arith.negf %202 : vector<8x128xf32>
    %204 = math.exp %203 : vector<8x128xf32>
    %cst_55 = arith.constant 1.000000e+00 : f32
    %205 = vector.broadcast %cst_55 : f32 to vector<8x128xf32>
    %206 = arith.addf %205, %204 : vector<8x128xf32>
    %207 = arith.divf %205, %206 : vector<8x128xf32>
    %208 = vector.extract_strided_slice %195 {offsets = [0, 256], sizes = [8, 128], strides = [1, 1]} : vector<8x512xf32> to vector<8x128xf32>
    %209 = math.tanh %208 : vector<8x128xf32>
    %210 = vector.extract_strided_slice %195 {offsets = [0, 384], sizes = [8, 128], strides = [1, 1]} : vector<8x512xf32> to vector<8x128xf32>
    %211 = arith.negf %210 : vector<8x128xf32>
    %212 = math.exp %211 : vector<8x128xf32>
    %cst_56 = arith.constant 1.000000e+00 : f32
    %213 = vector.broadcast %cst_56 : f32 to vector<8x128xf32>
    %214 = arith.addf %213, %212 : vector<8x128xf32>
    %215 = arith.divf %213, %214 : vector<8x128xf32>
    %216 = arith.mulf %207, %158 : vector<8x128xf32>
    %217 = arith.mulf %201, %209 : vector<8x128xf32>
    %218 = arith.addf %216, %217 : vector<8x128xf32>
    %219 = math.tanh %218 : vector<8x128xf32>
    %220 = arith.mulf %215, %219 : vector<8x128xf32>
    %221 = tpu.concatenate %220, %190 in 1 : vector<8x128xf32>, vector<8x128xf32> -> vector<8x256xf32>
    %222 = arith.truncf %221 : vector<8x256xf32> to vector<8x256xbf16>
    %c0_57 = arith.constant 0 : index
    %c0_58 = arith.constant 0 : index
    %223 = vector.load %arg4[%c0_57, %c0_58] : memref<256x512xbf16, #tpu.memory_space<vmem>>, vector<256x512xbf16>
    %cst_59 = arith.constant dense<0.000000e+00> : vector<8x512xf32>
    %224 = tpu.matmul %222, %223, %cst_59 {dimension_numbers = #tpu.dot_dimension_numbers<[1], [0], [0], [1], [0, 0, 1, 1], [], []>} : vector<8x256xbf16>, vector<256x512xbf16>, vector<8x512xf32> -> vector<8x512xf32>
    %225 = arith.addf %224, %9 : vector<8x512xf32>
    %226 = vector.extract_strided_slice %225 {offsets = [0, 0], sizes = [8, 128], strides = [1, 1]} : vector<8x512xf32> to vector<8x128xf32>
    %227 = arith.negf %226 : vector<8x128xf32>
    %228 = math.exp %227 : vector<8x128xf32>
    %cst_60 = arith.constant 1.000000e+00 : f32
    %229 = vector.broadcast %cst_60 : f32 to vector<8x128xf32>
    %230 = arith.addf %229, %228 : vector<8x128xf32>
    %231 = arith.divf %229, %230 : vector<8x128xf32>
    %232 = vector.extract_strided_slice %225 {offsets = [0, 128], sizes = [8, 128], strides = [1, 1]} : vector<8x512xf32> to vector<8x128xf32>
    %233 = arith.negf %232 : vector<8x128xf32>
    %234 = math.exp %233 : vector<8x128xf32>
    %cst_61 = arith.constant 1.000000e+00 : f32
    %235 = vector.broadcast %cst_61 : f32 to vector<8x128xf32>
    %236 = arith.addf %235, %234 : vector<8x128xf32>
    %237 = arith.divf %235, %236 : vector<8x128xf32>
    %238 = vector.extract_strided_slice %225 {offsets = [0, 256], sizes = [8, 128], strides = [1, 1]} : vector<8x512xf32> to vector<8x128xf32>
    %239 = math.tanh %238 : vector<8x128xf32>
    %240 = vector.extract_strided_slice %225 {offsets = [0, 384], sizes = [8, 128], strides = [1, 1]} : vector<8x512xf32> to vector<8x128xf32>
    %241 = arith.negf %240 : vector<8x128xf32>
    %242 = math.exp %241 : vector<8x128xf32>
    %cst_62 = arith.constant 1.000000e+00 : f32
    %243 = vector.broadcast %cst_62 : f32 to vector<8x128xf32>
    %244 = arith.addf %243, %242 : vector<8x128xf32>
    %245 = arith.divf %243, %244 : vector<8x128xf32>
    %246 = arith.mulf %237, %188 : vector<8x128xf32>
    %247 = arith.mulf %231, %239 : vector<8x128xf32>
    %248 = arith.addf %246, %247 : vector<8x128xf32>
    %249 = math.tanh %248 : vector<8x128xf32>
    %250 = arith.mulf %245, %249 : vector<8x128xf32>
    %c32 = arith.constant 32 : index
    %c0_63 = arith.constant 0 : index
    %251 = vector.load %arg15[%c32, %c0_63] : memref<64x512xf32, #tpu.memory_space<vmem>>, vector<8x512xf32>
    %252 = arith.truncf %220 : vector<8x128xf32> to vector<8x128xbf16>
    %c0_64 = arith.constant 0 : index
    %c0_65 = arith.constant 0 : index
    %253 = vector.load %arg2[%c0_64, %c0_65] : memref<128x512xbf16, #tpu.memory_space<vmem>>, vector<128x512xbf16>
    %cst_66 = arith.constant dense<0.000000e+00> : vector<8x512xf32>
    %254 = tpu.matmul %252, %253, %cst_66 {dimension_numbers = #tpu.dot_dimension_numbers<[1], [0], [0], [1], [0, 0, 1, 1], [], []>} : vector<8x128xbf16>, vector<128x512xbf16>, vector<8x512xf32> -> vector<8x512xf32>
    %255 = arith.addf %251, %254 : vector<8x512xf32>
    %256 = vector.extract_strided_slice %255 {offsets = [0, 0], sizes = [8, 128], strides = [1, 1]} : vector<8x512xf32> to vector<8x128xf32>
    %257 = arith.negf %256 : vector<8x128xf32>
    %258 = math.exp %257 : vector<8x128xf32>
    %cst_67 = arith.constant 1.000000e+00 : f32
    %259 = vector.broadcast %cst_67 : f32 to vector<8x128xf32>
    %260 = arith.addf %259, %258 : vector<8x128xf32>
    %261 = arith.divf %259, %260 : vector<8x128xf32>
    %262 = vector.extract_strided_slice %255 {offsets = [0, 128], sizes = [8, 128], strides = [1, 1]} : vector<8x512xf32> to vector<8x128xf32>
    %263 = arith.negf %262 : vector<8x128xf32>
    %264 = math.exp %263 : vector<8x128xf32>
    %cst_68 = arith.constant 1.000000e+00 : f32
    %265 = vector.broadcast %cst_68 : f32 to vector<8x128xf32>
    %266 = arith.addf %265, %264 : vector<8x128xf32>
    %267 = arith.divf %265, %266 : vector<8x128xf32>
    %268 = vector.extract_strided_slice %255 {offsets = [0, 256], sizes = [8, 128], strides = [1, 1]} : vector<8x512xf32> to vector<8x128xf32>
    %269 = math.tanh %268 : vector<8x128xf32>
    %270 = vector.extract_strided_slice %255 {offsets = [0, 384], sizes = [8, 128], strides = [1, 1]} : vector<8x512xf32> to vector<8x128xf32>
    %271 = arith.negf %270 : vector<8x128xf32>
    %272 = math.exp %271 : vector<8x128xf32>
    %cst_69 = arith.constant 1.000000e+00 : f32
    %273 = vector.broadcast %cst_69 : f32 to vector<8x128xf32>
    %274 = arith.addf %273, %272 : vector<8x128xf32>
    %275 = arith.divf %273, %274 : vector<8x128xf32>
    %276 = arith.mulf %267, %218 : vector<8x128xf32>
    %277 = arith.mulf %261, %269 : vector<8x128xf32>
    %278 = arith.addf %276, %277 : vector<8x128xf32>
    %279 = math.tanh %278 : vector<8x128xf32>
    %280 = arith.mulf %275, %279 : vector<8x128xf32>
    %281 = tpu.concatenate %280, %250 in 1 : vector<8x128xf32>, vector<8x128xf32> -> vector<8x256xf32>
    %282 = arith.truncf %281 : vector<8x256xf32> to vector<8x256xbf16>
    %c0_70 = arith.constant 0 : index
    %c0_71 = arith.constant 0 : index
    %283 = vector.load %arg4[%c0_70, %c0_71] : memref<256x512xbf16, #tpu.memory_space<vmem>>, vector<256x512xbf16>
    %cst_72 = arith.constant dense<0.000000e+00> : vector<8x512xf32>
    %284 = tpu.matmul %282, %283, %cst_72 {dimension_numbers = #tpu.dot_dimension_numbers<[1], [0], [0], [1], [0, 0, 1, 1], [], []>} : vector<8x256xbf16>, vector<256x512xbf16>, vector<8x512xf32> -> vector<8x512xf32>
    %285 = arith.addf %284, %9 : vector<8x512xf32>
    %286 = vector.extract_strided_slice %285 {offsets = [0, 0], sizes = [8, 128], strides = [1, 1]} : vector<8x512xf32> to vector<8x128xf32>
    %287 = arith.negf %286 : vector<8x128xf32>
    %288 = math.exp %287 : vector<8x128xf32>
    %cst_73 = arith.constant 1.000000e+00 : f32
    %289 = vector.broadcast %cst_73 : f32 to vector<8x128xf32>
    %290 = arith.addf %289, %288 : vector<8x128xf32>
    %291 = arith.divf %289, %290 : vector<8x128xf32>
    %292 = vector.extract_strided_slice %285 {offsets = [0, 128], sizes = [8, 128], strides = [1, 1]} : vector<8x512xf32> to vector<8x128xf32>
    %293 = arith.negf %292 : vector<8x128xf32>
    %294 = math.exp %293 : vector<8x128xf32>
    %cst_74 = arith.constant 1.000000e+00 : f32
    %295 = vector.broadcast %cst_74 : f32 to vector<8x128xf32>
    %296 = arith.addf %295, %294 : vector<8x128xf32>
    %297 = arith.divf %295, %296 : vector<8x128xf32>
    %298 = vector.extract_strided_slice %285 {offsets = [0, 256], sizes = [8, 128], strides = [1, 1]} : vector<8x512xf32> to vector<8x128xf32>
    %299 = math.tanh %298 : vector<8x128xf32>
    %300 = vector.extract_strided_slice %285 {offsets = [0, 384], sizes = [8, 128], strides = [1, 1]} : vector<8x512xf32> to vector<8x128xf32>
    %301 = arith.negf %300 : vector<8x128xf32>
    %302 = math.exp %301 : vector<8x128xf32>
    %cst_75 = arith.constant 1.000000e+00 : f32
    %303 = vector.broadcast %cst_75 : f32 to vector<8x128xf32>
    %304 = arith.addf %303, %302 : vector<8x128xf32>
    %305 = arith.divf %303, %304 : vector<8x128xf32>
    %306 = arith.mulf %297, %248 : vector<8x128xf32>
    %307 = arith.mulf %291, %299 : vector<8x128xf32>
    %308 = arith.addf %306, %307 : vector<8x128xf32>
    %309 = math.tanh %308 : vector<8x128xf32>
    %310 = arith.mulf %305, %309 : vector<8x128xf32>
    %c40 = arith.constant 40 : index
    %c0_76 = arith.constant 0 : index
    %311 = vector.load %arg15[%c40, %c0_76] : memref<64x512xf32, #tpu.memory_space<vmem>>, vector<8x512xf32>
    %312 = arith.truncf %280 : vector<8x128xf32> to vector<8x128xbf16>
    %c0_77 = arith.constant 0 : index
    %c0_78 = arith.constant 0 : index
    %313 = vector.load %arg2[%c0_77, %c0_78] : memref<128x512xbf16, #tpu.memory_space<vmem>>, vector<128x512xbf16>
    %cst_79 = arith.constant dense<0.000000e+00> : vector<8x512xf32>
    %314 = tpu.matmul %312, %313, %cst_79 {dimension_numbers = #tpu.dot_dimension_numbers<[1], [0], [0], [1], [0, 0, 1, 1], [], []>} : vector<8x128xbf16>, vector<128x512xbf16>, vector<8x512xf32> -> vector<8x512xf32>
    %315 = arith.addf %311, %314 : vector<8x512xf32>
    %316 = vector.extract_strided_slice %315 {offsets = [0, 0], sizes = [8, 128], strides = [1, 1]} : vector<8x512xf32> to vector<8x128xf32>
    %317 = arith.negf %316 : vector<8x128xf32>
    %318 = math.exp %317 : vector<8x128xf32>
    %cst_80 = arith.constant 1.000000e+00 : f32
    %319 = vector.broadcast %cst_80 : f32 to vector<8x128xf32>
    %320 = arith.addf %319, %318 : vector<8x128xf32>
    %321 = arith.divf %319, %320 : vector<8x128xf32>
    %322 = vector.extract_strided_slice %315 {offsets = [0, 128], sizes = [8, 128], strides = [1, 1]} : vector<8x512xf32> to vector<8x128xf32>
    %323 = arith.negf %322 : vector<8x128xf32>
    %324 = math.exp %323 : vector<8x128xf32>
    %cst_81 = arith.constant 1.000000e+00 : f32
    %325 = vector.broadcast %cst_81 : f32 to vector<8x128xf32>
    %326 = arith.addf %325, %324 : vector<8x128xf32>
    %327 = arith.divf %325, %326 : vector<8x128xf32>
    %328 = vector.extract_strided_slice %315 {offsets = [0, 256], sizes = [8, 128], strides = [1, 1]} : vector<8x512xf32> to vector<8x128xf32>
    %329 = math.tanh %328 : vector<8x128xf32>
    %330 = vector.extract_strided_slice %315 {offsets = [0, 384], sizes = [8, 128], strides = [1, 1]} : vector<8x512xf32> to vector<8x128xf32>
    %331 = arith.negf %330 : vector<8x128xf32>
    %332 = math.exp %331 : vector<8x128xf32>
    %cst_82 = arith.constant 1.000000e+00 : f32
    %333 = vector.broadcast %cst_82 : f32 to vector<8x128xf32>
    %334 = arith.addf %333, %332 : vector<8x128xf32>
    %335 = arith.divf %333, %334 : vector<8x128xf32>
    %336 = arith.mulf %327, %278 : vector<8x128xf32>
    %337 = arith.mulf %321, %329 : vector<8x128xf32>
    %338 = arith.addf %336, %337 : vector<8x128xf32>
    %339 = math.tanh %338 : vector<8x128xf32>
    %340 = arith.mulf %335, %339 : vector<8x128xf32>
    %341 = tpu.concatenate %340, %310 in 1 : vector<8x128xf32>, vector<8x128xf32> -> vector<8x256xf32>
    %342 = arith.truncf %341 : vector<8x256xf32> to vector<8x256xbf16>
    %c0_83 = arith.constant 0 : index
    %c0_84 = arith.constant 0 : index
    %343 = vector.load %arg4[%c0_83, %c0_84] : memref<256x512xbf16, #tpu.memory_space<vmem>>, vector<256x512xbf16>
    %cst_85 = arith.constant dense<0.000000e+00> : vector<8x512xf32>
    %344 = tpu.matmul %342, %343, %cst_85 {dimension_numbers = #tpu.dot_dimension_numbers<[1], [0], [0], [1], [0, 0, 1, 1], [], []>} : vector<8x256xbf16>, vector<256x512xbf16>, vector<8x512xf32> -> vector<8x512xf32>
    %345 = arith.addf %344, %9 : vector<8x512xf32>
    %346 = vector.extract_strided_slice %345 {offsets = [0, 0], sizes = [8, 128], strides = [1, 1]} : vector<8x512xf32> to vector<8x128xf32>
    %347 = arith.negf %346 : vector<8x128xf32>
    %348 = math.exp %347 : vector<8x128xf32>
    %cst_86 = arith.constant 1.000000e+00 : f32
    %349 = vector.broadcast %cst_86 : f32 to vector<8x128xf32>
    %350 = arith.addf %349, %348 : vector<8x128xf32>
    %351 = arith.divf %349, %350 : vector<8x128xf32>
    %352 = vector.extract_strided_slice %345 {offsets = [0, 128], sizes = [8, 128], strides = [1, 1]} : vector<8x512xf32> to vector<8x128xf32>
    %353 = arith.negf %352 : vector<8x128xf32>
    %354 = math.exp %353 : vector<8x128xf32>
    %cst_87 = arith.constant 1.000000e+00 : f32
    %355 = vector.broadcast %cst_87 : f32 to vector<8x128xf32>
    %356 = arith.addf %355, %354 : vector<8x128xf32>
    %357 = arith.divf %355, %356 : vector<8x128xf32>
    %358 = vector.extract_strided_slice %345 {offsets = [0, 256], sizes = [8, 128], strides = [1, 1]} : vector<8x512xf32> to vector<8x128xf32>
    %359 = math.tanh %358 : vector<8x128xf32>
    %360 = vector.extract_strided_slice %345 {offsets = [0, 384], sizes = [8, 128], strides = [1, 1]} : vector<8x512xf32> to vector<8x128xf32>
    %361 = arith.negf %360 : vector<8x128xf32>
    %362 = math.exp %361 : vector<8x128xf32>
    %cst_88 = arith.constant 1.000000e+00 : f32
    %363 = vector.broadcast %cst_88 : f32 to vector<8x128xf32>
    %364 = arith.addf %363, %362 : vector<8x128xf32>
    %365 = arith.divf %363, %364 : vector<8x128xf32>
    %366 = arith.mulf %357, %308 : vector<8x128xf32>
    %367 = arith.mulf %351, %359 : vector<8x128xf32>
    %368 = arith.addf %366, %367 : vector<8x128xf32>
    %369 = math.tanh %368 : vector<8x128xf32>
    %370 = arith.mulf %365, %369 : vector<8x128xf32>
    %c48 = arith.constant 48 : index
    %c0_89 = arith.constant 0 : index
    %371 = vector.load %arg15[%c48, %c0_89] : memref<64x512xf32, #tpu.memory_space<vmem>>, vector<8x512xf32>
    %372 = arith.truncf %340 : vector<8x128xf32> to vector<8x128xbf16>
    %c0_90 = arith.constant 0 : index
    %c0_91 = arith.constant 0 : index
    %373 = vector.load %arg2[%c0_90, %c0_91] : memref<128x512xbf16, #tpu.memory_space<vmem>>, vector<128x512xbf16>
    %cst_92 = arith.constant dense<0.000000e+00> : vector<8x512xf32>
    %374 = tpu.matmul %372, %373, %cst_92 {dimension_numbers = #tpu.dot_dimension_numbers<[1], [0], [0], [1], [0, 0, 1, 1], [], []>} : vector<8x128xbf16>, vector<128x512xbf16>, vector<8x512xf32> -> vector<8x512xf32>
    %375 = arith.addf %371, %374 : vector<8x512xf32>
    %376 = vector.extract_strided_slice %375 {offsets = [0, 0], sizes = [8, 128], strides = [1, 1]} : vector<8x512xf32> to vector<8x128xf32>
    %377 = arith.negf %376 : vector<8x128xf32>
    %378 = math.exp %377 : vector<8x128xf32>
    %cst_93 = arith.constant 1.000000e+00 : f32
    %379 = vector.broadcast %cst_93 : f32 to vector<8x128xf32>
    %380 = arith.addf %379, %378 : vector<8x128xf32>
    %381 = arith.divf %379, %380 : vector<8x128xf32>
    %382 = vector.extract_strided_slice %375 {offsets = [0, 128], sizes = [8, 128], strides = [1, 1]} : vector<8x512xf32> to vector<8x128xf32>
    %383 = arith.negf %382 : vector<8x128xf32>
    %384 = math.exp %383 : vector<8x128xf32>
    %cst_94 = arith.constant 1.000000e+00 : f32
    %385 = vector.broadcast %cst_94 : f32 to vector<8x128xf32>
    %386 = arith.addf %385, %384 : vector<8x128xf32>
    %387 = arith.divf %385, %386 : vector<8x128xf32>
    %388 = vector.extract_strided_slice %375 {offsets = [0, 256], sizes = [8, 128], strides = [1, 1]} : vector<8x512xf32> to vector<8x128xf32>
    %389 = math.tanh %388 : vector<8x128xf32>
    %390 = vector.extract_strided_slice %375 {offsets = [0, 384], sizes = [8, 128], strides = [1, 1]} : vector<8x512xf32> to vector<8x128xf32>
    %391 = arith.negf %390 : vector<8x128xf32>
    %392 = math.exp %391 : vector<8x128xf32>
    %cst_95 = arith.constant 1.000000e+00 : f32
    %393 = vector.broadcast %cst_95 : f32 to vector<8x128xf32>
    %394 = arith.addf %393, %392 : vector<8x128xf32>
    %395 = arith.divf %393, %394 : vector<8x128xf32>
    %396 = arith.mulf %387, %338 : vector<8x128xf32>
    %397 = arith.mulf %381, %389 : vector<8x128xf32>
    %398 = arith.addf %396, %397 : vector<8x128xf32>
    %399 = math.tanh %398 : vector<8x128xf32>
    %400 = arith.mulf %395, %399 : vector<8x128xf32>
    %401 = tpu.concatenate %400, %370 in 1 : vector<8x128xf32>, vector<8x128xf32> -> vector<8x256xf32>
    %402 = arith.truncf %401 : vector<8x256xf32> to vector<8x256xbf16>
    %c0_96 = arith.constant 0 : index
    %c0_97 = arith.constant 0 : index
    %403 = vector.load %arg4[%c0_96, %c0_97] : memref<256x512xbf16, #tpu.memory_space<vmem>>, vector<256x512xbf16>
    %cst_98 = arith.constant dense<0.000000e+00> : vector<8x512xf32>
    %404 = tpu.matmul %402, %403, %cst_98 {dimension_numbers = #tpu.dot_dimension_numbers<[1], [0], [0], [1], [0, 0, 1, 1], [], []>} : vector<8x256xbf16>, vector<256x512xbf16>, vector<8x512xf32> -> vector<8x512xf32>
    %405 = arith.addf %404, %9 : vector<8x512xf32>
    %406 = vector.extract_strided_slice %405 {offsets = [0, 0], sizes = [8, 128], strides = [1, 1]} : vector<8x512xf32> to vector<8x128xf32>
    %407 = arith.negf %406 : vector<8x128xf32>
    %408 = math.exp %407 : vector<8x128xf32>
    %cst_99 = arith.constant 1.000000e+00 : f32
    %409 = vector.broadcast %cst_99 : f32 to vector<8x128xf32>
    %410 = arith.addf %409, %408 : vector<8x128xf32>
    %411 = arith.divf %409, %410 : vector<8x128xf32>
    %412 = vector.extract_strided_slice %405 {offsets = [0, 128], sizes = [8, 128], strides = [1, 1]} : vector<8x512xf32> to vector<8x128xf32>
    %413 = arith.negf %412 : vector<8x128xf32>
    %414 = math.exp %413 : vector<8x128xf32>
    %cst_100 = arith.constant 1.000000e+00 : f32
    %415 = vector.broadcast %cst_100 : f32 to vector<8x128xf32>
    %416 = arith.addf %415, %414 : vector<8x128xf32>
    %417 = arith.divf %415, %416 : vector<8x128xf32>
    %418 = vector.extract_strided_slice %405 {offsets = [0, 256], sizes = [8, 128], strides = [1, 1]} : vector<8x512xf32> to vector<8x128xf32>
    %419 = math.tanh %418 : vector<8x128xf32>
    %420 = vector.extract_strided_slice %405 {offsets = [0, 384], sizes = [8, 128], strides = [1, 1]} : vector<8x512xf32> to vector<8x128xf32>
    %421 = arith.negf %420 : vector<8x128xf32>
    %422 = math.exp %421 : vector<8x128xf32>
    %cst_101 = arith.constant 1.000000e+00 : f32
    %423 = vector.broadcast %cst_101 : f32 to vector<8x128xf32>
    %424 = arith.addf %423, %422 : vector<8x128xf32>
    %425 = arith.divf %423, %424 : vector<8x128xf32>
    %426 = arith.mulf %417, %368 : vector<8x128xf32>
    %427 = arith.mulf %411, %419 : vector<8x128xf32>
    %428 = arith.addf %426, %427 : vector<8x128xf32>
    %429 = math.tanh %428 : vector<8x128xf32>
    %430 = arith.mulf %425, %429 : vector<8x128xf32>
    %c56 = arith.constant 56 : index
    %c0_102 = arith.constant 0 : index
    %431 = vector.load %arg15[%c56, %c0_102] : memref<64x512xf32, #tpu.memory_space<vmem>>, vector<8x512xf32>
    %432 = arith.truncf %400 : vector<8x128xf32> to vector<8x128xbf16>
    %c0_103 = arith.constant 0 : index
    %c0_104 = arith.constant 0 : index
    %433 = vector.load %arg2[%c0_103, %c0_104] : memref<128x512xbf16, #tpu.memory_space<vmem>>, vector<128x512xbf16>
    %cst_105 = arith.constant dense<0.000000e+00> : vector<8x512xf32>
    %434 = tpu.matmul %432, %433, %cst_105 {dimension_numbers = #tpu.dot_dimension_numbers<[1], [0], [0], [1], [0, 0, 1, 1], [], []>} : vector<8x128xbf16>, vector<128x512xbf16>, vector<8x512xf32> -> vector<8x512xf32>
    %435 = arith.addf %431, %434 : vector<8x512xf32>
    %436 = vector.extract_strided_slice %435 {offsets = [0, 0], sizes = [8, 128], strides = [1, 1]} : vector<8x512xf32> to vector<8x128xf32>
    %437 = arith.negf %436 : vector<8x128xf32>
    %438 = math.exp %437 : vector<8x128xf32>
    %cst_106 = arith.constant 1.000000e+00 : f32
    %439 = vector.broadcast %cst_106 : f32 to vector<8x128xf32>
    %440 = arith.addf %439, %438 : vector<8x128xf32>
    %441 = arith.divf %439, %440 : vector<8x128xf32>
    %442 = vector.extract_strided_slice %435 {offsets = [0, 128], sizes = [8, 128], strides = [1, 1]} : vector<8x512xf32> to vector<8x128xf32>
    %443 = arith.negf %442 : vector<8x128xf32>
    %444 = math.exp %443 : vector<8x128xf32>
    %cst_107 = arith.constant 1.000000e+00 : f32
    %445 = vector.broadcast %cst_107 : f32 to vector<8x128xf32>
    %446 = arith.addf %445, %444 : vector<8x128xf32>
    %447 = arith.divf %445, %446 : vector<8x128xf32>
    %448 = vector.extract_strided_slice %435 {offsets = [0, 256], sizes = [8, 128], strides = [1, 1]} : vector<8x512xf32> to vector<8x128xf32>
    %449 = math.tanh %448 : vector<8x128xf32>
    %450 = vector.extract_strided_slice %435 {offsets = [0, 384], sizes = [8, 128], strides = [1, 1]} : vector<8x512xf32> to vector<8x128xf32>
    %451 = arith.negf %450 : vector<8x128xf32>
    %452 = math.exp %451 : vector<8x128xf32>
    %cst_108 = arith.constant 1.000000e+00 : f32
    %453 = vector.broadcast %cst_108 : f32 to vector<8x128xf32>
    %454 = arith.addf %453, %452 : vector<8x128xf32>
    %455 = arith.divf %453, %454 : vector<8x128xf32>
    %456 = arith.mulf %447, %398 : vector<8x128xf32>
    %457 = arith.mulf %441, %449 : vector<8x128xf32>
    %458 = arith.addf %456, %457 : vector<8x128xf32>
    %459 = math.tanh %458 : vector<8x128xf32>
    %460 = arith.mulf %455, %459 : vector<8x128xf32>
    %461 = tpu.concatenate %460, %430 in 1 : vector<8x128xf32>, vector<8x128xf32> -> vector<8x256xf32>
    %462 = arith.truncf %461 : vector<8x256xf32> to vector<8x256xbf16>
    %c0_109 = arith.constant 0 : index
    %c0_110 = arith.constant 0 : index
    %463 = vector.load %arg4[%c0_109, %c0_110] : memref<256x512xbf16, #tpu.memory_space<vmem>>, vector<256x512xbf16>
    %cst_111 = arith.constant dense<0.000000e+00> : vector<8x512xf32>
    %464 = tpu.matmul %462, %463, %cst_111 {dimension_numbers = #tpu.dot_dimension_numbers<[1], [0], [0], [1], [0, 0, 1, 1], [], []>} : vector<8x256xbf16>, vector<256x512xbf16>, vector<8x512xf32> -> vector<8x512xf32>
    %465 = arith.addf %464, %9 : vector<8x512xf32>
    %466 = vector.extract_strided_slice %465 {offsets = [0, 0], sizes = [8, 128], strides = [1, 1]} : vector<8x512xf32> to vector<8x128xf32>
    %467 = arith.negf %466 : vector<8x128xf32>
    %468 = math.exp %467 : vector<8x128xf32>
    %cst_112 = arith.constant 1.000000e+00 : f32
    %469 = vector.broadcast %cst_112 : f32 to vector<8x128xf32>
    %470 = arith.addf %469, %468 : vector<8x128xf32>
    %471 = arith.divf %469, %470 : vector<8x128xf32>
    %472 = vector.extract_strided_slice %465 {offsets = [0, 128], sizes = [8, 128], strides = [1, 1]} : vector<8x512xf32> to vector<8x128xf32>
    %473 = arith.negf %472 : vector<8x128xf32>
    %474 = math.exp %473 : vector<8x128xf32>
    %cst_113 = arith.constant 1.000000e+00 : f32
    %475 = vector.broadcast %cst_113 : f32 to vector<8x128xf32>
    %476 = arith.addf %475, %474 : vector<8x128xf32>
    %477 = arith.divf %475, %476 : vector<8x128xf32>
    %478 = vector.extract_strided_slice %465 {offsets = [0, 256], sizes = [8, 128], strides = [1, 1]} : vector<8x512xf32> to vector<8x128xf32>
    %479 = math.tanh %478 : vector<8x128xf32>
    %480 = vector.extract_strided_slice %465 {offsets = [0, 384], sizes = [8, 128], strides = [1, 1]} : vector<8x512xf32> to vector<8x128xf32>
    %481 = arith.negf %480 : vector<8x128xf32>
    %482 = math.exp %481 : vector<8x128xf32>
    %cst_114 = arith.constant 1.000000e+00 : f32
    %483 = vector.broadcast %cst_114 : f32 to vector<8x128xf32>
    %484 = arith.addf %483, %482 : vector<8x128xf32>
    %485 = arith.divf %483, %484 : vector<8x128xf32>
    %486 = arith.mulf %477, %428 : vector<8x128xf32>
    %487 = arith.mulf %471, %479 : vector<8x128xf32>
    %488 = arith.addf %486, %487 : vector<8x128xf32>
    %489 = math.tanh %488 : vector<8x128xf32>
    %490 = arith.mulf %485, %489 : vector<8x128xf32>
    %491 = arith.truncf %490 : vector<8x128xf32> to vector<8x128xbf16>
    %c0_115 = arith.constant 0 : index
    %c0_116 = arith.constant 0 : index
    %492 = vector.load %arg6[%c0_115, %c0_116] : memref<128x128xbf16, #tpu.memory_space<vmem>>, vector<128x128xbf16>
    %cst_117 = arith.constant dense<0.000000e+00> : vector<8x128xf32>
    %493 = tpu.matmul %491, %492, %cst_117 {dimension_numbers = #tpu.dot_dimension_numbers<[1], [0], [0], [1], [0, 0, 1, 1], [], []>} : vector<8x128xbf16>, vector<128x128xbf16>, vector<8x128xf32> -> vector<8x128xf32>
    %c0_118 = arith.constant 0 : index
    %c0_119 = arith.constant 0 : index
    %494 = vector.load %arg7[%c0_118, %c0_119] : memref<1x128xf32, #tpu.memory_space<vmem>>, vector<1x128xf32>
    %495 = vector.broadcast %494 : vector<1x128xf32> to vector<8x128xf32>
    %496 = arith.addf %493, %495 : vector<8x128xf32>
    %cst_120 = arith.constant 0.000000e+00 : f32
    %497 = vector.broadcast %cst_120 : f32 to vector<8x128xf32>
    %498 = arith.maximumf %496, %497 : vector<8x128xf32>
    %499 = arith.truncf %498 : vector<8x128xf32> to vector<8x128xbf16>
    %c0_121 = arith.constant 0 : index
    %c0_122 = arith.constant 0 : index
    %500 = vector.load %arg8[%c0_121, %c0_122] : memref<128x128xbf16, #tpu.memory_space<vmem>>, vector<128x128xbf16>
    %cst_123 = arith.constant dense<0.000000e+00> : vector<8x128xf32>
    %501 = tpu.matmul %499, %500, %cst_123 {dimension_numbers = #tpu.dot_dimension_numbers<[1], [0], [0], [1], [0, 0, 1, 1], [], []>} : vector<8x128xbf16>, vector<128x128xbf16>, vector<8x128xf32> -> vector<8x128xf32>
    %c0_124 = arith.constant 0 : index
    %c0_125 = arith.constant 0 : index
    %502 = vector.load %arg9[%c0_124, %c0_125] : memref<1x128xf32, #tpu.memory_space<vmem>>, vector<1x128xf32>
    %503 = vector.broadcast %502 : vector<1x128xf32> to vector<8x128xf32>
    %504 = arith.addf %501, %503 : vector<8x128xf32>
    %cst_126 = arith.constant 0.000000e+00 : f32
    %505 = vector.broadcast %cst_126 : f32 to vector<8x128xf32>
    %506 = arith.maximumf %504, %505 : vector<8x128xf32>
    %507 = arith.truncf %506 : vector<8x128xf32> to vector<8x128xbf16>
    %c0_127 = arith.constant 0 : index
    %c0_128 = arith.constant 0 : index
    %508 = vector.load %arg10[%c0_127, %c0_128] : memref<128x128xbf16, #tpu.memory_space<vmem>>, vector<128x128xbf16>
    %cst_129 = arith.constant dense<0.000000e+00> : vector<8x128xf32>
    %509 = tpu.matmul %507, %508, %cst_129 {dimension_numbers = #tpu.dot_dimension_numbers<[1], [0], [0], [1], [0, 0, 1, 1], [], []>} : vector<8x128xbf16>, vector<128x128xbf16>, vector<8x128xf32> -> vector<8x128xf32>
    %c0_130 = arith.constant 0 : index
    %c0_131 = arith.constant 0 : index
    %510 = vector.load %arg11[%c0_130, %c0_131] : memref<1x128xf32, #tpu.memory_space<vmem>>, vector<1x128xf32>
    %511 = vector.broadcast %510 : vector<1x128xf32> to vector<8x128xf32>
    %512 = arith.addf %509, %511 : vector<8x128xf32>
    %cst_132 = arith.constant 0.000000e+00 : f32
    %513 = vector.broadcast %cst_132 : f32 to vector<8x128xf32>
    %514 = arith.maximumf %512, %513 : vector<8x128xf32>
    %515 = arith.truncf %514 : vector<8x128xf32> to vector<8x128xbf16>
    %c0_133 = arith.constant 0 : index
    %c0_134 = arith.constant 0 : index
    %516 = vector.load %arg12[%c0_133, %c0_134] : memref<128x128xbf16, #tpu.memory_space<vmem>>, vector<128x128xbf16>
    %cst_135 = arith.constant dense<0.000000e+00> : vector<8x128xf32>
    %517 = tpu.matmul %515, %516, %cst_135 {dimension_numbers = #tpu.dot_dimension_numbers<[1], [0], [0], [1], [0, 0, 1, 1], [], []>} : vector<8x128xbf16>, vector<128x128xbf16>, vector<8x128xf32> -> vector<8x128xf32>
    %c0_136 = arith.constant 0 : index
    %c0_137 = arith.constant 0 : index
    %518 = vector.load %arg13[%c0_136, %c0_137] : memref<1x128xf32, #tpu.memory_space<vmem>>, vector<1x128xf32>
    %519 = vector.broadcast %518 : vector<1x128xf32> to vector<8x128xf32>
    %520 = arith.addf %517, %519 : vector<8x128xf32>
    %c0_138 = arith.constant 0 : index
    %c0_139 = arith.constant 0 : index
    %521 = vector.load %arg14[%c0_138, %c0_139] : memref<8x128xf32, #tpu.memory_space<vmem>>, vector<8x128xf32>
    tpu.vector_store %arg14[%c0_138, %c0_139], %520 {strides = array<i32>} : memref<8x128xf32, #tpu.memory_space<vmem>>, vector<8x128xf32>,
    return
  }
}

</mosaic_0001>

<bundles_post_ra>
// kernel: tpu_custom_call.1
= control target key start
LH: loop header
LB: loop body
LE: loop exit
PB: predicated region body
PF: predicated region fallthrough
CT: control target
= control target key end

     0   :  { %19 = vsyncpa [#allocation4], 0  ;;  %s6302_s0 = inlined_call_operand.vmem [shape: bf16[64,32], index: 0, kind: input, shape index: {}]   ;;  %s6303_s1 = inlined_call_operand.hbm [shape: bf16[32,512], index: 1, kind: input, shape index: {}]   ;;  %s6304_s2 = inlined_call_operand.hbm [shape: bf16[128,512], index: 2, kind: input, shape index: {}]   ;;  %s6305_s3 = inlined_call_operand.hbm [shape: f32[1,512], index: 3, kind: input, shape index: {}]   ;;  %s6306_s4 = inlined_call_operand.hbm [shape: bf16[256,512], index: 4, kind: input, shape index: {}]   ;;  %s6307_s5 = inlined_call_operand.hbm [shape: f32[1,512], index: 5, kind: input, shape index: {}]   ;;  %s6308_s6 = inlined_call_operand.hbm [shape: bf16[128,128], index: 6, kind: input, shape index: {}]   ;;  %s6309_s7 = inlined_call_operand.vmem [shape: f32[1,128], index: 7, kind: input, shape index: {}]   ;;  %s6310_s8 = inlined_call_operand.hbm [shape: bf16[128,128], index: 8, kind: input, shape index: {}]   ;;  %s6311_s9 = inlined_call_operand.vmem [shape: f32[1,128], index: 9, kind: input, shape index: {}]   ;;  %s6312_s10 = inlined_call_operand.vmem [shape: bf16[128,128], index: 10, kind: input, shape index: {}]   ;;  %s6313_s11 = inlined_call_operand.vmem [shape: f32[1,128], index: 11, kind: input, shape index: {}]   ;;  %s6314_s12 = inlined_call_operand.hbm [shape: bf16[128,128], index: 12, kind: input, shape index: {}]   ;;  %s6315_s13 = inlined_call_operand.vmem [shape: f32[1,128], index: 13, kind: input, shape index: {}]   ;;  %s6316_s14 = inlined_call_operand.hbm [shape: f32[8,128], index: 14, kind: output, shape index: {}]  }
   0x1   :  { %20 = vsyncpa [#allocation7], 0 }
   0x2   :  { %21 = vsyncpa [#allocation10], 0 }
   0x3   :  { %22 = vsyncpa [#allocation13], 0 }
   0x4   :  { %23 = vsyncpa [#allocation16], 0 }
   0x5   :  { %24 = vsyncpa [#allocation5], 0  ;;  %s4453_s29 = smov [#allocation6]   ;;  %s4454_s15 = smov [#allocation9]  }
   0x6   :  { %s44_s30 = sshll.u32 %s4453_s29, 4  ;;  %s66_s16 = sshll.u32 %s4454_s15, 4  ;;  %s45_s30 = int_to_ptr.vmem [resolvable:$true] %s44_s30  ;;  %s67_s16 = int_to_ptr.vmem [resolvable:$true] %s66_s16 }
   0x7   :  { %s4269_s17 = scalar_lea.vmem %s45_s30, 4096  ;;  %p4274_p1 = scmp.lt.s32.totalorder %s45_s30, %s45_s30 }
   0x8   :  { %p4270_p0 = scmp.ne.s32.totalorder %s45_s30, %s4269_s17  ;;  %p4275_p2 = scmp.lt.s32.totalorder %s4269_s17, %s4269_s17 }
   0xa   :  { %p4276_p3 = por %p4275_p2, %p4274_p1 }
   0xc   :  { %p4277_p4 = pnand %p4276_p3, %p4270_p0 }
   0xe   :  { %4280 = shalt.err (!%p4277_p4)
}
   0xf   :  { %s4455_s18 = smov 256   ;;  %s4456_s19 = smov 16  }
  0x10   :  { %50 = dma.hbm_to_vmem [thread:$0]  %s6304_s2, 4096, %s45_s30, [#allocation7], %s4455_s18, %s4455_s18, %s4456_s19  }
  0x11   :  { %s4289_s22 = scalar_lea.vmem %s67_s16, 8192  ;;  %p4294_p6 = scmp.lt.s32.totalorder %s67_s16, %s67_s16 }
  0x12   :  { %p4290_p5 = scmp.ne.s32.totalorder %s67_s16, %s4289_s22  ;;  %p4295_p7 = scmp.lt.s32.totalorder %s4289_s22, %s4289_s22 }
  0x14   :  { %p4296_p8 = por %p4295_p7, %p4294_p6 }
  0x16   :  { %p4297_p9 = pnand %p4296_p8, %p4290_p5 }
  0x18   :  { %4300 = shalt.err (!%p4297_p9)
}
  0x19   :  { %72 = dma.hbm_to_vmem [thread:$0]  %s6306_s4, 8192, %s67_s16, [#allocation10], %s4455_s18, %s4455_s18, %s4456_s19  }
  0x1a   :  { %s4457_s25 = smov [#allocation12]  }
  0x1b   :  { %s88_s26 = sshll.u32 %s4457_s25, 4  ;;  %s89_s26 = int_to_ptr.vmem [resolvable:$true] %s88_s26 }
  0x1c   :  { %s4309_s27 = scalar_lea.vmem %s89_s26, 1024  ;;  %p4314_p11 = scmp.lt.s32.totalorder %s89_s26, %s89_s26 }
  0x1d   :  { %p4310_p10 = scmp.ne.s32.totalorder %s89_s26, %s4309_s27  ;;  %p4315_p12 = scmp.lt.s32.totalorder %s4309_s27, %s4309_s27 }
  0x1f   :  { %p4316_p13 = por %p4315_p12, %p4314_p11 }
  0x21   :  { %p4317_p0 = pnand %p4316_p13, %p4310_p10 }
  0x23   :  { %4320 = shalt.err (!%p4317_p0)
}
  0x24   :  { %s4458_s2 = smov 64   ;;  %s4459_s28 = smov 4  }
  0x25   :  { %94 = dma.hbm_to_vmem [thread:$0]  %s6308_s6, 1024, %s89_s26, [#allocation13], %s4458_s2, %s4458_s2, %s4459_s28  }
  0x26   :  { %s4460_s4 = smov [#allocation3]   ;;  %s4461_s16 = smov [#allocation8]  }
  0x27   :  { %s32_s15 = sshll.u32 %s4460_s4, 4  ;;  %s57_s17 = sshll.u32 %s4461_s16, 4  ;;  %s33_s15 = int_to_ptr.vmem [resolvable:$true] %s32_s15  ;;  %s58_s17 = int_to_ptr.vmem [resolvable:$true] %s57_s17 }
  0x28   :  { %s4329_s20 = scalar_lea.vmem %s33_s15, 1024  ;;  %p4334_p2 = scmp.lt.s32.totalorder %s33_s15, %s33_s15 }
  0x29   :  { %p4330_p1 = scmp.ne.s32.totalorder %s33_s15, %s4329_s20  ;;  %p4335_p3 = scmp.lt.s32.totalorder %s4329_s20, %s4329_s20 }
  0x2b   :  { %p4336_p4 = por %p4335_p3, %p4334_p2 }
  0x2d   :  { %p4337_p5 = pnand %p4336_p4, %p4330_p1 }
  0x2f   :  { %4340 = shalt.err (!%p4337_p5)
}
  0x30   :  { %38 = dma.hbm_to_vmem [thread:$0]  %s6303_s1, 1024, %s33_s15, [#allocation4], %s4455_s18, %s4455_s18, %s4456_s19  }
  0x31   :  { %s4349_s6 = scalar_lea.vmem %s58_s17, 64  ;;  %p4354_p7 = scmp.lt.s32.totalorder %s58_s17, %s58_s17 }
  0x32   :  { %p4350_p6 = scmp.ne.s32.totalorder %s58_s17, %s4349_s6  ;;  %p4355_p8 = scmp.lt.s32.totalorder %s4349_s6, %s4349_s6 }
  0x34   :  { %p4356_p9 = por %p4355_p8, %p4354_p7 }
  0x36   :  { %p4357_p10 = pnand %p4356_p9, %p4350_p6 }
  0x38   :  { %4360 = shalt.err (!%p4357_p10)
}
  0x39   :  { %60 = dma.hbm_to_vmem [thread:$0]  %s6305_s3, 64, %s58_s17, [#allocation7]  }
  0x3a   :  { %s4462_s25 = smov [#allocation11]   ;;  %s4463_s27 = smov [#allocation14]  }
  0x3b   :  { %s79_s26 = sshll.u32 %s4462_s25, 4  ;;  %s102_s29 = sshll.u32 %s4463_s27, 4  ;;  %s80_s26 = int_to_ptr.vmem [resolvable:$true] %s79_s26  ;;  %s103_s29 = int_to_ptr.vmem [resolvable:$true] %s102_s29 }
  0x3c   :  { %s4369_s30 = scalar_lea.vmem %s80_s26, 64  ;;  %p4374_p12 = scmp.lt.s32.totalorder %s80_s26, %s80_s26 }
  0x3d   :  { %p4370_p11 = scmp.ne.s32.totalorder %s80_s26, %s4369_s30  ;;  %p4375_p13 = scmp.lt.s32.totalorder %s4369_s30, %s4369_s30 }
  0x3f   :  { %p4376_p0 = por %p4375_p13, %p4374_p12 }
  0x41   :  { %p4377_p1 = pnand %p4376_p0, %p4370_p11 }
  0x43   :  { %4380 = shalt.err (!%p4377_p1)
}
  0x44   :  { %82 = dma.hbm_to_vmem [thread:$0]  %s6307_s5, 64, %s80_s26, [#allocation10]  }
  0x45   :  { %s4389_s19 = scalar_lea.vmem %s103_s29, 1024  ;;  %p4394_p3 = scmp.lt.s32.totalorder %s103_s29, %s103_s29 }
  0x46   :  { %p4390_p2 = scmp.ne.s32.totalorder %s103_s29, %s4389_s19  ;;  %p4395_p4 = scmp.lt.s32.totalorder %s4389_s19, %s4389_s19 }
  0x48   :  { %p4396_p5 = por %p4395_p4, %p4394_p3 }
  0x4a   :  { %p4397_p6 = pnand %p4396_p5, %p4390_p2 }
  0x4c   :  { %4400 = shalt.err (!%p4397_p6)
}
  0x4d   :  { %108 = dma.hbm_to_vmem [thread:$0]  %s6310_s8, 1024, %s103_s29, [#allocation13], %s4458_s2, %s4458_s2, %s4459_s28  }
  0x4e   :  { %s4464_s15 = smov [#allocation15]  }
  0x4f   :  { %s120_s16 = sshll.u32 %s4464_s15, 4  ;;  %s121_s16 = int_to_ptr.vmem [resolvable:$true] %s120_s16 }
  0x50   :  { %s4409_s17 = scalar_lea.vmem %s121_s16, 1024  ;;  %p4414_p8 = scmp.lt.s32.totalorder %s121_s16, %s121_s16 }
  0x51   :  { %p4410_p7 = scmp.ne.s32.totalorder %s121_s16, %s4409_s17  ;;  %p4415_p9 = scmp.lt.s32.totalorder %s4409_s17, %s4409_s17 }
  0x53   :  { %p4416_p10 = por %p4415_p9, %p4414_p8 }
  0x55   :  { %p4417_p11 = pnand %p4416_p10, %p4410_p7 }
  0x57   :  { %4420 = shalt.err (!%p4417_p11)
}
  0x58   :  { %126 = dma.hbm_to_vmem [thread:$0]  %s6314_s12, 1024, %s121_s16, [#allocation16], %s4458_s2, %s4458_s2, %s4459_s28  }
  0x59   :  { %4441 = dma.done.wait [#allocation4], 1024  }
  0x5a   :  { %4442 = vsyncadd [#allocation4], 4294966272 }
  0x5b   :  { %4443 = dma.done.wait [#allocation7], 4160  }
  0x5c   :  { %4444 = vsyncadd [#allocation7], 4294963136 }
  0x5d   :  { %4445 = dma.done.wait [#allocation10], 8256  }
  0x5e   :  { %4446 = vsyncadd [#allocation10], 4294959040 }
  0x5f   :  { %4447 = dma.done.wait [#allocation13], 2048  }
  0x60   :  { %4448 = vsyncadd [#allocation13], 4294965248 }
  0x61   :  { %4449 = dma.done.wait [#allocation16], 1024  }
  0x62   :  { %4450 = vsyncadd [#allocation16], 4294966272  ;;  %v6317_v0 = vmov 0   ;;  %v3621_v1 = vld [vmem:[#allocation3 + $0x24] ss:$16 sps:$4 sm:$0xff]   ;;  %vm252_vm0 = vcmask 261120  }
  0x63   :  { %297 = vmatprep.mubr.bf16.mxu0 %v6317_v0  ;;  %370 = vmatprep.mubr.bf16.mxu1 %v6317_v0  ;;  %v3623_v2 = vld [vmem:[#allocation3 + $0x2c] ss:$16 sps:$4 sm:$0xff]   ;;  %v3625_v3 = vld [vmem:[#allocation3 + $0x20] ss:$16 sps:$4 sm:$0xff]   ;;  %v3626_v4 = vld [vmem:[#allocation3 + $0x28] ss:$16 sps:$4 sm:$0xff]  }
  0x64   :  { %277 = vmatprep.subr.bf16.mxu0 %v3621_v1  ;;  %350 = vmatprep.subr.bf16.mxu1 %v3623_v2  ;;  %v3627_v5 = vld [vmem:[#allocation3 + $0x4] ss:$16 sps:$4 sm:$0xff]   ;;  %v3629_v6 = vld [vmem:[#allocation3 + $0xc] ss:$16 sps:$4 sm:$0xff]   ;;  %v3631_v7 = vld [vmem:[#allocation3] ss:$16 sps:$4 sm:$0xff]  }
  0x65   :  { %278 = vmatpush1.bf16.msra.mxu0 %v3625_v3  ;;  %351 = vmatpush1.bf16.msra.mxu1 %v3626_v4  ;;  %v3632_v8 = vld [vmem:[#allocation3 + $0x8] ss:$16 sps:$4 sm:$0xff]   ;;  %v3633_v9 = vld [vmem:[%s6302_s0] sm:$0xff]   ;;  %v4594_v11 = vld [vmem:[#allocation6 + $0xec] ss:$16 sps:$4 sm:$0xff]   ;;  %vm4468_vm1 = vmmov 0  }
  0x66   :  { %279 = vmatprep.subr.bf16.mxu0 %v3627_v5  ;;  %352 = vmatprep.subr.bf16.mxu1 %v3629_v6  ;;  %v4592_v10 = vld [vmem:[#allocation6 + $0xe4] ss:$16 sps:$4 sm:$0xff]   ;;  %v4596_v12 = vld [vmem:[#allocation6 + $0xe0] ss:$16 sps:$4 sm:$0xff]   ;;  %v4598_v13 = vld [vmem:[#allocation6 + $0xe8] ss:$16 sps:$4 sm:$0xff]  }
  0x67   :  { %v4601_v14 = vld [vmem:[#allocation6 + $0xc4] ss:$16 sps:$4 sm:$0xff]   ;;  %v4604_v15 = vld [vmem:[#allocation6 + $0xcc] ss:$16 sps:$4 sm:$0xff]   ;;  %v4608_v16 = vld [vmem:[#allocation6 + $0xc0] ss:$16 sps:$4 sm:$0xff]  }
  0x68   :  { %v4612_v17 = vld [vmem:[#allocation6 + $0xc8] ss:$16 sps:$4 sm:$0xff]   ;;  %v4616_v18 = vld [vmem:[#allocation6 + $0xa4] ss:$16 sps:$4 sm:$0xff]   ;;  %v4623_v20 = vld [vmem:[#allocation6 + $0xac] ss:$16 sps:$4 sm:$0xff]  }
  0x69   :  { %280 = vmatpush1.bf16.msra.mxu0 %v3631_v7  ;;  %353 = vmatpush1.bf16.msra.mxu1 %v3632_v8  ;;  %v3646_v19 = vld [vmem:[%s6302_s0 + $0x8] sm:$0xff]   ;;  %v4625_v21 = vld [vmem:[#allocation6 + $0xa0] ss:$16 sps:$4 sm:$0xff]   ;;  %v4633_v23 = vld [vmem:[#allocation6 + $0x84] ss:$16 sps:$4 sm:$0xff]   ;;  %s4469_s21 = smov [#allocation17]  }
  0x6a   :  { %661 = vmatprep.subr.bf16.mxu0 %v4592_v10  ;;  %702 = vmatprep.subr.bf16.mxu1 %v4594_v11  ;;  %v4629_v22 = vld [vmem:[#allocation6 + $0xa8] ss:$16 sps:$4 sm:$0xff]   ;;  %v4635_v24 = vld [vmem:[#allocation6 + $0x8c] ss:$16 sps:$4 sm:$0xff]   ;;  %v4639_v25 = vld [vmem:[#allocation6 + $0x80] ss:$16 sps:$4 sm:$0xff]  }
  0x6b   :  { %v4643_v26 = vld [vmem:[#allocation6 + $0x88] ss:$16 sps:$4 sm:$0xff]   ;;  %v4647_v27 = vld [vmem:[#allocation6 + $0x64] ss:$16 sps:$4 sm:$0xff]   ;;  %v4649_v28 = vld [vmem:[#allocation6 + $0x6c] ss:$16 sps:$4 sm:$0xff]  }
  0x6c   :  { %3300 = vmatmul.mubr.msk.bf16.vlgmr.msra.gmra.mxu0 %vm252_vm0, %v3633_v9  ;;  %3304 = vmatmul.mubr.msk.bf16.vlgmr.msra.gmra.mxu1 %vm252_vm0, %v3633_v9  ;;  %v3659_v29 = vld [vmem:[%s6302_s0 + $0x10] sm:$0xff]   ;;  %v4658_v31 = vld [vmem:[#allocation6 + $0x68] ss:$16 sps:$4 sm:$0xff]   ;;  %v4666_v33 = vld [vmem:[#allocation6 + $0x4c] ss:$16 sps:$4 sm:$0xff]   ;;  %s3275_s22 = sshll.u32 %s4469_s21, 4  ;;  %s3276_s22 = int_to_ptr.vmem [resolvable:$true] %s3275_s22 }
  0x6d   :  { %662 = vmatpush1.bf16.msra.mxu0 %v4596_v12  ;;  %703 = vmatpush1.bf16.msra.mxu1 %v4598_v13  ;;  %v4656_v30 = vld [vmem:[#allocation6 + $0x60] ss:$16 sps:$4 sm:$0xff]   ;;  %v4662_v32 = vld [vmem:[#allocation6 + $0x44] ss:$16 sps:$4 sm:$0xff]   ;;  %v4672_v35 = vld [vmem:[#allocation6 + $0x48] ss:$16 sps:$4 sm:$0xff]   ;;  %p4426_p13 = scmp.lt.s32.totalorder %s3276_s22, %s3276_s22 }
  0x6e   :  { %663 = vmatprep.subr.bf16.mxu0 %v4601_v14  ;;  %704 = vmatprep.subr.bf16.mxu1 %v4604_v15  ;;  %v4670_v34 = vld [vmem:[#allocation6 + $0x40] ss:$16 sps:$4 sm:$0xff]   ;;  %v4676_v36 = vld [vmem:[#allocation6 + $0x24] ss:$16 sps:$4 sm:$0xff]   ;;  %v4680_v37 = vld [vmem:[#allocation6 + $0x2c] ss:$16 sps:$4 sm:$0xff]  }
  0x6f   :  { %307 = vmatprep.mubr.bf16.mxu0 %v6317_v0  ;;  %380 = vmatprep.mubr.bf16.mxu1 %v6317_v0  ;;  %v3672_v38 = vld [vmem:[%s6302_s0 + $0x18] sm:$0xff]   ;;  %v4687_v39 = vld [vmem:[#allocation6 + $0x20] ss:$16 sps:$4 sm:$0xff]   ;;  %v4691_v41 = vld [vmem:[#allocation6 + $0x4] ss:$16 sps:$4 sm:$0xff]  }
  0x70   :  { %v4689_v40 = vld [vmem:[#allocation6 + $0x28] ss:$16 sps:$4 sm:$0xff]   ;;  %v4693_v42 = vld [vmem:[#allocation6 + $0xc] ss:$16 sps:$4 sm:$0xff]   ;;  %v4699_v43 = vld [vmem:[#allocation6] ss:$16 sps:$4 sm:$0xff]  }
  0x71   :  { %664 = vmatpush1.bf16.msra.mxu0 %v4608_v16  ;;  %705 = vmatpush1.bf16.msra.mxu1 %v4612_v17  ;;  %v4701_v44 = vld [vmem:[#allocation6 + $0x8] ss:$16 sps:$4 sm:$0xff]   ;;  %v4717_v46 = vld [vmem:[#allocation9 + $0xec] ss:$16 sps:$4 sm:$0xff]   ;;  %v4719_v47 = vld [vmem:[#allocation9 + $0xe0] ss:$16 sps:$4 sm:$0xff]  }
  0x72   :  { %665 = vmatprep.subr.bf16.mxu0 %v4616_v18  ;;  %706 = vmatprep.subr.bf16.mxu1 %v4623_v20  ;;  %v4715_v45 = vld [vmem:[#allocation9 + $0xe4] ss:$16 sps:$4 sm:$0xff]   ;;  %v4721_v48 = vld [vmem:[#allocation9 + $0xe8] ss:$16 sps:$4 sm:$0xff]   ;;  %v4729_v50 = vld [vmem:[#allocation9 + $0xcc] ss:$16 sps:$4 sm:$0xff]  }
  0x73   :  { %v4727_v49 = vld [vmem:[#allocation9 + $0xc4] ss:$16 sps:$4 sm:$0xff]   ;;  %v4731_v51 = vld [vmem:[#allocation9 + $0xc0] ss:$16 sps:$4 sm:$0xff]   ;;  %v4733_v52 = vld [vmem:[#allocation9 + $0xc8] ss:$16 sps:$4 sm:$0xff]  }
  0x74   :  { %3301 = vmatmul.mubr.msk.bf16.gmra.mxu0 %vm252_vm0, %v3646_v19  ;;  %3305 = vmatmul.mubr.msk.bf16.gmra.mxu1 %vm252_vm0, %v3646_v19  ;;  %v4739_v53 = vld [vmem:[#allocation9 + $0xa4] ss:$16 sps:$4 sm:$0xff]   ;;  %v4741_v54 = vld [vmem:[#allocation9 + $0xac] ss:$16 sps:$4 sm:$0xff]   ;;  %v4743_v55 = vld [vmem:[#allocation9 + $0xa0] ss:$16 sps:$4 sm:$0xff]  }
  0x75   :  { %666 = vmatpush1.bf16.msra.mxu0 %v4625_v21  ;;  %707 = vmatpush1.bf16.msra.mxu1 %v4629_v22  ;;  %6661 = vst [vmem:[#allocation24_spill] sm:$0xff] %v4741_v54  ;;  %6662 = vst [vmem:[#allocation25_spill] sm:$0xff] %v4743_v55  ;;  %v4745_v56 = vld [vmem:[#allocation9 + $0xa8] ss:$16 sps:$4 sm:$0xff]   ;;  %v4751_v57 = vld [vmem:[#allocation9 + $0x84] ss:$16 sps:$4 sm:$0xff]  }
  0x76   :  { %667 = vmatprep.subr.bf16.mxu0 %v4633_v23  ;;  %708 = vmatprep.subr.bf16.mxu1 %v4635_v24  ;;  %6663 = vst [vmem:[#allocation26_spill] sm:$0xff] %v4745_v56  ;;  %6664 = vst [vmem:[#allocation27_spill] sm:$0xff] %v4751_v57  ;;  %v4753_v58 = vld [vmem:[#allocation9 + $0x8c] ss:$16 sps:$4 sm:$0xff]   ;;  %v4755_v59 = vld [vmem:[#allocation9 + $0x80] ss:$16 sps:$4 sm:$0xff]  }
  0x77   :  { %317 = vmatprep.mubr.bf16.mxu0 %v6317_v0  ;;  %390 = vmatprep.mubr.bf16.mxu1 %v6317_v0  ;;  %6665 = vst [vmem:[#allocation28_spill] sm:$0xff] %v4753_v58  ;;  %6666 = vst [vmem:[#allocation29_spill] sm:$0xff] %v4755_v59  ;;  %v4757_v60 = vld [vmem:[#allocation9 + $0x88] ss:$16 sps:$4 sm:$0xff]   ;;  %v4763_v61 = vld [vmem:[#allocation9 + $0x64] ss:$16 sps:$4 sm:$0xff]  }
  0x78   :  { %6667 = vst [vmem:[#allocation30_spill] sm:$0xff] %v4757_v60  ;;  %6668 = vst [vmem:[#allocation31_spill] sm:$0xff] %v4763_v61  ;;  %v4765_v62 = vld [vmem:[#allocation9 + $0x6c] ss:$16 sps:$4 sm:$0xff]   ;;  %v4767_v63 = vld [vmem:[#allocation9 + $0x60] ss:$16 sps:$4 sm:$0xff]  }
  0x79   :  { %668 = vmatpush1.bf16.msra.mxu0 %v4639_v25  ;;  %709 = vmatpush1.bf16.msra.mxu1 %v4643_v26  ;;  %6669 = vst [vmem:[#allocation32_spill] sm:$0xff] %v4765_v62  ;;  %6670 = vst [vmem:[#allocation33_spill] sm:$0xff] %v4767_v63  ;;  %v4769_v1 = vld [vmem:[#allocation9 + $0x68] ss:$16 sps:$4 sm:$0xff]   ;;  %v4775_v2 = vld [vmem:[#allocation9 + $0x44] ss:$16 sps:$4 sm:$0xff]  }
  0x7a   :  { %669 = vmatprep.subr.bf16.mxu0 %v4647_v27  ;;  %710 = vmatprep.subr.bf16.mxu1 %v4649_v28  ;;  %6671 = vst [vmem:[#allocation34_spill] sm:$0xff] %v4769_v1  ;;  %6672 = vst [vmem:[#allocation35_spill] sm:$0xff] %v4775_v2  ;;  %v4777_v3 = vld [vmem:[#allocation9 + $0x4c] ss:$16 sps:$4 sm:$0xff]   ;;  %v4779_v4 = vld [vmem:[#allocation9 + $0x40] ss:$16 sps:$4 sm:$0xff]  }
  0x7b   :  { %6673 = vst [vmem:[#allocation36_spill] sm:$0xff] %v4777_v3  ;;  %6674 = vst [vmem:[#allocation37_spill] sm:$0xff] %v4779_v4  ;;  %v4781_v5 = vld [vmem:[#allocation9 + $0x48] ss:$16 sps:$4 sm:$0xff]   ;;  %v4787_v6 = vld [vmem:[#allocation9 + $0x24] ss:$16 sps:$4 sm:$0xff]  }
  0x7c   :  { %3302 = vmatmul.mubr.msk.bf16.gmra.mxu0 %vm252_vm0, %v3659_v29  ;;  %3306 = vmatmul.mubr.msk.bf16.gmra.mxu1 %vm252_vm0, %v3659_v29  ;;  %6675 = vst [vmem:[#allocation38_spill] sm:$0xff] %v4781_v5  ;;  %6676 = vst [vmem:[#allocation39_spill] sm:$0xff] %v4787_v6  ;;  %v4789_v7 = vld [vmem:[#allocation9 + $0x2c] ss:$16 sps:$4 sm:$0xff]   ;;  %v4791_v8 = vld [vmem:[#allocation9 + $0x20] ss:$16 sps:$4 sm:$0xff]  }
  0x7d   :  { %670 = vmatpush1.bf16.msra.mxu0 %v4656_v30  ;;  %711 = vmatpush1.bf16.msra.mxu1 %v4658_v31  ;;  %6677 = vst [vmem:[#allocation40_spill] sm:$0xff] %v4789_v7  ;;  %6678 = vst [vmem:[#allocation41_spill] sm:$0xff] %v4791_v8  ;;  %v4793_v9 = vld [vmem:[#allocation9 + $0x28] ss:$16 sps:$4 sm:$0xff]   ;;  %v4799_v19 = vld [vmem:[#allocation9 + $0x4] ss:$16 sps:$4 sm:$0xff]  }
  0x7e   :  { %671 = vmatprep.subr.bf16.mxu0 %v4662_v32  ;;  %712 = vmatprep.subr.bf16.mxu1 %v4666_v33  ;;  %6679 = vst [vmem:[#allocation42_spill] sm:$0xff] %v4793_v9  ;;  %6680 = vst [vmem:[#allocation43_spill] sm:$0xff] %v4799_v19  ;;  %v4801_v29 = vld [vmem:[#allocation9 + $0xc] ss:$16 sps:$4 sm:$0xff]  }
  0x7f   :  { %327 = vmatprep.mubr.bf16.mxu0 %v6317_v0  ;;  %400 = vmatprep.mubr.bf16.mxu1 %v6317_v0  ;;  %6681 = vst [vmem:[#allocation44_spill] sm:$0xff] %v4801_v29 }
  0x81   :  { %672 = vmatpush1.bf16.msra.mxu0 %v4670_v34  ;;  %713 = vmatpush1.bf16.msra.mxu1 %v4672_v35 }
  0x82   :  { %673 = vmatprep.subr.bf16.mxu0 %v4676_v36  ;;  %714 = vmatprep.subr.bf16.mxu1 %v4680_v37 }
  0x84   :  { %3303 = vmatmul.mubr.msk.bf16.gmra.mxu0 %vm252_vm0, %v3672_v38  ;;  %3307 = vmatmul.mubr.msk.bf16.gmra.mxu1 %vm252_vm0, %v3672_v38  ;;  %v4803_v38 = vld [vmem:[#allocation9] ss:$16 sps:$4 sm:$0xff]  }
  0x85   :  { %674 = vmatpush1.bf16.msra.mxu0 %v4687_v39  ;;  %715 = vmatpush1.bf16.msra.mxu1 %v4689_v40  ;;  %6682 = vst [vmem:[#allocation45_spill] sm:$0xff] %v4803_v38 }
  0x86   :  { %675 = vmatprep.subr.bf16.mxu0 %v4691_v41  ;;  %716 = vmatprep.subr.bf16.mxu1 %v4693_v42 }
  0x87   :  { %693 = vmatprep.mubr.bf16.mxu0 %v6317_v0  ;;  %734 = vmatprep.mubr.bf16.mxu1 %v6317_v0 }
  0x89   :  { %676 = vmatpush1.bf16.msra.mxu0 %v4699_v43  ;;  %717 = vmatpush1.bf16.msra.mxu1 %v4701_v44 }
  0x8a   :  { %1157 = vmatprep.subr.bf16.mxu0 %v4715_v45  ;;  %1198 = vmatprep.subr.bf16.mxu1 %v4717_v46 }
  0x8c   :  { %694 = vmatmul.mubr.bf16.vlgmr.msra.gmra.mxu0 %v6317_v0  ;;  %735 = vmatmul.mubr.bf16.vlgmr.msra.gmra.mxu1 %v6317_v0  ;;  %v4805_v0 = vld [vmem:[#allocation9 + $0x8] ss:$16 sps:$4 sm:$0xff]  }
  0x8d   :  { %1158 = vmatpush1.bf16.msra.mxu0 %v4719_v47  ;;  %1199 = vmatpush1.bf16.msra.mxu1 %v4721_v48  ;;  %6683 = vst [vmem:[#allocation46_spill] sm:$0xff] %v4805_v0 }
  0x8e   :  { %1159 = vmatprep.subr.bf16.mxu0 %v4727_v49  ;;  %1200 = vmatprep.subr.bf16.mxu1 %v4729_v50 }
  0x91   :  { %1160 = vmatpush1.bf16.msra.mxu0 %v4731_v51  ;;  %1201 = vmatpush1.bf16.msra.mxu1 %v4733_v52 }
  0x92   :  { %1161 = vmatprep.subr.bf16.mxu0 %v4739_v53  ;;  %1202 = vmatprep.subr.bf16.mxu1 %v4741_v54 }
  0x95   :  { %1162 = vmatpush1.bf16.msra.mxu0 %v4743_v55  ;;  %1203 = vmatpush1.bf16.msra.mxu1 %v4745_v56 }
  0x96   :  { %1163 = vmatprep.subr.bf16.mxu0 %v4751_v57  ;;  %1204 = vmatprep.subr.bf16.mxu1 %v4753_v58 }
  0x99   :  { %1164 = vmatpush1.bf16.msra.mxu0 %v4755_v59  ;;  %1205 = vmatpush1.bf16.msra.mxu1 %v4757_v60 }
  0x9a   :  { %1165 = vmatprep.subr.bf16.mxu0 %v4763_v61  ;;  %1206 = vmatprep.subr.bf16.mxu1 %v4765_v62 }
  0x9d   :  { %1166 = vmatpush1.bf16.msra.mxu0 %v4767_v63  ;;  %1207 = vmatpush1.bf16.msra.mxu1 %v4769_v1 }
  0x9e   :  { %1167 = vmatprep.subr.bf16.mxu0 %v4775_v2  ;;  %1208 = vmatprep.subr.bf16.mxu1 %v4777_v3  ;;  %v4466_v3 = vmov 0.0|0.0  }
  0x9f   :  { %1189 = vmatprep.mubr.bf16.mxu0 %v4466_v3  ;;  %1230 = vmatprep.mubr.bf16.mxu1 %v4466_v3  ;;  %v4899_v3 = vld [vmem:[#allocation9 + $0x100] ss:$16 sps:$4 sm:$0xff]  }
  0xa0   :  { %6714 = vst [vmem:[#allocation77_spill] sm:$0xff] %v4899_v3 }
  0xa1   :  { %1168 = vmatpush1.bf16.msra.mxu0 %v4779_v4  ;;  %1209 = vmatpush1.bf16.msra.mxu1 %v4781_v5  ;;  %v4867_v5 = vld [vmem:[#allocation9 + $0x144] ss:$16 sps:$4 sm:$0xff]   ;;  %v4869_v4 = vld [vmem:[#allocation9 + $0x14c] ss:$16 sps:$4 sm:$0xff]  }
  0xa2   :  { %1169 = vmatprep.subr.bf16.mxu0 %v4787_v6  ;;  %1210 = vmatprep.subr.bf16.mxu1 %v4789_v7  ;;  %v4811_v7 = vld [vmem:[#allocation9 + $0x1e4] ss:$16 sps:$4 sm:$0xff]   ;;  %v4817_v6 = vld [vmem:[#allocation9 + $0x1e8] ss:$16 sps:$4 sm:$0xff]   ;;  %6704 = vst [vmem:[#allocation67_spill] sm:$0xff] %v4867_v5  ;;  %6705 = vst [vmem:[#allocation68_spill] sm:$0xff] %v4869_v4 }
  0xa3   :  { %6684 = vst [vmem:[#allocation47_spill] sm:$0xff] %v4811_v7  ;;  %6687 = vst [vmem:[#allocation50_spill] sm:$0xff] %v4817_v6 }
  0xa5   :  { %1170 = vmatpush1.bf16.msra.mxu0 %v4791_v8  ;;  %1211 = vmatpush1.bf16.msra.mxu1 %v4793_v9  ;;  %v4813_v8 = vld [vmem:[#allocation9 + $0x1ec] ss:$16 sps:$4 sm:$0xff]   ;;  %v4815_v9 = vld [vmem:[#allocation9 + $0x1e0] ss:$16 sps:$4 sm:$0xff]  }
  0xa6   :  { %1171 = vmatprep.subr.bf16.mxu0 %v4799_v19  ;;  %1212 = vmatprep.subr.bf16.mxu1 %v4801_v29  ;;  %6685 = vst [vmem:[#allocation48_spill] sm:$0xff] %v4813_v8  ;;  %6686 = vst [vmem:[#allocation49_spill] sm:$0xff] %v4815_v9  ;;  %v4823_v29 = vld [vmem:[#allocation9 + $0x1c4] ss:$16 sps:$4 sm:$0xff]   ;;  %v4829_v19 = vld [vmem:[#allocation9 + $0x1c8] ss:$16 sps:$4 sm:$0xff]  }
  0xa7   :  { %6688 = vst [vmem:[#allocation51_spill] sm:$0xff] %v4823_v29  ;;  %6691 = vst [vmem:[#allocation54_spill] sm:$0xff] %v4829_v19 }
  0xa9   :  { %1172 = vmatpush1.bf16.msra.mxu0 %v4803_v38  ;;  %1213 = vmatpush1.bf16.msra.mxu1 %v4805_v0  ;;  %v4825_v38 = vld [vmem:[#allocation9 + $0x1cc] ss:$16 sps:$4 sm:$0xff]   ;;  %v4827_v0 = vld [vmem:[#allocation9 + $0x1c0] ss:$16 sps:$4 sm:$0xff]  }
  0xaa   :  { %1173 = vmatprep.subr.bf16.mxu0 %v4811_v7  ;;  %1214 = vmatprep.subr.bf16.mxu1 %v4813_v8  ;;  %6689 = vst [vmem:[#allocation52_spill] sm:$0xff] %v4825_v38  ;;  %6690 = vst [vmem:[#allocation53_spill] sm:$0xff] %v4827_v0  ;;  %v4835_v8 = vld [vmem:[#allocation9 + $0x1a4] ss:$16 sps:$4 sm:$0xff]   ;;  %v4841_v7 = vld [vmem:[#allocation9 + $0x1a8] ss:$16 sps:$4 sm:$0xff]  }
  0xab   :  { %6692 = vst [vmem:[#allocation55_spill] sm:$0xff] %v4835_v8  ;;  %6695 = vst [vmem:[#allocation58_spill] sm:$0xff] %v4841_v7 }
  0xad   :  { %1174 = vmatpush2.bf16.msra.mxu0 %v4815_v9  ;;  %1215 = vmatpush2.bf16.msra.mxu1 %v4817_v6  ;;  %v4837_v9 = vld [vmem:[#allocation9 + $0x1ac] ss:$16 sps:$4 sm:$0xff]   ;;  %v4839_v6 = vld [vmem:[#allocation9 + $0x1a0] ss:$16 sps:$4 sm:$0xff]  }
  0xae   :  { %1175 = vmatprep.subr.bf16.mxu0 %v4823_v29  ;;  %1216 = vmatprep.subr.bf16.mxu1 %v4825_v38  ;;  %6693 = vst [vmem:[#allocation56_spill] sm:$0xff] %v4837_v9  ;;  %6694 = vst [vmem:[#allocation57_spill] sm:$0xff] %v4839_v6  ;;  %v4847_v38 = vld [vmem:[#allocation9 + $0x184] ss:$16 sps:$4 sm:$0xff]   ;;  %v4853_v29 = vld [vmem:[#allocation9 + $0x188] ss:$16 sps:$4 sm:$0xff]  }
  0xaf   :  { %6696 = vst [vmem:[#allocation59_spill] sm:$0xff] %v4847_v38  ;;  %6699 = vst [vmem:[#allocation62_spill] sm:$0xff] %v4853_v29 }
  0xb1   :  { %1176 = vmatpush2.bf16.msra.mxu0 %v4827_v0  ;;  %1217 = vmatpush2.bf16.msra.mxu1 %v4829_v19  ;;  %v4849_v0 = vld [vmem:[#allocation9 + $0x18c] ss:$16 sps:$4 sm:$0xff]   ;;  %v4851_v19 = vld [vmem:[#allocation9 + $0x180] ss:$16 sps:$4 sm:$0xff]  }
  0xb2   :  { %1177 = vmatprep.subr.bf16.mxu0 %v4835_v8  ;;  %1218 = vmatprep.subr.bf16.mxu1 %v4837_v9  ;;  %6697 = vst [vmem:[#allocation60_spill] sm:$0xff] %v4849_v0  ;;  %6698 = vst [vmem:[#allocation61_spill] sm:$0xff] %v4851_v19  ;;  %v4859_v9 = vld [vmem:[#allocation9 + $0x164] ss:$16 sps:$4 sm:$0xff]   ;;  %v4865_v8 = vld [vmem:[#allocation9 + $0x168] ss:$16 sps:$4 sm:$0xff]  }
  0xb3   :  { %6700 = vst [vmem:[#allocation63_spill] sm:$0xff] %v4859_v9  ;;  %6703 = vst [vmem:[#allocation66_spill] sm:$0xff] %v4865_v8 }
  0xb5   :  { %1178 = vmatpush2.bf16.msra.mxu0 %v4839_v6  ;;  %1219 = vmatpush2.bf16.msra.mxu1 %v4841_v7  ;;  %v4861_v6 = vld [vmem:[#allocation9 + $0x16c] ss:$16 sps:$4 sm:$0xff]   ;;  %v4863_v7 = vld [vmem:[#allocation9 + $0x160] ss:$16 sps:$4 sm:$0xff]  }
  0xb6   :  { %1179 = vmatprep.subr.bf16.mxu0 %v4847_v38  ;;  %1220 = vmatprep.subr.bf16.mxu1 %v4849_v0  ;;  %6701 = vst [vmem:[#allocation64_spill] sm:$0xff] %v4861_v6  ;;  %6702 = vst [vmem:[#allocation65_spill] sm:$0xff] %v4863_v7  ;;  %v4881_v0 = vld [vmem:[#allocation9 + $0x124] ss:$16 sps:$4 sm:$0xff]   ;;  %v4883_v38 = vld [vmem:[#allocation9 + $0x12c] ss:$16 sps:$4 sm:$0xff]  }
  0xb7   :  { %6708 = vst [vmem:[#allocation71_spill] sm:$0xff] %v4881_v0  ;;  %6709 = vst [vmem:[#allocation72_spill] sm:$0xff] %v4883_v38 }
  0xb9   :  { %1180 = vmatpush2.bf16.msra.mxu0 %v4851_v19  ;;  %1221 = vmatpush2.bf16.msra.mxu1 %v4853_v29  ;;  %v4875_v29 = vld [vmem:[#allocation9 + $0x140] ss:$16 sps:$4 sm:$0xff]   ;;  %v4877_v19 = vld [vmem:[#allocation9 + $0x148] ss:$16 sps:$4 sm:$0xff]  }
  0xba   :  { %1181 = vmatprep.subr.bf16.mxu0 %v4859_v9  ;;  %1222 = vmatprep.subr.bf16.mxu1 %v4861_v6  ;;  %6706 = vst [vmem:[#allocation69_spill] sm:$0xff] %v4875_v29  ;;  %6707 = vst [vmem:[#allocation70_spill] sm:$0xff] %v4877_v19 }
  0xbd   :  { %1182 = vmatpush2.bf16.msra.mxu0 %v4863_v7  ;;  %1223 = vmatpush2.bf16.msra.mxu1 %v4865_v8  ;;  %v4887_v8 = vld [vmem:[#allocation9 + $0x120] ss:$16 sps:$4 sm:$0xff]   ;;  %v4889_v7 = vld [vmem:[#allocation9 + $0x128] ss:$16 sps:$4 sm:$0xff]  }
  0xbe   :  { %1183 = vmatprep.subr.bf16.mxu0 %v4867_v5  ;;  %1224 = vmatprep.subr.bf16.mxu1 %v4869_v4  ;;  %6710 = vst [vmem:[#allocation73_spill] sm:$0xff] %v4887_v8  ;;  %6711 = vst [vmem:[#allocation74_spill] sm:$0xff] %v4889_v7  ;;  %v4893_v4 = vld [vmem:[#allocation9 + $0x104] ss:$16 sps:$4 sm:$0xff]   ;;  %v4895_v5 = vld [vmem:[#allocation9 + $0x10c] ss:$16 sps:$4 sm:$0xff]  }
  0xbf   :  { %6712 = vst [vmem:[#allocation75_spill] sm:$0xff] %v4893_v4  ;;  %6713 = vst [vmem:[#allocation76_spill] sm:$0xff] %v4895_v5 }
  0xc1   :  { %1184 = vmatpush2.bf16.msra.mxu0 %v4875_v29  ;;  %1225 = vmatpush2.bf16.msra.mxu1 %v4877_v19  ;;  %v4901_v29 = vld [vmem:[#allocation9 + $0x108] ss:$16 sps:$4 sm:$0xff]  }
  0xc2   :  { %1185 = vmatprep.subr.bf16.mxu0 %v4881_v0  ;;  %1226 = vmatprep.subr.bf16.mxu1 %v4883_v38  ;;  %6715 = vst [vmem:[#allocation78_spill] sm:$0xff] %v4901_v29  ;;  %v172_v38 = vlaneseq }
  0xc5   :  { %1186 = vmatpush2.bf16.msra.mxu0 %v4887_v8  ;;  %1227 = vmatpush2.bf16.msra.mxu1 %v4889_v7  ;;  %v4909_v8 = vshrl.u32 %v172_v38, 7 }
  0xc6   :  { %1187 = vmatprep.subr.bf16.mxu0 %v4893_v4  ;;  %1228 = vmatprep.subr.bf16.mxu1 %v4895_v5  ;;  %v170_v4 = vld [vmem:[#allocation8] sm:$0xf] }
  0xc7   :  { %6716 = vst [vmem:[#allocation79_spill] sm:$0xff] %v4909_v8  ;;  %v6411_v7 = vsub.s32 2, %v4909_v8  ;;  %v6420_v0 = vsub.s32 0, %v4909_v8  ;;  %v6423_v19 = vsub.s32 3, %v4909_v8 }
  0xc9   :  { %1188 = vmatpush2.bf16.msra.mxu0 %v4899_v3  ;;  %1229 = vmatpush2.bf16.msra.mxu1 %v4901_v29  ;;  %v4920_v29 = vrot.slane %v170_v4, %v6411_v7  ;;  %v175_v3 = vrot.slane %v170_v4, %v6420_v0  ;;  %v4931_v9 = vrot.slane %v170_v4, %v6423_v19 }
  0xca   :  { %1267 = vmatprep.subr.bf16.mxu0 %v4592_v10  ;;  %1308 = vmatprep.subr.bf16.mxu1 %v4594_v11  ;;  %v6428_v10 = vsub.s32 1, %v4909_v8 }
  0xcc   :  { %v179_v63 = vrot.slane %v170_v4, %v6428_v10 }
 0x12c   :  { %v4914_v6 = vpop.f32.mrf.mxu0  ;;  %v4916_v5 = vpop.f32.mrf.mxu1 }
 0x12e   :  { %v4923_v11 = vpop.f32.mrf.mxu0  ;;  %v4925_v38 = vpop.f32.mrf.mxu1 }
 0x130   :  { %v303_v2 = vpop.f32.mrf.mxu0  ;;  %v376_v1 = vpop.f32.mrf.mxu1 }
 0x131   :  { %v4935_v7 = vadd.f32 %v303_v2, %v175_v3  ;;  %v4938_v62 = vadd.f32 %v376_v1, %v4920_v29 }
 0x132   :  { %v305_v61 = vpop.f32.mrf.mxu0  ;;  %v378_v60 = vpop.f32.mrf.mxu1 }
 0x133   :  { %6717 = vst [vmem:[#allocation80_spill] sm:$0xff] %v4935_v7  ;;  %6718 = vst [vmem:[#allocation81_spill] sm:$0xff] %v4938_v62  ;;  %v4940_v59 = vadd.f32 %v305_v61, %v179_v63  ;;  %v4943_v0 = vadd.f32 %v378_v60, %v4931_v9 }
 0x134   :  { %v309_v58 = vpop.f32.mrf.mxu0  ;;  %v382_v19 = vpop.f32.mrf.mxu1 }
 0x135   :  { %6719 = vst [vmem:[#allocation82_spill] sm:$0xff] %v4940_v59  ;;  %6720 = vst [vmem:[#allocation83_spill] sm:$0xff] %v4943_v0  ;;  %v4945_v57 = vadd.f32 %v309_v58, %v175_v3  ;;  %v4948_v56 = vadd.f32 %v382_v19, %v4920_v29 }
 0x136   :  { %v311_v4 = vpop.f32.mrf.mxu0  ;;  %v384_v2 = vpop.f32.mrf.mxu1 }
 0x137   :  { %6721 = vst [vmem:[#allocation84_spill] sm:$0xff] %v4945_v57  ;;  %6722 = vst [vmem:[#allocation85_spill] sm:$0xff] %v4948_v56  ;;  %v4950_v10 = vadd.f32 %v311_v4, %v179_v63  ;;  %v4953_v1 = vadd.f32 %v384_v2, %v4931_v9 }
 0x138   :  { %v313_v62 = vpop.f32.mrf.mxu0  ;;  %v386_v61 = vpop.f32.mrf.mxu1 }
 0x139   :  { %6723 = vst [vmem:[#allocation86_spill] sm:$0xff] %v4950_v10  ;;  %6724 = vst [vmem:[#allocation87_spill] sm:$0xff] %v4953_v1  ;;  %v4955_v59 = vadd.f32 %v313_v62, %v175_v3  ;;  %v4958_v60 = vadd.f32 %v386_v61, %v4920_v29 }
 0x13a   :  { %v315_v0 = vpop.f32.mrf.mxu0  ;;  %v388_v58 = vpop.f32.mrf.mxu1 }
 0x13b   :  { %6725 = vst [vmem:[#allocation88_spill] sm:$0xff] %v4955_v59  ;;  %6726 = vst [vmem:[#allocation89_spill] sm:$0xff] %v4958_v60  ;;  %v4960_v57 = vadd.f32 %v315_v0, %v179_v63  ;;  %v4963_v19 = vadd.f32 %v388_v58, %v4931_v9 }
 0x13c   :  { %v319_v56 = vpop.f32.mrf.mxu0  ;;  %v392_v4 = vpop.f32.mrf.mxu1 }
 0x13d   :  { %6727 = vst [vmem:[#allocation90_spill] sm:$0xff] %v4960_v57  ;;  %6728 = vst [vmem:[#allocation91_spill] sm:$0xff] %v4963_v19  ;;  %v4965_v10 = vadd.f32 %v319_v56, %v175_v3  ;;  %v4968_v2 = vadd.f32 %v392_v4, %v4920_v29 }
 0x13e   :  { %v321_v1 = vpop.f32.mrf.mxu0  ;;  %v394_v62 = vpop.f32.mrf.mxu1 }
 0x13f   :  { %6729 = vst [vmem:[#allocation92_spill] sm:$0xff] %v4965_v10  ;;  %6730 = vst [vmem:[#allocation93_spill] sm:$0xff] %v4968_v2  ;;  %v4970_v59 = vadd.f32 %v321_v1, %v179_v63  ;;  %v4973_v61 = vadd.f32 %v394_v62, %v4931_v9 }
 0x140   :  { %v323_v60 = vpop.f32.mrf.mxu0  ;;  %v396_v0 = vpop.f32.mrf.mxu1 }
 0x141   :  { %6731 = vst [vmem:[#allocation94_spill] sm:$0xff] %v4970_v59  ;;  %6732 = vst [vmem:[#allocation95_spill] sm:$0xff] %v4973_v61  ;;  %v4975_v57 = vadd.f32 %v323_v60, %v175_v3  ;;  %v4978_v58 = vadd.f32 %v396_v0, %v4920_v29 }
 0x142   :  { %v325_v19 = vpop.f32.mrf.mxu0  ;;  %v398_v56 = vpop.f32.mrf.mxu1 }
 0x143   :  { %6733 = vst [vmem:[#allocation96_spill] sm:$0xff] %v4975_v57  ;;  %6734 = vst [vmem:[#allocation97_spill] sm:$0xff] %v4978_v58  ;;  %v4980_v10 = vadd.f32 %v325_v19, %v179_v63  ;;  %v4983_v4 = vadd.f32 %v398_v56, %v4931_v9 }
 0x144   :  { %v329_v2 = vpop.f32.mrf.mxu0  ;;  %v402_v1 = vpop.f32.mrf.mxu1 }
 0x145   :  { %6735 = vst [vmem:[#allocation98_spill] sm:$0xff] %v4980_v10  ;;  %6736 = vst [vmem:[#allocation99_spill] sm:$0xff] %v4983_v4  ;;  %v4985_v59 = vadd.f32 %v329_v2, %v175_v3  ;;  %v4988_v62 = vadd.f32 %v402_v1, %v4920_v29 }
 0x146   :  { %v331_v61 = vpop.f32.mrf.mxu0  ;;  %v404_v60 = vpop.f32.mrf.mxu1 }
 0x147   :  { %6737 = vst [vmem:[#allocation100_spill] sm:$0xff] %v4985_v59  ;;  %6738 = vst [vmem:[#allocation101_spill] sm:$0xff] %v4988_v62  ;;  %v4990_v57 = vadd.f32 %v331_v61, %v179_v63  ;;  %v4993_v0 = vadd.f32 %v404_v60, %v4931_v9  ;;  %v300_v59 = vadd.f32 %v4914_v6, %v175_v3 }
 0x148   :  { %v333_v58 = vpop.f32.mrf.mxu0  ;;  %v406_v19 = vpop.f32.mrf.mxu1  ;;  %v302_v60 = vadd.f32 %v4923_v11, %v179_v63 }
 0x149   :  { %6739 = vst [vmem:[#allocation102_spill] sm:$0xff] %v4990_v57  ;;  %6740 = vst [vmem:[#allocation103_spill] sm:$0xff] %v4993_v0  ;;  %v4995_v10 = vadd.f32 %v333_v58, %v175_v3  ;;  %v4998_v56 = vadd.f32 %v406_v19, %v4920_v29  ;;  %v375_v3 = vadd.f32 %v4925_v38, %v4931_v9 }
 0x14a   :  { %v335_v4 = vpop.f32.mrf.mxu0  ;;  %v408_v2 = vpop.f32.mrf.mxu1 }
 0x14b   :  { %6741 = vst [vmem:[#allocation104_spill] sm:$0xff] %v4995_v10  ;;  %6742 = vst [vmem:[#allocation105_spill] sm:$0xff] %v4998_v56  ;;  %v5001_v1 = vadd.f32 %v335_v4, %v179_v63  ;;  %v5004_v62 = vadd.f32 %v408_v2, %v4931_v9  ;;  %v373_v2 = vadd.f32 %v4916_v5, %v4920_v29 }
 0x14c   :  { %v695_v61 = vpop.f32.mrf.mxu0  ;;  %v736_v57 = vpop.f32.mrf.mxu1 }
 0x14d   :  { %6743 = vst [vmem:[#allocation106_spill] sm:$0xff] %v5001_v1  ;;  %6744 = vst [vmem:[#allocation107_spill] sm:$0xff] %v5004_v62  ;;  %v743_v0 = vadd.f32 %v695_v61, %v300_v59  ;;  %v745_v11 = vadd.f32 %v736_v57, %v373_v2  ;;  %v6779_v2 = vld [vmem:[#allocation57_spill] sm:$0xff]  ;;  %v6797_v62 = vld [vmem:[#allocation75_spill] sm:$0xff] }
 0x14e   :  { %v697_v7 = vpop.f32.mrf.mxu0  ;;  %v738_v58 = vpop.f32.mrf.mxu1  ;;  %v6798_v1 = vld [vmem:[#allocation76_spill] sm:$0xff] }
 0x14f   :  { %v3340_v10 = vmul.f32 -1.442695, %v743_v0  ;;  %v744_v8 = vadd.f32 %v697_v7, %v302_v60  ;;  %v746_v4 = vadd.f32 %v738_v58, %v375_v3  ;;  %v6777_v3 = vld [vmem:[#allocation55_spill] sm:$0xff] }
 0x150   :  { %v699_v19 = vpop.f32.mrf.mxu0  ;;  %v740_v56 = vpop.f32.mrf.mxu1 }
 0x151   :  { %3813 = vpow2.f32 %v3340_v10  ;;  %v3341_v55 = vmul.f32 -1.442695, %v744_v8  ;;  %v3342_v63 = vmul.f32 -1.442695, %v746_v4  ;;  %v6745_v19 = vmov 0   ;;  %v6778_v4 = vld [vmem:[#allocation56_spill] sm:$0xff] }
 0x152   :  { %v700_v54 = vpop.f32.mrf.mxu0  ;;  %v741_v6 = vpop.f32.mrf.mxu1 }
 0x153   :  { %3815 = vpow2.f32 %v3341_v55  ;;  %v6776_v6 = vld [vmem:[#allocation54_spill] sm:$0xff] }
 0x154   :  { %3817 = vpow2.f32 %v3342_v63  ;;  %v6780_v63 = vld [vmem:[#allocation58_spill] sm:$0xff] }
 0x15e   :  { %v3814_v59 = vpop.eup %3813 }
 0x15f   :  { %v750_v61 = vadd.f32 1.0, %v3814_v59  ;;  %v6781_v59 = vld [vmem:[#allocation59_spill] sm:$0xff] }
 0x160   :  { %v3816_v0 = vpop.eup %3815 }
 0x161   :  { %3819 = vrcp.f32 %v750_v61  ;;  %v756_v7 = vadd.f32 1.0, %v3816_v0  ;;  %v3818_v54 = vpop.eup %3817  ;;  %v6783_v61 = vld [vmem:[#allocation61_spill] sm:$0xff]  ;;  %v6784_v0 = vld [vmem:[#allocation62_spill] sm:$0xff] }
 0x162   :  { %3821 = vtanh.f32 %v745_v11  ;;  %v763_v56 = vadd.f32 1.0, %v3818_v54  ;;  %v6782_v11 = vld [vmem:[#allocation60_spill] sm:$0xff] }
 0x163   :  { %3823 = vrcp.f32 %v756_v7  ;;  %v6785_v7 = vld [vmem:[#allocation63_spill] sm:$0xff]  ;;  %v6786_v54 = vld [vmem:[#allocation64_spill] sm:$0xff] }
 0x164   :  { %3825 = vrcp.f32 %v763_v56  ;;  %v6790_v56 = vld [vmem:[#allocation68_spill] sm:$0xff] }
 0x16e   :  { %v3820_v8 = vpop.eup %3819 }
 0x16f   :  { %v3822_v55 = vpop.eup %3821 }
 0x170   :  { %v3824_v10 = vpop.eup %3823  ;;  %v767_v38 = vmul.f32 %v3822_v55, %v3820_v8  ;;  %v6787_v8 = vld [vmem:[#allocation65_spill] sm:$0xff]  ;;  %v6788_v55 = vld [vmem:[#allocation66_spill] sm:$0xff] }
 0x171   :  { %v766_v9 = vmul.f32 0.0, %v3824_v10  ;;  %v3826_v57 = vpop.eup %3825  ;;  %v6789_v10 = vld [vmem:[#allocation67_spill] sm:$0xff] }
 0x173   :  { %v5011_v60 = vadd.f32 %v767_v38, %v766_v9  ;;  %v6791_v9 = vld [vmem:[#allocation69_spill] sm:$0xff]  ;;  %v6792_v38 = vld [vmem:[#allocation70_spill] sm:$0xff] }
 0x175   :  { %3827 = vtanh.f32 %v5011_v60 }
 0x182   :  { %v3828_v5 = vpop.eup %3827 }
 0x183   :  { %v770_v29 = vmul.f32 %v3828_v5, %v3826_v57  ;;  %v6793_v57 = vld [vmem:[#allocation71_spill] sm:$0xff]  ;;  %v6794_v5 = vld [vmem:[#allocation72_spill] sm:$0xff] }
 0x185   :  { %v771_v58 = vpack.c.bf16 %v770_v29, %v770_v29  ;;  %v6795_v29 = vld [vmem:[#allocation73_spill] sm:$0xff] }
 0x187   :  { %1190 = vmatmul.mubr.bf16.vlgmr.msra.gmra.mxu0 %v771_v58  ;;  %1231 = vmatmul.mubr.bf16.vlgmr.msra.gmra.mxu1 %v771_v58 }
 0x188   :  { %1268 = vmatpush1.bf16.msra.mxu0 %v4596_v12  ;;  %1309 = vmatpush1.bf16.msra.mxu1 %v4598_v13  ;;  %v6746_v12 = vld [vmem:[#allocation24_spill] sm:$0xff]  ;;  %v6747_v13 = vld [vmem:[#allocation25_spill] sm:$0xff] }
 0x189   :  { %1269 = vmatprep.subr.bf16.mxu0 %v4601_v14  ;;  %1310 = vmatprep.subr.bf16.mxu1 %v4604_v15  ;;  %v6748_v14 = vld [vmem:[#allocation26_spill] sm:$0xff]  ;;  %v6749_v15 = vld [vmem:[#allocation27_spill] sm:$0xff] }
 0x18a   :  { %1299 = vmatprep.mubr.bf16.mxu0 %v6745_v19  ;;  %1340 = vmatprep.mubr.bf16.mxu1 %v6745_v19 }
 0x18c   :  { %1270 = vmatpush1.bf16.msra.mxu0 %v4608_v16  ;;  %1311 = vmatpush1.bf16.msra.mxu1 %v4612_v17  ;;  %v6750_v16 = vld [vmem:[#allocation28_spill] sm:$0xff]  ;;  %v6751_v17 = vld [vmem:[#allocation29_spill] sm:$0xff] }
 0x18d   :  { %1271 = vmatprep.subr.bf16.mxu0 %v4616_v18  ;;  %1312 = vmatprep.subr.bf16.mxu1 %v4623_v20  ;;  %v6752_v18 = vld [vmem:[#allocation30_spill] sm:$0xff]  ;;  %v6753_v20 = vld [vmem:[#allocation31_spill] sm:$0xff] }
 0x190   :  { %1272 = vmatpush1.bf16.msra.mxu0 %v4625_v21  ;;  %1313 = vmatpush1.bf16.msra.mxu1 %v4629_v22  ;;  %v6754_v21 = vld [vmem:[#allocation32_spill] sm:$0xff]  ;;  %v6755_v22 = vld [vmem:[#allocation33_spill] sm:$0xff] }
 0x191   :  { %1273 = vmatprep.subr.bf16.mxu0 %v4633_v23  ;;  %1314 = vmatprep.subr.bf16.mxu1 %v4635_v24  ;;  %v6756_v23 = vld [vmem:[#allocation34_spill] sm:$0xff]  ;;  %v6757_v24 = vld [vmem:[#allocation35_spill] sm:$0xff] }
 0x194   :  { %1274 = vmatpush1.bf16.msra.mxu0 %v4639_v25  ;;  %1315 = vmatpush1.bf16.msra.mxu1 %v4643_v26  ;;  %v6758_v25 = vld [vmem:[#allocation36_spill] sm:$0xff]  ;;  %v6759_v26 = vld [vmem:[#allocation37_spill] sm:$0xff] }
 0x195   :  { %1275 = vmatprep.subr.bf16.mxu0 %v4647_v27  ;;  %1316 = vmatprep.subr.bf16.mxu1 %v4649_v28  ;;  %v6760_v27 = vld [vmem:[#allocation38_spill] sm:$0xff]  ;;  %v6761_v28 = vld [vmem:[#allocation39_spill] sm:$0xff] }
 0x198   :  { %1276 = vmatpush1.bf16.msra.mxu0 %v4656_v30  ;;  %1317 = vmatpush1.bf16.msra.mxu1 %v4658_v31  ;;  %v6762_v30 = vld [vmem:[#allocation40_spill] sm:$0xff]  ;;  %v6763_v31 = vld [vmem:[#allocation41_spill] sm:$0xff] }
 0x199   :  { %1277 = vmatprep.subr.bf16.mxu0 %v4662_v32  ;;  %1318 = vmatprep.subr.bf16.mxu1 %v4666_v33  ;;  %v6764_v32 = vld [vmem:[#allocation42_spill] sm:$0xff]  ;;  %v6765_v33 = vld [vmem:[#allocation43_spill] sm:$0xff] }
 0x19c   :  { %1278 = vmatpush1.bf16.msra.mxu0 %v4670_v34  ;;  %1319 = vmatpush1.bf16.msra.mxu1 %v4672_v35  ;;  %v6766_v34 = vld [vmem:[#allocation44_spill] sm:$0xff]  ;;  %v6767_v35 = vld [vmem:[#allocation45_spill] sm:$0xff] }
 0x19d   :  { %1279 = vmatprep.subr.bf16.mxu0 %v4676_v36  ;;  %1320 = vmatprep.subr.bf16.mxu1 %v4680_v37  ;;  %v6768_v36 = vld [vmem:[#allocation46_spill] sm:$0xff]  ;;  %v6769_v37 = vld [vmem:[#allocation47_spill] sm:$0xff] }
 0x1a0   :  { %1280 = vmatpush1.bf16.msra.mxu0 %v4687_v39  ;;  %1321 = vmatpush1.bf16.msra.mxu1 %v4689_v40  ;;  %v6770_v39 = vld [vmem:[#allocation48_spill] sm:$0xff]  ;;  %v6771_v40 = vld [vmem:[#allocation49_spill] sm:$0xff] }
 0x1a1   :  { %1281 = vmatprep.subr.bf16.mxu0 %v4691_v41  ;;  %1322 = vmatprep.subr.bf16.mxu1 %v4693_v42  ;;  %v6772_v41 = vld [vmem:[#allocation50_spill] sm:$0xff]  ;;  %v6773_v42 = vld [vmem:[#allocation51_spill] sm:$0xff] }
 0x1a4   :  { %1282 = vmatpush1.bf16.msra.mxu0 %v4699_v43  ;;  %1323 = vmatpush1.bf16.msra.mxu1 %v4701_v44  ;;  %v6774_v43 = vld [vmem:[#allocation52_spill] sm:$0xff]  ;;  %v6775_v44 = vld [vmem:[#allocation53_spill] sm:$0xff] }
 0x1a5   :  { %1379 = vmatprep.subr.bf16.mxu0 %v4715_v45  ;;  %1420 = vmatprep.subr.bf16.mxu1 %v4717_v46 }
 0x1a7   :  { %1300 = vmatmul.mubr.bf16.vlgmr.msra.gmra.mxu0 %v771_v58  ;;  %1341 = vmatmul.mubr.bf16.vlgmr.msra.gmra.mxu1 %v771_v58  ;;  %v6796_v58 = vld [vmem:[#allocation74_spill] sm:$0xff] }
 0x1a8   :  { %1380 = vmatpush1.bf16.msra.mxu0 %v4719_v47  ;;  %1421 = vmatpush1.bf16.msra.mxu1 %v4721_v48 }
 0x1a9   :  { %1381 = vmatprep.subr.bf16.mxu0 %v4727_v49  ;;  %1422 = vmatprep.subr.bf16.mxu1 %v4729_v50 }
 0x1ac   :  { %1382 = vmatpush1.bf16.msra.mxu0 %v4731_v51  ;;  %1423 = vmatpush1.bf16.msra.mxu1 %v4733_v52 }
 0x1ad   :  { %1383 = vmatprep.subr.bf16.mxu0 %v4739_v53  ;;  %1424 = vmatprep.subr.bf16.mxu1 %v6746_v12 }
 0x1b0   :  { %1384 = vmatpush1.bf16.msra.mxu0 %v6747_v13  ;;  %1425 = vmatpush1.bf16.msra.mxu1 %v6748_v14 }
 0x1b1   :  { %1385 = vmatprep.subr.bf16.mxu0 %v6749_v15  ;;  %1426 = vmatprep.subr.bf16.mxu1 %v6750_v16 }
 0x1b4   :  { %1386 = vmatpush1.bf16.msra.mxu0 %v6751_v17  ;;  %1427 = vmatpush1.bf16.msra.mxu1 %v6752_v18 }
 0x1b5   :  { %1387 = vmatprep.subr.bf16.mxu0 %v6753_v20  ;;  %1428 = vmatprep.subr.bf16.mxu1 %v6754_v21 }
 0x1b8   :  { %1388 = vmatpush1.bf16.msra.mxu0 %v6755_v22  ;;  %1429 = vmatpush1.bf16.msra.mxu1 %v6756_v23 }
 0x1b9   :  { %1389 = vmatprep.subr.bf16.mxu0 %v6757_v24  ;;  %1430 = vmatprep.subr.bf16.mxu1 %v6758_v25 }
 0x1bc   :  { %1390 = vmatpush1.bf16.msra.mxu0 %v6759_v26  ;;  %1431 = vmatpush1.bf16.msra.mxu1 %v6760_v27 }
 0x1bd   :  { %1391 = vmatprep.subr.bf16.mxu0 %v6761_v28  ;;  %1432 = vmatprep.subr.bf16.mxu1 %v6762_v30 }
 0x1c0   :  { %1392 = vmatpush1.bf16.msra.mxu0 %v6763_v31  ;;  %1433 = vmatpush1.bf16.msra.mxu1 %v6764_v32 }
 0x1c1   :  { %1393 = vmatprep.subr.bf16.mxu0 %v6765_v33  ;;  %1434 = vmatprep.subr.bf16.mxu1 %v6766_v34 }
 0x1c4   :  { %1394 = vmatpush1.bf16.msra.mxu0 %v6767_v35  ;;  %1435 = vmatpush1.bf16.msra.mxu1 %v6768_v36 }
 0x1c5   :  { %1395 = vmatprep.subr.bf16.mxu0 %v6769_v37  ;;  %1436 = vmatprep.subr.bf16.mxu1 %v6770_v39 }
 0x1c8   :  { %1396 = vmatpush2.bf16.msra.mxu0 %v6771_v40  ;;  %1437 = vmatpush2.bf16.msra.mxu1 %v6772_v41 }
 0x1c9   :  { %1397 = vmatprep.subr.bf16.mxu0 %v6773_v42  ;;  %1438 = vmatprep.subr.bf16.mxu1 %v6774_v43 }
 0x1cc   :  { %1398 = vmatpush2.bf16.msra.mxu0 %v6775_v44  ;;  %1439 = vmatpush2.bf16.msra.mxu1 %v6776_v6 }
 0x1cd   :  { %1399 = vmatprep.subr.bf16.mxu0 %v6777_v3  ;;  %1440 = vmatprep.subr.bf16.mxu1 %v6778_v4 }
 0x1d0   :  { %1400 = vmatpush2.bf16.msra.mxu0 %v6779_v2  ;;  %1441 = vmatpush2.bf16.msra.mxu1 %v6780_v63 }
 0x1d1   :  { %1401 = vmatprep.subr.bf16.mxu0 %v6781_v59  ;;  %1442 = vmatprep.subr.bf16.mxu1 %v6782_v11 }
 0x1d4   :  { %1402 = vmatpush2.bf16.msra.mxu0 %v6783_v61  ;;  %1443 = vmatpush2.bf16.msra.mxu1 %v6784_v0 }
 0x1d5   :  { %1403 = vmatprep.subr.bf16.mxu0 %v6785_v7  ;;  %1444 = vmatprep.subr.bf16.mxu1 %v6786_v54 }
 0x1d8   :  { %1404 = vmatpush2.bf16.msra.mxu0 %v6787_v8  ;;  %1445 = vmatpush2.bf16.msra.mxu1 %v6788_v55  ;;  %v6799_v55 = vld [vmem:[#allocation77_spill] sm:$0xff] }
 0x1d9   :  { %1405 = vmatprep.subr.bf16.mxu0 %v6789_v10  ;;  %1446 = vmatprep.subr.bf16.mxu1 %v6790_v56  ;;  %v6800_v10 = vld [vmem:[#allocation78_spill] sm:$0xff] }
 0x1da   :  { %v5110_v56 = vld [vmem:[#allocation6 + $0xe4] ss:$16 sps:$4 sm:$0xff]  }
 0x1db   :  { %6801 = vst [vmem:[#allocation24_spill] sm:$0xff] %v5110_v56 }
 0x1dc   :  { %1406 = vmatpush2.bf16.msra.mxu0 %v6791_v9  ;;  %1447 = vmatpush2.bf16.msra.mxu1 %v6792_v38  ;;  %v5113_v38 = vld [vmem:[#allocation6 + $0xec] ss:$16 sps:$4 sm:$0xff]  }
 0x1dd   :  { %1407 = vmatprep.subr.bf16.mxu0 %v6793_v57  ;;  %1448 = vmatprep.subr.bf16.mxu1 %v6794_v5  ;;  %6802 = vst [vmem:[#allocation25_spill] sm:$0xff] %v5113_v38  ;;  %v443_v5 = vld [vmem:[#allocation11] sm:$0xf] }
 0x1e0   :  { %1408 = vmatpush2.bf16.msra.mxu0 %v6795_v29  ;;  %1449 = vmatpush2.bf16.msra.mxu1 %v6796_v58  ;;  %v6803_v29 = vld [vmem:[#allocation79_spill] sm:$0xff] }
 0x1e1   :  { %1409 = vmatprep.subr.bf16.mxu0 %v6797_v62  ;;  %1450 = vmatprep.subr.bf16.mxu1 %v6798_v1  ;;  %v6804_v57 = vsub.s32 0, %v6803_v29  ;;  %v6806_v62 = vsub.s32 1, %v6803_v29  ;;  %v6808_v59 = vsub.s32 3, %v6803_v29 }
 0x1e3   :  { %v5118_v58 = vrot.slane %v443_v5, %v6804_v57  ;;  %v5122_v1 = vrot.slane %v443_v5, %v6806_v62  ;;  %v5128_v62 = vrot.slane %v443_v5, %v6808_v59 }
 0x1e4   :  { %1410 = vmatpush2.bf16.msra.mxu0 %v6799_v55  ;;  %1451 = vmatpush2.bf16.msra.mxu1 %v6800_v10 }
 0x1e5   :  { %1489 = vmatprep.subr.bf16.mxu0 %v5110_v56  ;;  %1530 = vmatprep.subr.bf16.mxu1 %v5113_v38  ;;  %6805 = vst [vmem:[#allocation26_spill] sm:$0xff] %v5118_v58  ;;  %6807 = vst [vmem:[#allocation27_spill] sm:$0xff] %v5122_v1 }
 0x1e6   :  { %6809 = vst [vmem:[#allocation28_spill] sm:$0xff] %v5128_v62 }
 0x247   :  { %v1191_v55 = vpop.f32.mrf.mxu0  ;;  %v1232_v9 = vpop.f32.mrf.mxu1 }
 0x248   :  { %v1192_v10 = vadd.f32 %v1191_v55, %v5118_v58  ;;  %v6810_v55 = vsub.s32 2, %v6803_v29 }
 0x249   :  { %v1193_v8 = vpop.f32.mrf.mxu0  ;;  %v1234_v54 = vpop.f32.mrf.mxu1 }
 0x24a   :  { %v3407_v56 = vmul.f32 -1.442695, %v1192_v10  ;;  %v1194_v7 = vadd.f32 %v1193_v8, %v5122_v1  ;;  %v1235_v63 = vadd.f32 %v1234_v54, %v5128_v62  ;;  %v5133_v58 = vrot.slane %v443_v5, %v6810_v55  ;;  %v6813_v62 = vld [vmem:[#allocation82_spill] sm:$0xff] }
 0x24b   :  { %v1195_v0 = vpop.f32.mrf.mxu0  ;;  %v1236_v38 = vpop.f32.mrf.mxu1 }
 0x24c   :  { %3829 = vpow2.f32 %v3407_v56  ;;  %v3408_v61 = vmul.f32 -1.442695, %v1194_v7  ;;  %6811 = vst [vmem:[#allocation29_spill] sm:$0xff] %v5133_v58  ;;  %v3409_v10 = vmul.f32 -1.442695, %v1235_v63  ;;  %v1233_v0 = vadd.f32 %v1232_v9, %v5133_v58  ;;  %v6812_v38 = vld [vmem:[#allocation80_spill] sm:$0xff] }
 0x24d   :  { %v1196_v11 = vpop.f32.mrf.mxu0  ;;  %v1237_v57 = vpop.f32.mrf.mxu1 }
 0x24e   :  { %3831 = vpow2.f32 %v3408_v61 }
 0x24f   :  { %3833 = vpow2.f32 %v3409_v10 }
 0x259   :  { %v3830_v2 = vpop.eup %3829 }
 0x25a   :  { %v1242_v8 = vadd.f32 1.0, %v3830_v2 }
 0x25b   :  { %v3832_v56 = vpop.eup %3831 }
 0x25c   :  { %3835 = vrcp.f32 %v1242_v8  ;;  %v1248_v11 = vadd.f32 1.0, %v3832_v56  ;;  %v3834_v7 = vpop.eup %3833 }
 0x25d   :  { %3837 = vtanh.f32 %v1233_v0  ;;  %v1255_v2 = vadd.f32 1.0, %v3834_v7 }
 0x25e   :  { %3839 = vrcp.f32 %v1248_v11 }
 0x267   :  { %v1301_v61 = vpop.f32.mrf.mxu0  ;;  %v1342_v59 = vpop.f32.mrf.mxu1 }
 0x268   :  { %v1349_v54 = vadd.f32 %v1301_v61, %v6812_v38  ;;  %v6814_v61 = vld [vmem:[#allocation83_spill] sm:$0xff] }
 0x269   :  { %v3836_v57 = vpop.eup %3835  ;;  %v1303_v29 = vpop.f32.mrf.mxu0 }
 0x26a   :  { %v1344_v5 = vpop.f32.mrf.mxu1  ;;  %v3838_v55 = vpop.eup %3837  ;;  %v3410_v63 = vmul.f32 -1.442695, %v1349_v54  ;;  %v1350_v1 = vadd.f32 %v1303_v29, %v6813_v62  ;;  %v6815_v54 = vld [vmem:[#allocation81_spill] sm:$0xff] }
 0x26b   :  { %v3840_v9 = vpop.eup %3839  ;;  %v1305_v58 = vpop.f32.mrf.mxu0  ;;  %v1259_v56 = vmul.f32 %v3838_v55, %v3836_v57  ;;  %v1352_v38 = vadd.f32 %v1344_v5, %v6814_v61  ;;  %v1351_v62 = vadd.f32 %v1342_v59, %v6815_v54 }
 0x26c   :  { %v1346_v10 = vpop.f32.mrf.mxu1  ;;  %v1258_v8 = vmul.f32 0.0, %v3840_v9  ;;  %3841 = vpow2.f32 %v3410_v63  ;;  %v3411_v0 = vmul.f32 -1.442695, %v1350_v1 }
 0x26d   :  { %v1306_v11 = vpop.f32.mrf.mxu0  ;;  %v3412_v29 = vmul.f32 -1.442695, %v1352_v38 }
 0x26e   :  { %v1347_v4 = vpop.f32.mrf.mxu1  ;;  %v5138_v3 = vadd.f32 %v1259_v56, %v1258_v8  ;;  %3843 = vpow2.f32 %v3411_v0 }
 0x26f   :  { %3845 = vrcp.f32 %v1255_v2 }
 0x270   :  { %3847 = vtanh.f32 %v5138_v3 }
 0x271   :  { %3849 = vtanh.f32 %v1351_v62 }
 0x272   :  { %3851 = vpow2.f32 %v3412_v29  ;;  %v5151_v29 = vld [vmem:[#allocation6 + $0xe0] ss:$16 sps:$4 sm:$0xff]  }
 0x279   :  { %v3842_v7 = vpop.eup %3841 }
 0x27a   :  { %v1356_v58 = vadd.f32 1.0, %v3842_v7  ;;  %v5154_v7 = vld [vmem:[#allocation6 + $0xe8] ss:$16 sps:$4 sm:$0xff]  }
 0x27b   :  { %v3844_v9 = vpop.eup %3843 }
 0x27c   :  { %v3846_v57 = vpop.eup %3845  ;;  %3853 = vrcp.f32 %v1356_v58  ;;  %v1362_v1 = vadd.f32 1.0, %v3844_v9  ;;  %v5160_v58 = vld [vmem:[#allocation6 + $0xcc] ss:$16 sps:$4 sm:$0xff]   ;;  %v5165_v9 = vld [vmem:[#allocation6 + $0xc0] ss:$16 sps:$4 sm:$0xff]  }
 0x27d   :  { %v3848_v4 = vpop.eup %3847 }
 0x27e   :  { %3855 = vrcp.f32 %v1362_v1  ;;  %v1262_v55 = vmul.f32 %v3848_v4, %v3846_v57  ;;  %v3850_v2 = vpop.eup %3849  ;;  %v5168_v57 = vld [vmem:[#allocation6 + $0xc8] ss:$16 sps:$4 sm:$0xff]   ;;  %v5171_v1 = vld [vmem:[#allocation6 + $0xa4] ss:$16 sps:$4 sm:$0xff]   ;;  %v5174_v4 = vld [vmem:[#allocation6 + $0xac] ss:$16 sps:$4 sm:$0xff]  }
 0x27f   :  { %v3852_v10 = vpop.eup %3851 }
 0x280   :  { %v1378_v63 = vpack.c.bf16 %v1262_v55, %v1262_v55  ;;  %v1369_v56 = vadd.f32 1.0, %v3852_v10  ;;  %v5177_v55 = vld [vmem:[#allocation6 + $0xa0] ss:$16 sps:$4 sm:$0xff]   ;;  %v5186_v10 = vld [vmem:[#allocation6 + $0x8c] ss:$16 sps:$4 sm:$0xff]  }
 0x282   :  { %1411 = vmatprep.mubr.bf16.mxu0 %v1378_v63  ;;  %1452 = vmatprep.mubr.bf16.mxu1 %v1378_v63  ;;  %3857 = vrcp.f32 %v1369_v56  ;;  %v5180_v63 = vld [vmem:[#allocation6 + $0xa8] ss:$16 sps:$4 sm:$0xff]   ;;  %v5198_v56 = vld [vmem:[#allocation6 + $0x6c] ss:$16 sps:$4 sm:$0xff]  }
 0x283   :  { %6817 = vst [vmem:[#allocation31_spill] sm:$0xff] %v5198_v56 }
 0x289   :  { %v3854_v5 = vpop.eup %3853 }
 0x28a   :  { %v1373_v8 = vmul.f32 %v3854_v5, %v3850_v2  ;;  %v5183_v2 = vld [vmem:[#allocation6 + $0x84] ss:$16 sps:$4 sm:$0xff]   ;;  %v5189_v5 = vld [vmem:[#allocation6 + $0x80] ss:$16 sps:$4 sm:$0xff]  }
 0x28b   :  { %v3856_v59 = vpop.eup %3855 }
 0x28c   :  { %v1372_v0 = vmul.f32 %v3856_v59, %v5011_v60  ;;  %v5157_v60 = vld [vmem:[#allocation6 + $0xc4] ss:$16 sps:$4 sm:$0xff]  }
 0x28d   :  { %v5195_v59 = vld [vmem:[#allocation6 + $0x64] ss:$16 sps:$4 sm:$0xff]  }
 0x28e   :  { %v5144_v11 = vadd.f32 %v1373_v8, %v1372_v0  ;;  %v5192_v8 = vld [vmem:[#allocation6 + $0x88] ss:$16 sps:$4 sm:$0xff]   ;;  %6816 = vst [vmem:[#allocation30_spill] sm:$0xff] %v5195_v59  ;;  %v5201_v0 = vld [vmem:[#allocation6 + $0x60] ss:$16 sps:$4 sm:$0xff]  }
 0x28f   :  { %v3858_v61 = vpop.eup %3857  ;;  %6818 = vst [vmem:[#allocation32_spill] sm:$0xff] %v5201_v0 }
 0x290   :  { %3859 = vtanh.f32 %v5144_v11 }
 0x29d   :  { %v3860_v38 = vpop.eup %3859 }
 0x29e   :  { %v1376_v54 = vmul.f32 %v3860_v38, %v3858_v61  ;;  %v5204_v61 = vld [vmem:[#allocation6 + $0x68] ss:$16 sps:$4 sm:$0xff]   ;;  %v5207_v38 = vld [vmem:[#allocation6 + $0x44] ss:$16 sps:$4 sm:$0xff]  }
 0x29f   :  { %6819 = vst [vmem:[#allocation33_spill] sm:$0xff] %v5204_v61  ;;  %6820 = vst [vmem:[#allocation34_spill] sm:$0xff] %v5207_v38 }
 0x2a0   :  { %v5147_v62 = vpack.c.bf16 %v1376_v54, %v1376_v54  ;;  %v5210_v54 = vld [vmem:[#allocation6 + $0x4c] ss:$16 sps:$4 sm:$0xff]  }
 0x2a1   :  { %6821 = vst [vmem:[#allocation35_spill] sm:$0xff] %v5210_v54 }
 0x2a2   :  { %1412 = vmatmul.mubr.bf16.vlgmr.msra.gmra.mxu0 %v5147_v62  ;;  %1453 = vmatmul.mubr.bf16.vlgmr.msra.gmra.mxu1 %v5147_v62 }
 0x2a3   :  { %1490 = vmatpush1.bf16.msra.mxu0 %v5151_v29  ;;  %1531 = vmatpush1.bf16.msra.mxu1 %v5154_v7 }
 0x2a4   :  { %1491 = vmatprep.subr.bf16.mxu0 %v5157_v60  ;;  %1532 = vmatprep.subr.bf16.mxu1 %v5160_v58 }
 0x2a5   :  { %1521 = vmatprep.mubr.bf16.mxu0 %v6745_v19  ;;  %1562 = vmatprep.mubr.bf16.mxu1 %v6745_v19 }
 0x2a7   :  { %1492 = vmatpush1.bf16.msra.mxu0 %v5165_v9  ;;  %1533 = vmatpush1.bf16.msra.mxu1 %v5168_v57 }
 0x2a8   :  { %1493 = vmatprep.subr.bf16.mxu0 %v5171_v1  ;;  %1534 = vmatprep.subr.bf16.mxu1 %v5174_v4 }
 0x2ab   :  { %1494 = vmatpush1.bf16.msra.mxu0 %v5177_v55  ;;  %1535 = vmatpush1.bf16.msra.mxu1 %v5180_v63 }
 0x2ac   :  { %1495 = vmatprep.subr.bf16.mxu0 %v5183_v2  ;;  %1536 = vmatprep.subr.bf16.mxu1 %v5186_v10 }
 0x2af   :  { %1496 = vmatpush1.bf16.msra.mxu0 %v5189_v5  ;;  %1537 = vmatpush1.bf16.msra.mxu1 %v5192_v8 }
 0x2b0   :  { %1497 = vmatprep.subr.bf16.mxu0 %v5195_v59  ;;  %1538 = vmatprep.subr.bf16.mxu1 %v5198_v56  ;;  %v5213_v59 = vld [vmem:[#allocation6 + $0x40] ss:$16 sps:$4 sm:$0xff]   ;;  %v5216_v56 = vld [vmem:[#allocation6 + $0x48] ss:$16 sps:$4 sm:$0xff]  }
 0x2b1   :  { %6822 = vst [vmem:[#allocation36_spill] sm:$0xff] %v5213_v59  ;;  %6823 = vst [vmem:[#allocation37_spill] sm:$0xff] %v5216_v56 }
 0x2b3   :  { %1498 = vmatpush1.bf16.msra.mxu0 %v5201_v0  ;;  %1539 = vmatpush1.bf16.msra.mxu1 %v5204_v61  ;;  %v5219_v0 = vld [vmem:[#allocation6 + $0x24] ss:$16 sps:$4 sm:$0xff]   ;;  %v5222_v61 = vld [vmem:[#allocation6 + $0x2c] ss:$16 sps:$4 sm:$0xff]  }
 0x2b4   :  { %1499 = vmatprep.subr.bf16.mxu0 %v5207_v38  ;;  %1540 = vmatprep.subr.bf16.mxu1 %v5210_v54  ;;  %6824 = vst [vmem:[#allocation38_spill] sm:$0xff] %v5219_v0  ;;  %6825 = vst [vmem:[#allocation39_spill] sm:$0xff] %v5222_v61  ;;  %v5225_v38 = vld [vmem:[#allocation6 + $0x20] ss:$16 sps:$4 sm:$0xff]   ;;  %v5228_v54 = vld [vmem:[#allocation6 + $0x28] ss:$16 sps:$4 sm:$0xff]  }
 0x2b7   :  { %1500 = vmatpush1.bf16.msra.mxu0 %v5213_v59  ;;  %1541 = vmatpush1.bf16.msra.mxu1 %v5216_v56  ;;  %v5231_v59 = vld [vmem:[#allocation6 + $0x4] ss:$16 sps:$4 sm:$0xff]   ;;  %v5234_v56 = vld [vmem:[#allocation6 + $0xc] ss:$16 sps:$4 sm:$0xff]  }
 0x2b8   :  { %1501 = vmatprep.subr.bf16.mxu0 %v5219_v0  ;;  %1542 = vmatprep.subr.bf16.mxu1 %v5222_v61  ;;  %v5237_v0 = vld [vmem:[#allocation6] ss:$16 sps:$4 sm:$0xff]   ;;  %v5240_v61 = vld [vmem:[#allocation6 + $0x8] ss:$16 sps:$4 sm:$0xff]  }
 0x2bb   :  { %1502 = vmatpush1.bf16.msra.mxu0 %v5225_v38  ;;  %1543 = vmatpush1.bf16.msra.mxu1 %v5228_v54 }
 0x2bc   :  { %1503 = vmatprep.subr.bf16.mxu0 %v5231_v59  ;;  %1544 = vmatprep.subr.bf16.mxu1 %v5234_v56 }
 0x2bf   :  { %1504 = vmatpush1.bf16.msra.mxu0 %v5237_v0  ;;  %1545 = vmatpush1.bf16.msra.mxu1 %v5240_v61 }
 0x2c0   :  { %1601 = vmatprep.subr.bf16.mxu0 %v4715_v45  ;;  %1642 = vmatprep.subr.bf16.mxu1 %v4717_v46  ;;  %v6826_v45 = vld [vmem:[#allocation55_spill] sm:$0xff]  ;;  %v6827_v46 = vld [vmem:[#allocation56_spill] sm:$0xff] }
 0x2c2   :  { %1522 = vmatmul.mubr.bf16.vlgmr.msra.gmra.mxu0 %v5147_v62  ;;  %1563 = vmatmul.mubr.bf16.vlgmr.msra.gmra.mxu1 %v5147_v62  ;;  %v6854_v62 = vld [vmem:[#allocation28_spill] sm:$0xff] }
 0x2c3   :  { %1602 = vmatpush1.bf16.msra.mxu0 %v4719_v47  ;;  %1643 = vmatpush1.bf16.msra.mxu1 %v4721_v48  ;;  %v6828_v47 = vld [vmem:[#allocation57_spill] sm:$0xff]  ;;  %v6829_v48 = vld [vmem:[#allocation58_spill] sm:$0xff] }
 0x2c4   :  { %1603 = vmatprep.subr.bf16.mxu0 %v4727_v49  ;;  %1644 = vmatprep.subr.bf16.mxu1 %v4729_v50  ;;  %v6830_v49 = vld [vmem:[#allocation59_spill] sm:$0xff]  ;;  %v6831_v50 = vld [vmem:[#allocation60_spill] sm:$0xff] }
 0x2c7   :  { %1604 = vmatpush1.bf16.msra.mxu0 %v4731_v51  ;;  %1645 = vmatpush1.bf16.msra.mxu1 %v4733_v52  ;;  %v6832_v51 = vld [vmem:[#allocation61_spill] sm:$0xff]  ;;  %v6833_v52 = vld [vmem:[#allocation62_spill] sm:$0xff] }
 0x2c8   :  { %1605 = vmatprep.subr.bf16.mxu0 %v4739_v53  ;;  %1646 = vmatprep.subr.bf16.mxu1 %v6746_v12  ;;  %v6834_v53 = vld [vmem:[#allocation63_spill] sm:$0xff]  ;;  %v6835_v12 = vld [vmem:[#allocation64_spill] sm:$0xff] }
 0x2cb   :  { %1606 = vmatpush1.bf16.msra.mxu0 %v6747_v13  ;;  %1647 = vmatpush1.bf16.msra.mxu1 %v6748_v14  ;;  %v6836_v13 = vld [vmem:[#allocation65_spill] sm:$0xff]  ;;  %v6837_v14 = vld [vmem:[#allocation66_spill] sm:$0xff] }
 0x2cc   :  { %1607 = vmatprep.subr.bf16.mxu0 %v6749_v15  ;;  %1648 = vmatprep.subr.bf16.mxu1 %v6750_v16  ;;  %v6838_v15 = vld [vmem:[#allocation67_spill] sm:$0xff]  ;;  %v6839_v16 = vld [vmem:[#allocation68_spill] sm:$0xff] }
 0x2cf   :  { %1608 = vmatpush1.bf16.msra.mxu0 %v6751_v17  ;;  %1649 = vmatpush1.bf16.msra.mxu1 %v6752_v18  ;;  %v6840_v17 = vld [vmem:[#allocation69_spill] sm:$0xff]  ;;  %v6841_v18 = vld [vmem:[#allocation70_spill] sm:$0xff] }
 0x2d0   :  { %1609 = vmatprep.subr.bf16.mxu0 %v6753_v20  ;;  %1650 = vmatprep.subr.bf16.mxu1 %v6754_v21  ;;  %v6842_v20 = vld [vmem:[#allocation71_spill] sm:$0xff]  ;;  %v6843_v21 = vld [vmem:[#allocation72_spill] sm:$0xff] }
 0x2d3   :  { %1610 = vmatpush1.bf16.msra.mxu0 %v6755_v22  ;;  %1651 = vmatpush1.bf16.msra.mxu1 %v6756_v23  ;;  %v6844_v22 = vld [vmem:[#allocation73_spill] sm:$0xff]  ;;  %v6845_v23 = vld [vmem:[#allocation74_spill] sm:$0xff] }
 0x2d4   :  { %1611 = vmatprep.subr.bf16.mxu0 %v6757_v24  ;;  %1652 = vmatprep.subr.bf16.mxu1 %v6758_v25  ;;  %v6846_v24 = vld [vmem:[#allocation75_spill] sm:$0xff]  ;;  %v6847_v25 = vld [vmem:[#allocation76_spill] sm:$0xff] }
 0x2d7   :  { %1612 = vmatpush1.bf16.msra.mxu0 %v6759_v26  ;;  %1653 = vmatpush1.bf16.msra.mxu1 %v6760_v27  ;;  %v6848_v26 = vld [vmem:[#allocation77_spill] sm:$0xff]  ;;  %v6849_v27 = vld [vmem:[#allocation78_spill] sm:$0xff] }
 0x2d8   :  { %1613 = vmatprep.subr.bf16.mxu0 %v6761_v28  ;;  %1654 = vmatprep.subr.bf16.mxu1 %v6762_v30  ;;  %v6850_v28 = vld [vmem:[#allocation24_spill] sm:$0xff]  ;;  %v6851_v30 = vld [vmem:[#allocation25_spill] sm:$0xff] }
 0x2db   :  { %1614 = vmatpush1.bf16.msra.mxu0 %v6763_v31  ;;  %1655 = vmatpush1.bf16.msra.mxu1 %v6764_v32 }
 0x2dc   :  { %1615 = vmatprep.subr.bf16.mxu0 %v6765_v33  ;;  %1656 = vmatprep.subr.bf16.mxu1 %v6766_v34  ;;  %v6852_v33 = vld [vmem:[#allocation26_spill] sm:$0xff] }
 0x2df   :  { %1616 = vmatpush1.bf16.msra.mxu0 %v6767_v35  ;;  %1657 = vmatpush1.bf16.msra.mxu1 %v6768_v36 }
 0x2e0   :  { %1617 = vmatprep.subr.bf16.mxu0 %v6769_v37  ;;  %1658 = vmatprep.subr.bf16.mxu1 %v6770_v39  ;;  %v6853_v39 = vld [vmem:[#allocation27_spill] sm:$0xff] }
 0x2e3   :  { %1618 = vmatpush2.bf16.msra.mxu0 %v6771_v40  ;;  %1659 = vmatpush2.bf16.msra.mxu1 %v6772_v41 }
 0x2e4   :  { %1619 = vmatprep.subr.bf16.mxu0 %v6773_v42  ;;  %1660 = vmatprep.subr.bf16.mxu1 %v6774_v43 }
 0x2e7   :  { %1620 = vmatpush2.bf16.msra.mxu0 %v6775_v44  ;;  %1661 = vmatpush2.bf16.msra.mxu1 %v6776_v6 }
 0x2e8   :  { %1621 = vmatprep.subr.bf16.mxu0 %v6826_v45  ;;  %1662 = vmatprep.subr.bf16.mxu1 %v6827_v46 }
 0x2eb   :  { %1622 = vmatpush2.bf16.msra.mxu0 %v6828_v47  ;;  %1663 = vmatpush2.bf16.msra.mxu1 %v6829_v48  ;;  %v6855_v48 = vld [vmem:[#allocation29_spill] sm:$0xff] }
 0x2ec   :  { %1623 = vmatprep.subr.bf16.mxu0 %v6830_v49  ;;  %1664 = vmatprep.subr.bf16.mxu1 %v6831_v50 }
 0x2ef   :  { %1624 = vmatpush2.bf16.msra.mxu0 %v6832_v51  ;;  %1665 = vmatpush2.bf16.msra.mxu1 %v6833_v52 }
 0x2f0   :  { %1625 = vmatprep.subr.bf16.mxu0 %v6834_v53  ;;  %1666 = vmatprep.subr.bf16.mxu1 %v6835_v12 }
 0x2f3   :  { %1626 = vmatpush2.bf16.msra.mxu0 %v6836_v13  ;;  %1667 = vmatpush2.bf16.msra.mxu1 %v6837_v14  ;;  %v6856_v14 = vld [vmem:[#allocation84_spill] sm:$0xff] }
 0x2f4   :  { %1627 = vmatprep.subr.bf16.mxu0 %v6838_v15  ;;  %1668 = vmatprep.subr.bf16.mxu1 %v6839_v16 }
 0x2f7   :  { %1628 = vmatpush2.bf16.msra.mxu0 %v6840_v17  ;;  %1669 = vmatpush2.bf16.msra.mxu1 %v6841_v18 }
 0x2f8   :  { %1629 = vmatprep.subr.bf16.mxu0 %v6842_v20  ;;  %1670 = vmatprep.subr.bf16.mxu1 %v6843_v21 }
 0x2fb   :  { %1630 = vmatpush2.bf16.msra.mxu0 %v6844_v22  ;;  %1671 = vmatpush2.bf16.msra.mxu1 %v6845_v23  ;;  %v6857_v22 = vld [vmem:[#allocation86_spill] sm:$0xff] }
 0x2fc   :  { %1631 = vmatprep.subr.bf16.mxu0 %v6846_v24  ;;  %1672 = vmatprep.subr.bf16.mxu1 %v6847_v25 }
 0x2ff   :  { %1632 = vmatpush2.bf16.msra.mxu0 %v6848_v26  ;;  %1673 = vmatpush2.bf16.msra.mxu1 %v6849_v27 }
 0x300   :  { %1711 = vmatprep.subr.bf16.mxu0 %v6850_v28  ;;  %1752 = vmatprep.subr.bf16.mxu1 %v6851_v30 }
 0x362   :  { %v1413_v31 = vpop.f32.mrf.mxu0  ;;  %v1454_v32 = vpop.f32.mrf.mxu1 }
 0x363   :  { %v1414_v34 = vadd.f32 %v1413_v31, %v6852_v33  ;;  %v1455_v49 = vadd.f32 %v1454_v32, %v6855_v48 }
 0x364   :  { %v1415_v35 = vpop.f32.mrf.mxu0  ;;  %v1456_v36 = vpop.f32.mrf.mxu1 }
 0x365   :  { %v3413_v37 = vmul.f32 -1.442695, %v1414_v34  ;;  %v1416_v40 = vadd.f32 %v1415_v35, %v6853_v39  ;;  %v1457_v45 = vadd.f32 %v1456_v36, %v6854_v62 }
 0x366   :  { %v1417_v41 = vpop.f32.mrf.mxu0  ;;  %v1458_v42 = vpop.f32.mrf.mxu1 }
 0x367   :  { %3861 = vpow2.f32 %v3413_v37  ;;  %v3414_v43 = vmul.f32 -1.442695, %v1416_v40  ;;  %v3415_v46 = vmul.f32 -1.442695, %v1457_v45  ;;  %v6858_v40 = vld [vmem:[#allocation87_spill] sm:$0xff]  ;;  %v6859_v42 = vld [vmem:[#allocation85_spill] sm:$0xff] }
 0x368   :  { %v1418_v44 = vpop.f32.mrf.mxu0  ;;  %v1459_v6 = vpop.f32.mrf.mxu1 }
 0x369   :  { %3863 = vpow2.f32 %v3414_v43 }
 0x36a   :  { %3865 = vpow2.f32 %v3415_v46 }
 0x374   :  { %v3862_v47 = vpop.eup %3861 }
 0x375   :  { %v1464_v50 = vadd.f32 1.0, %v3862_v47 }
 0x376   :  { %v3864_v51 = vpop.eup %3863 }
 0x377   :  { %3867 = vrcp.f32 %v1464_v50  ;;  %v1470_v52 = vadd.f32 1.0, %v3864_v51  ;;  %v3866_v13 = vpop.eup %3865 }
 0x378   :  { %3869 = vtanh.f32 %v1455_v49  ;;  %v1477_v25 = vadd.f32 1.0, %v3866_v13 }
 0x379   :  { %3871 = vrcp.f32 %v1470_v52 }
 0x382   :  { %v1523_v53 = vpop.f32.mrf.mxu0  ;;  %v1564_v12 = vpop.f32.mrf.mxu1 }
 0x383   :  { %v1571_v15 = vadd.f32 %v1523_v53, %v6856_v14  ;;  %v1573_v43 = vadd.f32 %v1564_v12, %v6859_v42  ;;  %v5368_v42 = vld [vmem:[#allocation9 + $0xe8] ss:$16 sps:$4 sm:$0xff]  }
 0x384   :  { %v3868_v16 = vpop.eup %3867  ;;  %v1525_v17 = vpop.f32.mrf.mxu0 }
 0x385   :  { %v1566_v18 = vpop.f32.mrf.mxu1  ;;  %v3870_v20 = vpop.eup %3869  ;;  %v3416_v21 = vmul.f32 -1.442695, %v1571_v15  ;;  %v1572_v23 = vadd.f32 %v1525_v17, %v6857_v22 }
 0x386   :  { %v3872_v24 = vpop.eup %3871  ;;  %v1527_v26 = vpop.f32.mrf.mxu0  ;;  %v1481_v31 = vmul.f32 %v3870_v20, %v3868_v16  ;;  %v1574_v41 = vadd.f32 %v1566_v18, %v6858_v40  ;;  %v5362_v40 = vld [vmem:[#allocation9 + $0xec] ss:$16 sps:$4 sm:$0xff]  }
 0x387   :  { %v1568_v27 = vpop.f32.mrf.mxu1  ;;  %v1480_v32 = vmul.f32 %v3872_v24, %v5138_v3  ;;  %3873 = vpow2.f32 %v3416_v21  ;;  %v3417_v34 = vmul.f32 -1.442695, %v1572_v23  ;;  %v6861_v23 = vld [vmem:[#allocation31_spill] sm:$0xff]  ;;  %v6862_v24 = vld [vmem:[#allocation32_spill] sm:$0xff]  ;;  %v6864_v26 = vld [vmem:[#allocation34_spill] sm:$0xff] }
 0x388   :  { %v1528_v35 = vpop.f32.mrf.mxu0  ;;  %v3418_v44 = vmul.f32 -1.442695, %v1574_v41  ;;  %v6865_v27 = vld [vmem:[#allocation35_spill] sm:$0xff]  ;;  %v5365_v41 = vld [vmem:[#allocation9 + $0xe0] ss:$16 sps:$4 sm:$0xff]  }
 0x389   :  { %v1569_v36 = vpop.f32.mrf.mxu1  ;;  %3875 = vpow2.f32 %v3417_v34  ;;  %v5318_v37 = vadd.f32 %v1481_v31, %v1480_v32  ;;  %v6866_v31 = vld [vmem:[#allocation36_spill] sm:$0xff]  ;;  %v6867_v32 = vld [vmem:[#allocation37_spill] sm:$0xff]  ;;  %v6868_v34 = vld [vmem:[#allocation38_spill] sm:$0xff] }
 0x38a   :  { %3877 = vrcp.f32 %v1477_v25  ;;  %v6863_v25 = vld [vmem:[#allocation33_spill] sm:$0xff]  ;;  %v6869_v35 = vld [vmem:[#allocation39_spill] sm:$0xff] }
 0x38b   :  { %3879 = vtanh.f32 %v5318_v37  ;;  %v5359_v36 = vld [vmem:[#allocation9 + $0xe4] ss:$16 sps:$4 sm:$0xff]  }
 0x38c   :  { %3881 = vtanh.f32 %v1573_v43  ;;  %v5371_v43 = vld [vmem:[#allocation9 + $0xc4] ss:$16 sps:$4 sm:$0xff]  }
 0x38d   :  { %3883 = vpow2.f32 %v3418_v44  ;;  %v5374_v44 = vld [vmem:[#allocation9 + $0xcc] ss:$16 sps:$4 sm:$0xff]  }
 0x394   :  { %v3874_v6 = vpop.eup %3873 }
 0x395   :  { %v1578_v45 = vadd.f32 1.0, %v3874_v6  ;;  %v5377_v6 = vld [vmem:[#allocation9 + $0xc0] ss:$16 sps:$4 sm:$0xff]  }
 0x396   :  { %v3876_v46 = vpop.eup %3875 }
 0x397   :  { %v3878_v3 = vpop.eup %3877  ;;  %3885 = vrcp.f32 %v1578_v45  ;;  %v1584_v47 = vadd.f32 1.0, %v3876_v46  ;;  %v5380_v45 = vld [vmem:[#allocation9 + $0xc8] ss:$16 sps:$4 sm:$0xff]   ;;  %v5383_v46 = vld [vmem:[#allocation9 + $0xa4] ss:$16 sps:$4 sm:$0xff]  }
 0x398   :  { %v3880_v49 = vpop.eup %3879 }
 0x399   :  { %3887 = vrcp.f32 %v1584_v47  ;;  %v1484_v50 = vmul.f32 %v3880_v49, %v3878_v3  ;;  %v3882_v52 = vpop.eup %3881  ;;  %v5386_v3 = vld [vmem:[#allocation9 + $0xac] ss:$16 sps:$4 sm:$0xff]   ;;  %v5389_v47 = vld [vmem:[#allocation9 + $0xa0] ss:$16 sps:$4 sm:$0xff]   ;;  %v5392_v49 = vld [vmem:[#allocation9 + $0xa8] ss:$16 sps:$4 sm:$0xff]  }
 0x39a   :  { %v3884_v53 = vpop.eup %3883  ;;  %6870 = vst [vmem:[#allocation40_spill] sm:$0xff] %v5389_v47  ;;  %6871 = vst [vmem:[#allocation41_spill] sm:$0xff] %v5392_v49 }
 0x39b   :  { %v1600_v51 = vpack.c.bf16 %v1484_v50, %v1484_v50  ;;  %v1591_v15 = vadd.f32 1.0, %v3884_v53  ;;  %v5395_v50 = vld [vmem:[#allocation9 + $0x84] ss:$16 sps:$4 sm:$0xff]   ;;  %v5404_v53 = vld [vmem:[#allocation9 + $0x88] ss:$16 sps:$4 sm:$0xff]  }
 0x39c   :  { %6872 = vst [vmem:[#allocation42_spill] sm:$0xff] %v5395_v50  ;;  %6875 = vst [vmem:[#allocation45_spill] sm:$0xff] %v5404_v53 }
 0x39d   :  { %1633 = vmatprep.mubr.bf16.mxu0 %v1600_v51  ;;  %1674 = vmatprep.mubr.bf16.mxu1 %v1600_v51  ;;  %3889 = vrcp.f32 %v1591_v15  ;;  %v5398_v51 = vld [vmem:[#allocation9 + $0x8c] ss:$16 sps:$4 sm:$0xff]   ;;  %v5416_v15 = vld [vmem:[#allocation9 + $0x68] ss:$16 sps:$4 sm:$0xff]  }
 0x39e   :  { %6873 = vst [vmem:[#allocation43_spill] sm:$0xff] %v5398_v51  ;;  %6879 = vst [vmem:[#allocation49_spill] sm:$0xff] %v5416_v15 }
 0x3a4   :  { %v3886_v13 = vpop.eup %3885 }
 0x3a5   :  { %v1595_v14 = vmul.f32 %v3886_v13, %v3882_v52  ;;  %v5401_v52 = vld [vmem:[#allocation9 + $0x80] ss:$16 sps:$4 sm:$0xff]   ;;  %v5407_v13 = vld [vmem:[#allocation9 + $0x64] ss:$16 sps:$4 sm:$0xff]  }
 0x3a6   :  { %v3888_v12 = vpop.eup %3887  ;;  %6874 = vst [vmem:[#allocation44_spill] sm:$0xff] %v5401_v52  ;;  %6876 = vst [vmem:[#allocation46_spill] sm:$0xff] %v5407_v13 }
 0x3a7   :  { %v1594_v16 = vmul.f32 %v3888_v12, %v5144_v11  ;;  %v6860_v11 = vld [vmem:[#allocation30_spill] sm:$0xff] }
 0x3a8   :  { %v5413_v12 = vld [vmem:[#allocation9 + $0x60] ss:$16 sps:$4 sm:$0xff]  }
 0x3a9   :  { %v5324_v17 = vadd.f32 %v1595_v14, %v1594_v16  ;;  %v5410_v14 = vld [vmem:[#allocation9 + $0x6c] ss:$16 sps:$4 sm:$0xff]   ;;  %6878 = vst [vmem:[#allocation48_spill] sm:$0xff] %v5413_v12  ;;  %v5419_v16 = vld [vmem:[#allocation9 + $0x44] ss:$16 sps:$4 sm:$0xff]  }
 0x3aa   :  { %v3890_v18 = vpop.eup %3889  ;;  %6877 = vst [vmem:[#allocation47_spill] sm:$0xff] %v5410_v14  ;;  %6880 = vst [vmem:[#allocation50_spill] sm:$0xff] %v5419_v16 }
 0x3ab   :  { %3891 = vtanh.f32 %v5324_v17 }
 0x3b8   :  { %v3892_v20 = vpop.eup %3891 }
 0x3b9   :  { %v1598_v21 = vmul.f32 %v3892_v20, %v3890_v18  ;;  %v5422_v18 = vld [vmem:[#allocation9 + $0x4c] ss:$16 sps:$4 sm:$0xff]   ;;  %v5425_v20 = vld [vmem:[#allocation9 + $0x40] ss:$16 sps:$4 sm:$0xff]  }
 0x3ba   :  { %6881 = vst [vmem:[#allocation51_spill] sm:$0xff] %v5422_v18  ;;  %6882 = vst [vmem:[#allocation52_spill] sm:$0xff] %v5425_v20 }
 0x3bb   :  { %v1599_v22 = vpack.c.bf16 %v1598_v21, %v1598_v21  ;;  %v5428_v21 = vld [vmem:[#allocation9 + $0x48] ss:$16 sps:$4 sm:$0xff]  }
 0x3bc   :  { %6883 = vst [vmem:[#allocation53_spill] sm:$0xff] %v5428_v21 }
 0x3bd   :  { %1634 = vmatmul.mubr.bf16.vlgmr.msra.gmra.mxu0 %v1599_v22  ;;  %1675 = vmatmul.mubr.bf16.vlgmr.msra.gmra.mxu1 %v1599_v22 }
 0x3be   :  { %1712 = vmatpush1.bf16.msra.mxu0 %v5151_v29  ;;  %1753 = vmatpush1.bf16.msra.mxu1 %v5154_v7 }
 0x3bf   :  { %1713 = vmatprep.subr.bf16.mxu0 %v5157_v60  ;;  %1754 = vmatprep.subr.bf16.mxu1 %v5160_v58 }
 0x3c0   :  { %1743 = vmatprep.mubr.bf16.mxu0 %v6745_v19  ;;  %1784 = vmatprep.mubr.bf16.mxu1 %v6745_v19 }
 0x3c2   :  { %1714 = vmatpush1.bf16.msra.mxu0 %v5165_v9  ;;  %1755 = vmatpush1.bf16.msra.mxu1 %v5168_v57 }
 0x3c3   :  { %1715 = vmatprep.subr.bf16.mxu0 %v5171_v1  ;;  %1756 = vmatprep.subr.bf16.mxu1 %v5174_v4 }
 0x3c6   :  { %1716 = vmatpush1.bf16.msra.mxu0 %v5177_v55  ;;  %1757 = vmatpush1.bf16.msra.mxu1 %v5180_v63 }
 0x3c7   :  { %1717 = vmatprep.subr.bf16.mxu0 %v5183_v2  ;;  %1758 = vmatprep.subr.bf16.mxu1 %v5186_v10 }
 0x3ca   :  { %1718 = vmatpush1.bf16.msra.mxu0 %v5189_v5  ;;  %1759 = vmatpush1.bf16.msra.mxu1 %v5192_v8 }
 0x3cb   :  { %1719 = vmatprep.subr.bf16.mxu0 %v6860_v11  ;;  %1760 = vmatprep.subr.bf16.mxu1 %v6861_v23 }
 0x3ce   :  { %1720 = vmatpush1.bf16.msra.mxu0 %v6862_v24  ;;  %1761 = vmatpush1.bf16.msra.mxu1 %v6863_v25 }
 0x3cf   :  { %1721 = vmatprep.subr.bf16.mxu0 %v6864_v26  ;;  %1762 = vmatprep.subr.bf16.mxu1 %v6865_v27 }
 0x3d2   :  { %1722 = vmatpush1.bf16.msra.mxu0 %v6866_v31  ;;  %1763 = vmatpush1.bf16.msra.mxu1 %v6867_v32 }
 0x3d3   :  { %1723 = vmatprep.subr.bf16.mxu0 %v6868_v34  ;;  %1764 = vmatprep.subr.bf16.mxu1 %v6869_v35 }
 0x3d6   :  { %1724 = vmatpush1.bf16.msra.mxu0 %v5225_v38  ;;  %1765 = vmatpush1.bf16.msra.mxu1 %v5228_v54 }
 0x3d7   :  { %1725 = vmatprep.subr.bf16.mxu0 %v5231_v59  ;;  %1766 = vmatprep.subr.bf16.mxu1 %v5234_v56 }
 0x3da   :  { %1726 = vmatpush1.bf16.msra.mxu0 %v5237_v0  ;;  %1767 = vmatpush1.bf16.msra.mxu1 %v5240_v61 }
 0x3db   :  { %1823 = vmatprep.subr.bf16.mxu0 %v5359_v36  ;;  %1864 = vmatprep.subr.bf16.mxu1 %v5362_v40 }
 0x3dd   :  { %1744 = vmatmul.mubr.bf16.vlgmr.msra.gmra.mxu0 %v1599_v22  ;;  %1785 = vmatmul.mubr.bf16.vlgmr.msra.gmra.mxu1 %v1599_v22  ;;  %v5431_v22 = vld [vmem:[#allocation9 + $0x24] ss:$16 sps:$4 sm:$0xff]  }
 0x3de   :  { %1824 = vmatpush1.bf16.msra.mxu0 %v5365_v41  ;;  %1865 = vmatpush1.bf16.msra.mxu1 %v5368_v42  ;;  %6884 = vst [vmem:[#allocation54_spill] sm:$0xff] %v5431_v22 }
 0x3df   :  { %1825 = vmatprep.subr.bf16.mxu0 %v5371_v43  ;;  %1866 = vmatprep.subr.bf16.mxu1 %v5374_v44 }
 0x3e2   :  { %1826 = vmatpush1.bf16.msra.mxu0 %v5377_v6  ;;  %1867 = vmatpush1.bf16.msra.mxu1 %v5380_v45 }
 0x3e3   :  { %1827 = vmatprep.subr.bf16.mxu0 %v5383_v46  ;;  %1868 = vmatprep.subr.bf16.mxu1 %v5386_v3 }
 0x3e6   :  { %1828 = vmatpush1.bf16.msra.mxu0 %v5389_v47  ;;  %1869 = vmatpush1.bf16.msra.mxu1 %v5392_v49 }
 0x3e7   :  { %1829 = vmatprep.subr.bf16.mxu0 %v5395_v50  ;;  %1870 = vmatprep.subr.bf16.mxu1 %v5398_v51 }
 0x3ea   :  { %1830 = vmatpush1.bf16.msra.mxu0 %v5401_v52  ;;  %1871 = vmatpush1.bf16.msra.mxu1 %v5404_v53 }
 0x3eb   :  { %1831 = vmatprep.subr.bf16.mxu0 %v5407_v13  ;;  %1872 = vmatprep.subr.bf16.mxu1 %v5410_v14 }
 0x3ee   :  { %1832 = vmatpush1.bf16.msra.mxu0 %v5413_v12  ;;  %1873 = vmatpush1.bf16.msra.mxu1 %v5416_v15  ;;  %v5434_v15 = vld [vmem:[#allocation9 + $0x2c] ss:$16 sps:$4 sm:$0xff]  }
 0x3ef   :  { %1833 = vmatprep.subr.bf16.mxu0 %v5419_v16  ;;  %1874 = vmatprep.subr.bf16.mxu1 %v5422_v18  ;;  %6885 = vst [vmem:[#allocation79_spill] sm:$0xff] %v5434_v15  ;;  %v5437_v16 = vld [vmem:[#allocation9 + $0x20] ss:$16 sps:$4 sm:$0xff]   ;;  %v5440_v18 = vld [vmem:[#allocation9 + $0x28] ss:$16 sps:$4 sm:$0xff]  }
 0x3f0   :  { %6886 = vst [vmem:[#allocation80_spill] sm:$0xff] %v5437_v16  ;;  %6887 = vst [vmem:[#allocation82_spill] sm:$0xff] %v5440_v18 }
 0x3f2   :  { %1834 = vmatpush1.bf16.msra.mxu0 %v5425_v20  ;;  %1875 = vmatpush1.bf16.msra.mxu1 %v5428_v21  ;;  %v5443_v20 = vld [vmem:[#allocation9 + $0x4] ss:$16 sps:$4 sm:$0xff]   ;;  %v5446_v21 = vld [vmem:[#allocation9 + $0xc] ss:$16 sps:$4 sm:$0xff]  }
 0x3f3   :  { %1835 = vmatprep.subr.bf16.mxu0 %v5431_v22  ;;  %1876 = vmatprep.subr.bf16.mxu1 %v5434_v15  ;;  %6888 = vst [vmem:[#allocation83_spill] sm:$0xff] %v5443_v20  ;;  %6889 = vst [vmem:[#allocation81_spill] sm:$0xff] %v5446_v21  ;;  %v5449_v22 = vld [vmem:[#allocation9] ss:$16 sps:$4 sm:$0xff]   ;;  %v5452_v15 = vld [vmem:[#allocation9 + $0x8] ss:$16 sps:$4 sm:$0xff]  }
 0x3f4   :  { %6890 = vst [vmem:[#allocation55_spill] sm:$0xff] %v5449_v22  ;;  %6891 = vst [vmem:[#allocation56_spill] sm:$0xff] %v5452_v15 }
 0x3f6   :  { %1836 = vmatpush1.bf16.msra.mxu0 %v5437_v16  ;;  %1877 = vmatpush1.bf16.msra.mxu1 %v5440_v18  ;;  %v5455_v16 = vld [vmem:[#allocation9 + $0x1e4] ss:$16 sps:$4 sm:$0xff]   ;;  %v5458_v18 = vld [vmem:[#allocation9 + $0x1ec] ss:$16 sps:$4 sm:$0xff]  }
 0x3f7   :  { %1837 = vmatprep.subr.bf16.mxu0 %v5443_v20  ;;  %1878 = vmatprep.subr.bf16.mxu1 %v5446_v21  ;;  %6892 = vst [vmem:[#allocation57_spill] sm:$0xff] %v5455_v16  ;;  %6893 = vst [vmem:[#allocation58_spill] sm:$0xff] %v5458_v18  ;;  %v5461_v20 = vld [vmem:[#allocation9 + $0x1e0] ss:$16 sps:$4 sm:$0xff]   ;;  %v5464_v21 = vld [vmem:[#allocation9 + $0x1e8] ss:$16 sps:$4 sm:$0xff]  }
 0x3f8   :  { %6894 = vst [vmem:[#allocation59_spill] sm:$0xff] %v5461_v20  ;;  %6895 = vst [vmem:[#allocation60_spill] sm:$0xff] %v5464_v21 }
 0x3fa   :  { %1838 = vmatpush1.bf16.msra.mxu0 %v5449_v22  ;;  %1879 = vmatpush1.bf16.msra.mxu1 %v5452_v15  ;;  %v5467_v22 = vld [vmem:[#allocation9 + $0x1c4] ss:$16 sps:$4 sm:$0xff]   ;;  %v5470_v15 = vld [vmem:[#allocation9 + $0x1cc] ss:$16 sps:$4 sm:$0xff]  }
 0x3fb   :  { %1839 = vmatprep.subr.bf16.mxu0 %v5455_v16  ;;  %1880 = vmatprep.subr.bf16.mxu1 %v5458_v18  ;;  %6896 = vst [vmem:[#allocation61_spill] sm:$0xff] %v5467_v22  ;;  %6897 = vst [vmem:[#allocation62_spill] sm:$0xff] %v5470_v15  ;;  %v5473_v16 = vld [vmem:[#allocation9 + $0x1c0] ss:$16 sps:$4 sm:$0xff]   ;;  %v5476_v18 = vld [vmem:[#allocation9 + $0x1c8] ss:$16 sps:$4 sm:$0xff]  }
 0x3fc   :  { %6898 = vst [vmem:[#allocation63_spill] sm:$0xff] %v5473_v16  ;;  %6899 = vst [vmem:[#allocation64_spill] sm:$0xff] %v5476_v18 }
 0x3fe   :  { %1840 = vmatpush2.bf16.msra.mxu0 %v5461_v20  ;;  %1881 = vmatpush2.bf16.msra.mxu1 %v5464_v21  ;;  %v5479_v20 = vld [vmem:[#allocation9 + $0x1a4] ss:$16 sps:$4 sm:$0xff]   ;;  %v5482_v21 = vld [vmem:[#allocation9 + $0x1ac] ss:$16 sps:$4 sm:$0xff]  }
 0x3ff   :  { %1841 = vmatprep.subr.bf16.mxu0 %v5467_v22  ;;  %1882 = vmatprep.subr.bf16.mxu1 %v5470_v15  ;;  %6900 = vst [vmem:[#allocation65_spill] sm:$0xff] %v5479_v20  ;;  %6901 = vst [vmem:[#allocation66_spill] sm:$0xff] %v5482_v21  ;;  %v5485_v22 = vld [vmem:[#allocation9 + $0x1a0] ss:$16 sps:$4 sm:$0xff]   ;;  %v5488_v15 = vld [vmem:[#allocation9 + $0x1a8] ss:$16 sps:$4 sm:$0xff]  }
 0x400   :  { %6902 = vst [vmem:[#allocation67_spill] sm:$0xff] %v5485_v22  ;;  %6903 = vst [vmem:[#allocation68_spill] sm:$0xff] %v5488_v15 }
 0x402   :  { %1842 = vmatpush2.bf16.msra.mxu0 %v5473_v16  ;;  %1883 = vmatpush2.bf16.msra.mxu1 %v5476_v18  ;;  %v5491_v16 = vld [vmem:[#allocation9 + $0x184] ss:$16 sps:$4 sm:$0xff]   ;;  %v5494_v18 = vld [vmem:[#allocation9 + $0x18c] ss:$16 sps:$4 sm:$0xff]  }
 0x403   :  { %1843 = vmatprep.subr.bf16.mxu0 %v5479_v20  ;;  %1884 = vmatprep.subr.bf16.mxu1 %v5482_v21  ;;  %6904 = vst [vmem:[#allocation69_spill] sm:$0xff] %v5491_v16  ;;  %6905 = vst [vmem:[#allocation70_spill] sm:$0xff] %v5494_v18  ;;  %v5497_v20 = vld [vmem:[#allocation9 + $0x180] ss:$16 sps:$4 sm:$0xff]   ;;  %v5500_v21 = vld [vmem:[#allocation9 + $0x188] ss:$16 sps:$4 sm:$0xff]  }
 0x404   :  { %6906 = vst [vmem:[#allocation71_spill] sm:$0xff] %v5497_v20  ;;  %6907 = vst [vmem:[#allocation72_spill] sm:$0xff] %v5500_v21 }
 0x406   :  { %1844 = vmatpush2.bf16.msra.mxu0 %v5485_v22  ;;  %1885 = vmatpush2.bf16.msra.mxu1 %v5488_v15  ;;  %v5503_v22 = vld [vmem:[#allocation9 + $0x164] ss:$16 sps:$4 sm:$0xff]   ;;  %v5506_v15 = vld [vmem:[#allocation9 + $0x16c] ss:$16 sps:$4 sm:$0xff]  }
 0x407   :  { %1845 = vmatprep.subr.bf16.mxu0 %v5491_v16  ;;  %1886 = vmatprep.subr.bf16.mxu1 %v5494_v18  ;;  %6908 = vst [vmem:[#allocation73_spill] sm:$0xff] %v5503_v22  ;;  %6909 = vst [vmem:[#allocation74_spill] sm:$0xff] %v5506_v15  ;;  %v5509_v16 = vld [vmem:[#allocation9 + $0x160] ss:$16 sps:$4 sm:$0xff]   ;;  %v5512_v18 = vld [vmem:[#allocation9 + $0x168] ss:$16 sps:$4 sm:$0xff]  }
 0x408   :  { %6910 = vst [vmem:[#allocation75_spill] sm:$0xff] %v5509_v16  ;;  %6911 = vst [vmem:[#allocation76_spill] sm:$0xff] %v5512_v18 }
 0x40a   :  { %1846 = vmatpush2.bf16.msra.mxu0 %v5497_v20  ;;  %1887 = vmatpush2.bf16.msra.mxu1 %v5500_v21  ;;  %v5515_v20 = vld [vmem:[#allocation9 + $0x144] ss:$16 sps:$4 sm:$0xff]   ;;  %v5518_v21 = vld [vmem:[#allocation9 + $0x14c] ss:$16 sps:$4 sm:$0xff]  }
 0x40b   :  { %1847 = vmatprep.subr.bf16.mxu0 %v5503_v22  ;;  %1888 = vmatprep.subr.bf16.mxu1 %v5506_v15  ;;  %6912 = vst [vmem:[#allocation77_spill] sm:$0xff] %v5515_v20  ;;  %6913 = vst [vmem:[#allocation78_spill] sm:$0xff] %v5518_v21  ;;  %v5521_v22 = vld [vmem:[#allocation9 + $0x140] ss:$16 sps:$4 sm:$0xff]   ;;  %v5524_v15 = vld [vmem:[#allocation9 + $0x148] ss:$16 sps:$4 sm:$0xff]  }
 0x40c   :  { %6914 = vst [vmem:[#allocation24_spill] sm:$0xff] %v5521_v22  ;;  %6915 = vst [vmem:[#allocation25_spill] sm:$0xff] %v5524_v15 }
 0x40e   :  { %1848 = vmatpush2.bf16.msra.mxu0 %v5509_v16  ;;  %1889 = vmatpush2.bf16.msra.mxu1 %v5512_v18  ;;  %v5527_v16 = vld [vmem:[#allocation9 + $0x124] ss:$16 sps:$4 sm:$0xff]   ;;  %v5530_v18 = vld [vmem:[#allocation9 + $0x12c] ss:$16 sps:$4 sm:$0xff]  }
 0x40f   :  { %1849 = vmatprep.subr.bf16.mxu0 %v5515_v20  ;;  %1890 = vmatprep.subr.bf16.mxu1 %v5518_v21  ;;  %6916 = vst [vmem:[#allocation84_spill] sm:$0xff] %v5527_v16  ;;  %6917 = vst [vmem:[#allocation86_spill] sm:$0xff] %v5530_v18  ;;  %v5533_v20 = vld [vmem:[#allocation9 + $0x120] ss:$16 sps:$4 sm:$0xff]   ;;  %v5536_v21 = vld [vmem:[#allocation9 + $0x128] ss:$16 sps:$4 sm:$0xff]  }
 0x410   :  { %6918 = vst [vmem:[#allocation87_spill] sm:$0xff] %v5533_v20  ;;  %6919 = vst [vmem:[#allocation85_spill] sm:$0xff] %v5536_v21 }
 0x412   :  { %1850 = vmatpush2.bf16.msra.mxu0 %v5521_v22  ;;  %1891 = vmatpush2.bf16.msra.mxu1 %v5524_v15  ;;  %v5539_v22 = vld [vmem:[#allocation9 + $0x104] ss:$16 sps:$4 sm:$0xff]   ;;  %v5542_v15 = vld [vmem:[#allocation9 + $0x10c] ss:$16 sps:$4 sm:$0xff]  }
 0x413   :  { %1851 = vmatprep.subr.bf16.mxu0 %v5527_v16  ;;  %1892 = vmatprep.subr.bf16.mxu1 %v5530_v18  ;;  %6920 = vst [vmem:[#allocation30_spill] sm:$0xff] %v5539_v22  ;;  %6921 = vst [vmem:[#allocation31_spill] sm:$0xff] %v5542_v15  ;;  %v5545_v16 = vld [vmem:[#allocation9 + $0x100] ss:$16 sps:$4 sm:$0xff]   ;;  %v5548_v18 = vld [vmem:[#allocation9 + $0x108] ss:$16 sps:$4 sm:$0xff]  }
 0x414   :  { %6922 = vst [vmem:[#allocation32_spill] sm:$0xff] %v5545_v16  ;;  %6923 = vst [vmem:[#allocation33_spill] sm:$0xff] %v5548_v18 }
 0x416   :  { %1852 = vmatpush2.bf16.msra.mxu0 %v5533_v20  ;;  %1893 = vmatpush2.bf16.msra.mxu1 %v5536_v21 }
 0x417   :  { %1853 = vmatprep.subr.bf16.mxu0 %v5539_v22  ;;  %1894 = vmatprep.subr.bf16.mxu1 %v5542_v15 }
 0x41a   :  { %1854 = vmatpush2.bf16.msra.mxu0 %v5545_v16  ;;  %1895 = vmatpush2.bf16.msra.mxu1 %v5548_v18 }
 0x41b   :  { %1933 = vmatprep.subr.bf16.mxu0 %v6850_v28  ;;  %1974 = vmatprep.subr.bf16.mxu1 %v6851_v30 }
 0x47d   :  { %v1635_v21 = vpop.f32.mrf.mxu0  ;;  %v1676_v20 = vpop.f32.mrf.mxu1 }
 0x47e   :  { %v1636_v22 = vadd.f32 %v1635_v21, %v6852_v33  ;;  %v1677_v49 = vadd.f32 %v1676_v20, %v6855_v48 }
 0x47f   :  { %v1637_v12 = vpop.f32.mrf.mxu0  ;;  %v1678_v14 = vpop.f32.mrf.mxu1 }
 0x480   :  { %v3419_v13 = vmul.f32 -1.442695, %v1636_v22  ;;  %v1638_v15 = vadd.f32 %v1637_v12, %v6853_v39  ;;  %v1679_v28 = vadd.f32 %v1678_v14, %v6854_v62  ;;  %v6924_v12 = vld [vmem:[#allocation88_spill] sm:$0xff]  ;;  %v6925_v62 = vld [vmem:[#allocation90_spill] sm:$0xff] }
 0x481   :  { %v1639_v53 = vpop.f32.mrf.mxu0  ;;  %v1680_v52 = vpop.f32.mrf.mxu1 }
 0x482   :  { %3893 = vpow2.f32 %v3419_v13  ;;  %v3420_v16 = vmul.f32 -1.442695, %v1638_v15  ;;  %v3421_v18 = vmul.f32 -1.442695, %v1679_v28 }
 0x483   :  { %v1640_v51 = vpop.f32.mrf.mxu0  ;;  %v1681_v50 = vpop.f32.mrf.mxu1 }
 0x484   :  { %3895 = vpow2.f32 %v3420_v16 }
 0x485   :  { %3897 = vpow2.f32 %v3421_v18 }
 0x48f   :  { %v3894_v30 = vpop.eup %3893 }
 0x490   :  { %v1686_v47 = vadd.f32 1.0, %v3894_v30 }
 0x491   :  { %v3896_v21 = vpop.eup %3895 }
 0x492   :  { %3899 = vrcp.f32 %v1686_v47  ;;  %v1692_v22 = vadd.f32 1.0, %v3896_v21  ;;  %v3898_v13 = vpop.eup %3897 }
 0x493   :  { %3901 = vtanh.f32 %v1677_v49  ;;  %v1699_v30 = vadd.f32 1.0, %v3898_v13 }
 0x494   :  { %3903 = vrcp.f32 %v1692_v22 }
 0x49d   :  { %v1745_v53 = vpop.f32.mrf.mxu0  ;;  %v1786_v52 = vpop.f32.mrf.mxu1 }
 0x49e   :  { %v1793_v51 = vadd.f32 %v1745_v53, %v6924_v12  ;;  %v6926_v12 = vld [vmem:[#allocation91_spill] sm:$0xff] }
 0x49f   :  { %v3900_v50 = vpop.eup %3899  ;;  %v1747_v15 = vpop.f32.mrf.mxu0 }
 0x4a0   :  { %v1788_v16 = vpop.f32.mrf.mxu1  ;;  %v3902_v14 = vpop.eup %3901  ;;  %v3422_v28 = vmul.f32 -1.442695, %v1793_v51  ;;  %v1794_v39 = vadd.f32 %v1747_v15, %v6925_v62  ;;  %v6927_v62 = vld [vmem:[#allocation89_spill] sm:$0xff] }
 0x4a1   :  { %v3904_v20 = vpop.eup %3903  ;;  %v1749_v48 = vpop.f32.mrf.mxu0  ;;  %v1703_v47 = vmul.f32 %v3902_v14, %v3900_v50  ;;  %v1796_v51 = vadd.f32 %v1788_v16, %v6926_v12  ;;  %v1795_v15 = vadd.f32 %v1786_v52, %v6927_v62 }
 0x4a2   :  { %v1790_v18 = vpop.f32.mrf.mxu1  ;;  %v1702_v49 = vmul.f32 %v3904_v20, %v5318_v37  ;;  %3905 = vpow2.f32 %v3422_v28  ;;  %v3423_v21 = vmul.f32 -1.442695, %v1794_v39 }
 0x4a3   :  { %v1750_v22 = vpop.f32.mrf.mxu0  ;;  %v3424_v13 = vmul.f32 -1.442695, %v1796_v51 }
 0x4a4   :  { %v1791_v33 = vpop.f32.mrf.mxu1  ;;  %3907 = vpow2.f32 %v3423_v21  ;;  %v5560_v53 = vadd.f32 %v1703_v47, %v1702_v49 }
 0x4a5   :  { %3909 = vrcp.f32 %v1699_v30 }
 0x4a6   :  { %3911 = vtanh.f32 %v5560_v53 }
 0x4a7   :  { %3913 = vtanh.f32 %v1795_v15 }
 0x4a8   :  { %3915 = vpow2.f32 %v3424_v13  ;;  %v6959_v13 = vld [vmem:[#allocation66_spill] sm:$0xff] }
 0x4af   :  { %v3906_v48 = vpop.eup %3905 }
 0x4b0   :  { %v1800_v18 = vadd.f32 1.0, %v3906_v48  ;;  %v6960_v48 = vld [vmem:[#allocation67_spill] sm:$0xff] }
 0x4b1   :  { %v3908_v50 = vpop.eup %3907 }
 0x4b2   :  { %v3910_v37 = vpop.eup %3909  ;;  %3917 = vrcp.f32 %v1800_v18  ;;  %v1806_v39 = vadd.f32 1.0, %v3908_v50  ;;  %v6961_v18 = vld [vmem:[#allocation68_spill] sm:$0xff]  ;;  %v6962_v50 = vld [vmem:[#allocation69_spill] sm:$0xff] }
 0x4b3   :  { %v3912_v33 = vpop.eup %3911 }
 0x4b4   :  { %3919 = vrcp.f32 %v1806_v39  ;;  %v1706_v14 = vmul.f32 %v3912_v33, %v3910_v37  ;;  %v3914_v20 = vpop.eup %3913  ;;  %v6963_v37 = vld [vmem:[#allocation70_spill] sm:$0xff]  ;;  %v6964_v39 = vld [vmem:[#allocation71_spill] sm:$0xff]  ;;  %v6965_v33 = vld [vmem:[#allocation72_spill] sm:$0xff] }
 0x4b5   :  { %v3916_v30 = vpop.eup %3915 }
 0x4b6   :  { %v1822_v28 = vpack.c.bf16 %v1706_v14, %v1706_v14  ;;  %v1813_v49 = vadd.f32 1.0, %v3916_v30  ;;  %v6966_v14 = vld [vmem:[#allocation73_spill] sm:$0xff]  ;;  %v6969_v30 = vld [vmem:[#allocation76_spill] sm:$0xff] }
 0x4b8   :  { %1855 = vmatprep.mubr.bf16.mxu0 %v1822_v28  ;;  %1896 = vmatprep.mubr.bf16.mxu1 %v1822_v28  ;;  %3921 = vrcp.f32 %v1813_v49  ;;  %v6967_v28 = vld [vmem:[#allocation74_spill] sm:$0xff]  ;;  %v6973_v49 = vld [vmem:[#allocation25_spill] sm:$0xff] }
 0x4bf   :  { %v3918_v16 = vpop.eup %3917 }
 0x4c0   :  { %v1817_v47 = vmul.f32 %v3918_v16, %v3914_v20  ;;  %v6968_v20 = vld [vmem:[#allocation75_spill] sm:$0xff]  ;;  %v6970_v16 = vld [vmem:[#allocation77_spill] sm:$0xff] }
 0x4c1   :  { %v3920_v52 = vpop.eup %3919 }
 0x4c2   :  { %v1816_v21 = vmul.f32 %v3920_v52, %v5324_v17  ;;  %v6948_v17 = vld [vmem:[#allocation55_spill] sm:$0xff]  ;;  %v6972_v52 = vld [vmem:[#allocation24_spill] sm:$0xff] }
 0x4c4   :  { %v5566_v22 = vadd.f32 %v1817_v47, %v1816_v21  ;;  %v6971_v47 = vld [vmem:[#allocation78_spill] sm:$0xff]  ;;  %v6974_v21 = vld [vmem:[#allocation84_spill] sm:$0xff] }
 0x4c5   :  { %v3922_v12 = vpop.eup %3921 }
 0x4c6   :  { %3923 = vtanh.f32 %v5566_v22 }
 0x4d3   :  { %v3924_v51 = vpop.eup %3923 }
 0x4d4   :  { %v1820_v62 = vmul.f32 %v3924_v51, %v3922_v12  ;;  %v6975_v12 = vld [vmem:[#allocation86_spill] sm:$0xff]  ;;  %v6976_v51 = vld [vmem:[#allocation87_spill] sm:$0xff] }
 0x4d6   :  { %v1821_v15 = vpack.c.bf16 %v1820_v62, %v1820_v62  ;;  %v6977_v62 = vld [vmem:[#allocation85_spill] sm:$0xff] }
 0x4d8   :  { %1856 = vmatmul.mubr.bf16.vlgmr.msra.gmra.mxu0 %v1821_v15  ;;  %1897 = vmatmul.mubr.bf16.vlgmr.msra.gmra.mxu1 %v1821_v15 }
 0x4d9   :  { %1934 = vmatpush1.bf16.msra.mxu0 %v5151_v29  ;;  %1975 = vmatpush1.bf16.msra.mxu1 %v5154_v7  ;;  %v6928_v29 = vld [vmem:[#allocation40_spill] sm:$0xff]  ;;  %v6929_v7 = vld [vmem:[#allocation41_spill] sm:$0xff] }
 0x4da   :  { %1935 = vmatprep.subr.bf16.mxu0 %v5157_v60  ;;  %1976 = vmatprep.subr.bf16.mxu1 %v5160_v58  ;;  %v6930_v60 = vld [vmem:[#allocation42_spill] sm:$0xff]  ;;  %v6931_v58 = vld [vmem:[#allocation43_spill] sm:$0xff] }
 0x4db   :  { %1965 = vmatprep.mubr.bf16.mxu0 %v6745_v19  ;;  %2006 = vmatprep.mubr.bf16.mxu1 %v6745_v19 }
 0x4dd   :  { %1936 = vmatpush1.bf16.msra.mxu0 %v5165_v9  ;;  %1977 = vmatpush1.bf16.msra.mxu1 %v5168_v57  ;;  %v6932_v9 = vld [vmem:[#allocation44_spill] sm:$0xff]  ;;  %v6933_v57 = vld [vmem:[#allocation45_spill] sm:$0xff] }
 0x4de   :  { %1937 = vmatprep.subr.bf16.mxu0 %v5171_v1  ;;  %1978 = vmatprep.subr.bf16.mxu1 %v5174_v4  ;;  %v6934_v1 = vld [vmem:[#allocation46_spill] sm:$0xff]  ;;  %v6935_v4 = vld [vmem:[#allocation47_spill] sm:$0xff] }
 0x4e1   :  { %1938 = vmatpush1.bf16.msra.mxu0 %v5177_v55  ;;  %1979 = vmatpush1.bf16.msra.mxu1 %v5180_v63  ;;  %v6936_v55 = vld [vmem:[#allocation48_spill] sm:$0xff]  ;;  %v6937_v63 = vld [vmem:[#allocation49_spill] sm:$0xff] }
 0x4e2   :  { %1939 = vmatprep.subr.bf16.mxu0 %v5183_v2  ;;  %1980 = vmatprep.subr.bf16.mxu1 %v5186_v10  ;;  %v6938_v2 = vld [vmem:[#allocation50_spill] sm:$0xff]  ;;  %v6939_v10 = vld [vmem:[#allocation51_spill] sm:$0xff] }
 0x4e5   :  { %1940 = vmatpush1.bf16.msra.mxu0 %v5189_v5  ;;  %1981 = vmatpush1.bf16.msra.mxu1 %v5192_v8  ;;  %v6940_v5 = vld [vmem:[#allocation52_spill] sm:$0xff]  ;;  %v6941_v8 = vld [vmem:[#allocation53_spill] sm:$0xff] }
 0x4e6   :  { %1941 = vmatprep.subr.bf16.mxu0 %v6860_v11  ;;  %1982 = vmatprep.subr.bf16.mxu1 %v6861_v23  ;;  %v6949_v11 = vld [vmem:[#allocation56_spill] sm:$0xff]  ;;  %v6950_v23 = vld [vmem:[#allocation57_spill] sm:$0xff] }
 0x4e9   :  { %1942 = vmatpush1.bf16.msra.mxu0 %v6862_v24  ;;  %1983 = vmatpush1.bf16.msra.mxu1 %v6863_v25  ;;  %v6951_v24 = vld [vmem:[#allocation58_spill] sm:$0xff]  ;;  %v6952_v25 = vld [vmem:[#allocation59_spill] sm:$0xff] }
 0x4ea   :  { %1943 = vmatprep.subr.bf16.mxu0 %v6864_v26  ;;  %1984 = vmatprep.subr.bf16.mxu1 %v6865_v27  ;;  %v6953_v26 = vld [vmem:[#allocation60_spill] sm:$0xff]  ;;  %v6954_v27 = vld [vmem:[#allocation61_spill] sm:$0xff] }
 0x4ed   :  { %1944 = vmatpush1.bf16.msra.mxu0 %v6866_v31  ;;  %1985 = vmatpush1.bf16.msra.mxu1 %v6867_v32  ;;  %v6955_v31 = vld [vmem:[#allocation62_spill] sm:$0xff]  ;;  %v6956_v32 = vld [vmem:[#allocation63_spill] sm:$0xff] }
 0x4ee   :  { %1945 = vmatprep.subr.bf16.mxu0 %v6868_v34  ;;  %1986 = vmatprep.subr.bf16.mxu1 %v6869_v35  ;;  %v6957_v34 = vld [vmem:[#allocation64_spill] sm:$0xff]  ;;  %v6958_v35 = vld [vmem:[#allocation65_spill] sm:$0xff] }
 0x4f1   :  { %1946 = vmatpush1.bf16.msra.mxu0 %v5225_v38  ;;  %1987 = vmatpush1.bf16.msra.mxu1 %v5228_v54  ;;  %v6946_v38 = vld [vmem:[#allocation83_spill] sm:$0xff]  ;;  %v6947_v54 = vld [vmem:[#allocation81_spill] sm:$0xff] }
 0x4f2   :  { %1947 = vmatprep.subr.bf16.mxu0 %v5231_v59  ;;  %1988 = vmatprep.subr.bf16.mxu1 %v5234_v56  ;;  %v6942_v59 = vld [vmem:[#allocation54_spill] sm:$0xff]  ;;  %v6943_v56 = vld [vmem:[#allocation79_spill] sm:$0xff] }
 0x4f5   :  { %1948 = vmatpush1.bf16.msra.mxu0 %v5237_v0  ;;  %1989 = vmatpush1.bf16.msra.mxu1 %v5240_v61  ;;  %v6944_v0 = vld [vmem:[#allocation80_spill] sm:$0xff]  ;;  %v6945_v61 = vld [vmem:[#allocation82_spill] sm:$0xff] }
 0x4f6   :  { %2045 = vmatprep.subr.bf16.mxu0 %v5359_v36  ;;  %2086 = vmatprep.subr.bf16.mxu1 %v5362_v40 }
 0x4f8   :  { %1966 = vmatmul.mubr.bf16.vlgmr.msra.gmra.mxu0 %v1821_v15  ;;  %2007 = vmatmul.mubr.bf16.vlgmr.msra.gmra.mxu1 %v1821_v15  ;;  %v6978_v15 = vld [vmem:[#allocation30_spill] sm:$0xff] }
 0x4f9   :  { %2046 = vmatpush1.bf16.msra.mxu0 %v5365_v41  ;;  %2087 = vmatpush1.bf16.msra.mxu1 %v5368_v42 }
 0x4fa   :  { %2047 = vmatprep.subr.bf16.mxu0 %v5371_v43  ;;  %2088 = vmatprep.subr.bf16.mxu1 %v5374_v44 }
 0x4fd   :  { %2048 = vmatpush1.bf16.msra.mxu0 %v5377_v6  ;;  %2089 = vmatpush1.bf16.msra.mxu1 %v5380_v45 }
 0x4fe   :  { %2049 = vmatprep.subr.bf16.mxu0 %v5383_v46  ;;  %2090 = vmatprep.subr.bf16.mxu1 %v5386_v3 }
 0x501   :  { %2050 = vmatpush1.bf16.msra.mxu0 %v6928_v29  ;;  %2091 = vmatpush1.bf16.msra.mxu1 %v6929_v7 }
 0x502   :  { %2051 = vmatprep.subr.bf16.mxu0 %v6930_v60  ;;  %2092 = vmatprep.subr.bf16.mxu1 %v6931_v58 }
 0x505   :  { %2052 = vmatpush1.bf16.msra.mxu0 %v6932_v9  ;;  %2093 = vmatpush1.bf16.msra.mxu1 %v6933_v57 }
 0x506   :  { %2053 = vmatprep.subr.bf16.mxu0 %v6934_v1  ;;  %2094 = vmatprep.subr.bf16.mxu1 %v6935_v4 }
 0x509   :  { %2054 = vmatpush1.bf16.msra.mxu0 %v6936_v55  ;;  %2095 = vmatpush1.bf16.msra.mxu1 %v6937_v63 }
 0x50a   :  { %2055 = vmatprep.subr.bf16.mxu0 %v6938_v2  ;;  %2096 = vmatprep.subr.bf16.mxu1 %v6939_v10 }
 0x50d   :  { %2056 = vmatpush1.bf16.msra.mxu0 %v6940_v5  ;;  %2097 = vmatpush1.bf16.msra.mxu1 %v6941_v8 }
 0x50e   :  { %2057 = vmatprep.subr.bf16.mxu0 %v6942_v59  ;;  %2098 = vmatprep.subr.bf16.mxu1 %v6943_v56 }
 0x511   :  { %2058 = vmatpush1.bf16.msra.mxu0 %v6944_v0  ;;  %2099 = vmatpush1.bf16.msra.mxu1 %v6945_v61 }
 0x512   :  { %2059 = vmatprep.subr.bf16.mxu0 %v6946_v38  ;;  %2100 = vmatprep.subr.bf16.mxu1 %v6947_v54 }
 0x515   :  { %2060 = vmatpush1.bf16.msra.mxu0 %v6948_v17  ;;  %2101 = vmatpush1.bf16.msra.mxu1 %v6949_v11 }
 0x516   :  { %2061 = vmatprep.subr.bf16.mxu0 %v6950_v23  ;;  %2102 = vmatprep.subr.bf16.mxu1 %v6951_v24 }
 0x519   :  { %2062 = vmatpush2.bf16.msra.mxu0 %v6952_v25  ;;  %2103 = vmatpush2.bf16.msra.mxu1 %v6953_v26 }
 0x51a   :  { %2063 = vmatprep.subr.bf16.mxu0 %v6954_v27  ;;  %2104 = vmatprep.subr.bf16.mxu1 %v6955_v31 }
 0x51d   :  { %2064 = vmatpush2.bf16.msra.mxu0 %v6956_v32  ;;  %2105 = vmatpush2.bf16.msra.mxu1 %v6957_v34 }
 0x51e   :  { %2065 = vmatprep.subr.bf16.mxu0 %v6958_v35  ;;  %2106 = vmatprep.subr.bf16.mxu1 %v6959_v13 }
 0x521   :  { %2066 = vmatpush2.bf16.msra.mxu0 %v6960_v48  ;;  %2107 = vmatpush2.bf16.msra.mxu1 %v6961_v18  ;;  %v6987_v48 = vld [vmem:[#allocation29_spill] sm:$0xff] }
 0x522   :  { %2067 = vmatprep.subr.bf16.mxu0 %v6962_v50  ;;  %2108 = vmatprep.subr.bf16.mxu1 %v6963_v37 }
 0x525   :  { %2068 = vmatpush2.bf16.msra.mxu0 %v6964_v39  ;;  %2109 = vmatpush2.bf16.msra.mxu1 %v6965_v33 }
 0x526   :  { %2069 = vmatprep.subr.bf16.mxu0 %v6966_v14  ;;  %2110 = vmatprep.subr.bf16.mxu1 %v6967_v28 }
 0x529   :  { %2070 = vmatpush2.bf16.msra.mxu0 %v6968_v20  ;;  %2111 = vmatpush2.bf16.msra.mxu1 %v6969_v30  ;;  %v6979_v20 = vld [vmem:[#allocation31_spill] sm:$0xff]  ;;  %v6980_v30 = vld [vmem:[#allocation32_spill] sm:$0xff] }
 0x52a   :  { %2071 = vmatprep.subr.bf16.mxu0 %v6970_v16  ;;  %2112 = vmatprep.subr.bf16.mxu1 %v6971_v47  ;;  %v6981_v16 = vld [vmem:[#allocation33_spill] sm:$0xff]  ;;  %v5665_v47 = vld [vmem:[#allocation6 + $0xe4] ss:$16 sps:$4 sm:$0xff]  }
 0x52b   :  { %6982 = vst [vmem:[#allocation34_spill] sm:$0xff] %v5665_v47 }
 0x52d   :  { %2072 = vmatpush2.bf16.msra.mxu0 %v6972_v52  ;;  %2113 = vmatpush2.bf16.msra.mxu1 %v6973_v49  ;;  %v5668_v49 = vld [vmem:[#allocation6 + $0xec] ss:$16 sps:$4 sm:$0xff]  }
 0x52e   :  { %2073 = vmatprep.subr.bf16.mxu0 %v6974_v21  ;;  %2114 = vmatprep.subr.bf16.mxu1 %v6975_v12  ;;  %6983 = vst [vmem:[#allocation35_spill] sm:$0xff] %v5668_v49  ;;  %v6984_v21 = vld [vmem:[#allocation26_spill] sm:$0xff] }
 0x531   :  { %2074 = vmatpush2.bf16.msra.mxu0 %v6976_v51  ;;  %2115 = vmatpush2.bf16.msra.mxu1 %v6977_v62 }
 0x532   :  { %2075 = vmatprep.subr.bf16.mxu0 %v6978_v15  ;;  %2116 = vmatprep.subr.bf16.mxu1 %v6979_v20  ;;  %v6985_v20 = vld [vmem:[#allocation27_spill] sm:$0xff] }
 0x535   :  { %2076 = vmatpush2.bf16.msra.mxu0 %v6980_v30  ;;  %2117 = vmatpush2.bf16.msra.mxu1 %v6981_v16 }
 0x536   :  { %2155 = vmatprep.subr.bf16.mxu0 %v5665_v47  ;;  %2196 = vmatprep.subr.bf16.mxu1 %v5668_v49  ;;  %v6986_v47 = vld [vmem:[#allocation28_spill] sm:$0xff] }
 0x598   :  { %v1857_v12 = vpop.f32.mrf.mxu0  ;;  %v1898_v51 = vpop.f32.mrf.mxu1 }
 0x599   :  { %v1858_v62 = vadd.f32 %v1857_v12, %v6984_v21  ;;  %v1899_v13 = vadd.f32 %v1898_v51, %v6987_v48 }
 0x59a   :  { %v1859_v52 = vpop.f32.mrf.mxu0  ;;  %v1900_v15 = vpop.f32.mrf.mxu1 }
 0x59b   :  { %v3425_v28 = vmul.f32 -1.442695, %v1858_v62  ;;  %v1860_v14 = vadd.f32 %v1859_v52, %v6985_v20  ;;  %v1901_v50 = vadd.f32 %v1900_v15, %v6986_v47  ;;  %v6989_v47 = vld [vmem:[#allocation94_spill] sm:$0xff] }
 0x59c   :  { %v1861_v30 = vpop.f32.mrf.mxu0  ;;  %v1902_v33 = vpop.f32.mrf.mxu1 }
 0x59d   :  { %3925 = vpow2.f32 %v3425_v28  ;;  %v3426_v16 = vmul.f32 -1.442695, %v1860_v14  ;;  %v3427_v18 = vmul.f32 -1.442695, %v1901_v50  ;;  %v6988_v14 = vld [vmem:[#allocation92_spill] sm:$0xff] }
 0x59e   :  { %v1862_v39 = vpop.f32.mrf.mxu0  ;;  %v1903_v37 = vpop.f32.mrf.mxu1 }
 0x59f   :  { %3927 = vpow2.f32 %v3426_v16 }
 0x5a0   :  { %3929 = vpow2.f32 %v3427_v18 }
 0x5aa   :  { %v3926_v49 = vpop.eup %3925 }
 0x5ab   :  { %v1908_v35 = vadd.f32 1.0, %v3926_v49 }
 0x5ac   :  { %v3928_v12 = vpop.eup %3927 }
 0x5ad   :  { %3931 = vrcp.f32 %v1908_v35  ;;  %v1914_v62 = vadd.f32 1.0, %v3928_v12  ;;  %v3930_v28 = vpop.eup %3929 }
 0x5ae   :  { %3933 = vtanh.f32 %v1899_v13  ;;  %v1921_v49 = vadd.f32 1.0, %v3930_v28 }
 0x5af   :  { %3935 = vrcp.f32 %v1914_v62 }
 0x5b8   :  { %v1967_v30 = vpop.f32.mrf.mxu0  ;;  %v2008_v33 = vpop.f32.mrf.mxu1 }
 0x5b9   :  { %v2015_v39 = vadd.f32 %v1967_v30, %v6988_v14  ;;  %v6990_v14 = vld [vmem:[#allocation95_spill] sm:$0xff] }
 0x5ba   :  { %v3932_v37 = vpop.eup %3931  ;;  %v1969_v16 = vpop.f32.mrf.mxu0 }
 0x5bb   :  { %v2010_v52 = vpop.f32.mrf.mxu1  ;;  %v3934_v15 = vpop.eup %3933  ;;  %v3428_v50 = vmul.f32 -1.442695, %v2015_v39  ;;  %v2016_v20 = vadd.f32 %v1969_v16, %v6989_v47  ;;  %v6991_v47 = vld [vmem:[#allocation93_spill] sm:$0xff] }
 0x5bc   :  { %v3936_v51 = vpop.eup %3935  ;;  %v1971_v48 = vpop.f32.mrf.mxu0  ;;  %v1925_v35 = vmul.f32 %v3934_v15, %v3932_v37  ;;  %v2018_v39 = vadd.f32 %v2010_v52, %v6990_v14  ;;  %v2017_v16 = vadd.f32 %v2008_v33, %v6991_v47 }
 0x5bd   :  { %v2012_v18 = vpop.f32.mrf.mxu1  ;;  %v1924_v13 = vmul.f32 %v3936_v51, %v5560_v53  ;;  %3937 = vpow2.f32 %v3428_v50  ;;  %v3429_v12 = vmul.f32 -1.442695, %v2016_v20 }
 0x5be   :  { %v1972_v62 = vpop.f32.mrf.mxu0  ;;  %v3430_v28 = vmul.f32 -1.442695, %v2018_v39 }
 0x5bf   :  { %v2013_v21 = vpop.f32.mrf.mxu1  ;;  %3939 = vpow2.f32 %v3429_v12  ;;  %v5678_v30 = vadd.f32 %v1925_v35, %v1924_v13 }
 0x5c0   :  { %3941 = vrcp.f32 %v1921_v49 }
 0x5c1   :  { %3943 = vtanh.f32 %v5678_v30 }
 0x5c2   :  { %3945 = vtanh.f32 %v2017_v16 }
 0x5c3   :  { %3947 = vpow2.f32 %v3430_v28  ;;  %v5691_v28 = vld [vmem:[#allocation6 + $0xe0] ss:$16 sps:$4 sm:$0xff]  }
 0x5ca   :  { %v3938_v48 = vpop.eup %3937 }
 0x5cb   :  { %v2022_v18 = vadd.f32 1.0, %v3938_v48  ;;  %v5694_v48 = vld [vmem:[#allocation6 + $0xe8] ss:$16 sps:$4 sm:$0xff]  }
 0x5cc   :  { %v3940_v37 = vpop.eup %3939 }
 0x5cd   :  { %v3942_v53 = vpop.eup %3941  ;;  %3949 = vrcp.f32 %v2022_v18  ;;  %v2028_v20 = vadd.f32 1.0, %v3940_v37  ;;  %v5700_v18 = vld [vmem:[#allocation6 + $0xcc] ss:$16 sps:$4 sm:$0xff]   ;;  %v5705_v37 = vld [vmem:[#allocation6 + $0xc0] ss:$16 sps:$4 sm:$0xff]  }
 0x5ce   :  { %v3944_v21 = vpop.eup %3943 }
 0x5cf   :  { %3951 = vrcp.f32 %v2028_v20  ;;  %v1928_v15 = vmul.f32 %v3944_v21, %v3942_v53  ;;  %v3946_v51 = vpop.eup %3945  ;;  %v5708_v53 = vld [vmem:[#allocation6 + $0xc8] ss:$16 sps:$4 sm:$0xff]   ;;  %v5711_v20 = vld [vmem:[#allocation6 + $0xa4] ss:$16 sps:$4 sm:$0xff]   ;;  %v5714_v21 = vld [vmem:[#allocation6 + $0xac] ss:$16 sps:$4 sm:$0xff]  }
 0x5d0   :  { %v3948_v49 = vpop.eup %3947 }
 0x5d1   :  { %v2044_v50 = vpack.c.bf16 %v1928_v15, %v1928_v15  ;;  %v2035_v13 = vadd.f32 1.0, %v3948_v49  ;;  %v5717_v15 = vld [vmem:[#allocation6 + $0xa0] ss:$16 sps:$4 sm:$0xff]   ;;  %v5726_v49 = vld [vmem:[#allocation6 + $0x8c] ss:$16 sps:$4 sm:$0xff]  }
 0x5d3   :  { %2077 = vmatprep.mubr.bf16.mxu0 %v2044_v50  ;;  %2118 = vmatprep.mubr.bf16.mxu1 %v2044_v50  ;;  %3953 = vrcp.f32 %v2035_v13  ;;  %v5720_v50 = vld [vmem:[#allocation6 + $0xa8] ss:$16 sps:$4 sm:$0xff]   ;;  %v5738_v13 = vld [vmem:[#allocation6 + $0x6c] ss:$16 sps:$4 sm:$0xff]  }
 0x5d4   :  { %6993 = vst [vmem:[#allocation37_spill] sm:$0xff] %v5738_v13 }
 0x5da   :  { %v3950_v52 = vpop.eup %3949 }
 0x5db   :  { %v2039_v35 = vmul.f32 %v3950_v52, %v3946_v51  ;;  %v5723_v51 = vld [vmem:[#allocation6 + $0x84] ss:$16 sps:$4 sm:$0xff]   ;;  %v5729_v52 = vld [vmem:[#allocation6 + $0x80] ss:$16 sps:$4 sm:$0xff]  }
 0x5dc   :  { %v3952_v33 = vpop.eup %3951 }
 0x5dd   :  { %v2038_v12 = vmul.f32 %v3952_v33, %v5566_v22  ;;  %v5697_v22 = vld [vmem:[#allocation6 + $0xc4] ss:$16 sps:$4 sm:$0xff]  }
 0x5de   :  { %v5735_v33 = vld [vmem:[#allocation6 + $0x64] ss:$16 sps:$4 sm:$0xff]  }
 0x5df   :  { %v5684_v62 = vadd.f32 %v2039_v35, %v2038_v12  ;;  %v5732_v35 = vld [vmem:[#allocation6 + $0x88] ss:$16 sps:$4 sm:$0xff]   ;;  %6992 = vst [vmem:[#allocation36_spill] sm:$0xff] %v5735_v33  ;;  %v5741_v12 = vld [vmem:[#allocation6 + $0x60] ss:$16 sps:$4 sm:$0xff]  }
 0x5e0   :  { %v3954_v14 = vpop.eup %3953  ;;  %6994 = vst [vmem:[#allocation38_spill] sm:$0xff] %v5741_v12 }
 0x5e1   :  { %3955 = vtanh.f32 %v5684_v62 }
 0x5ee   :  { %v3956_v39 = vpop.eup %3955 }
 0x5ef   :  { %v2042_v47 = vmul.f32 %v3956_v39, %v3954_v14  ;;  %v5744_v14 = vld [vmem:[#allocation6 + $0x68] ss:$16 sps:$4 sm:$0xff]   ;;  %v5747_v39 = vld [vmem:[#allocation6 + $0x44] ss:$16 sps:$4 sm:$0xff]  }
 0x5f0   :  { %6995 = vst [vmem:[#allocation39_spill] sm:$0xff] %v5744_v14  ;;  %6996 = vst [vmem:[#allocation88_spill] sm:$0xff] %v5747_v39 }
 0x5f1   :  { %v5687_v16 = vpack.c.bf16 %v2042_v47, %v2042_v47  ;;  %v5750_v47 = vld [vmem:[#allocation6 + $0x4c] ss:$16 sps:$4 sm:$0xff]  }
 0x5f2   :  { %6997 = vst [vmem:[#allocation90_spill] sm:$0xff] %v5750_v47 }
 0x5f3   :  { %2078 = vmatmul.mubr.bf16.vlgmr.msra.gmra.mxu0 %v5687_v16  ;;  %2119 = vmatmul.mubr.bf16.vlgmr.msra.gmra.mxu1 %v5687_v16 }
 0x5f4   :  { %2156 = vmatpush1.bf16.msra.mxu0 %v5691_v28  ;;  %2197 = vmatpush1.bf16.msra.mxu1 %v5694_v48 }
 0x5f5   :  { %2157 = vmatprep.subr.bf16.mxu0 %v5697_v22  ;;  %2198 = vmatprep.subr.bf16.mxu1 %v5700_v18 }
 0x5f6   :  { %2187 = vmatprep.mubr.bf16.mxu0 %v6745_v19  ;;  %2228 = vmatprep.mubr.bf16.mxu1 %v6745_v19 }
 0x5f8   :  { %2158 = vmatpush1.bf16.msra.mxu0 %v5705_v37  ;;  %2199 = vmatpush1.bf16.msra.mxu1 %v5708_v53 }
 0x5f9   :  { %2159 = vmatprep.subr.bf16.mxu0 %v5711_v20  ;;  %2200 = vmatprep.subr.bf16.mxu1 %v5714_v21 }
 0x5fc   :  { %2160 = vmatpush1.bf16.msra.mxu0 %v5717_v15  ;;  %2201 = vmatpush1.bf16.msra.mxu1 %v5720_v50 }
 0x5fd   :  { %2161 = vmatprep.subr.bf16.mxu0 %v5723_v51  ;;  %2202 = vmatprep.subr.bf16.mxu1 %v5726_v49 }
 0x600   :  { %2162 = vmatpush1.bf16.msra.mxu0 %v5729_v52  ;;  %2203 = vmatpush1.bf16.msra.mxu1 %v5732_v35 }
 0x601   :  { %2163 = vmatprep.subr.bf16.mxu0 %v5735_v33  ;;  %2204 = vmatprep.subr.bf16.mxu1 %v5738_v13  ;;  %v5753_v33 = vld [vmem:[#allocation6 + $0x40] ss:$16 sps:$4 sm:$0xff]   ;;  %v5756_v13 = vld [vmem:[#allocation6 + $0x48] ss:$16 sps:$4 sm:$0xff]  }
 0x602   :  { %6998 = vst [vmem:[#allocation91_spill] sm:$0xff] %v5753_v33  ;;  %6999 = vst [vmem:[#allocation89_spill] sm:$0xff] %v5756_v13 }
 0x604   :  { %2164 = vmatpush1.bf16.msra.mxu0 %v5741_v12  ;;  %2205 = vmatpush1.bf16.msra.mxu1 %v5744_v14  ;;  %v5759_v12 = vld [vmem:[#allocation6 + $0x24] ss:$16 sps:$4 sm:$0xff]   ;;  %v5762_v14 = vld [vmem:[#allocation6 + $0x2c] ss:$16 sps:$4 sm:$0xff]  }
 0x605   :  { %2165 = vmatprep.subr.bf16.mxu0 %v5747_v39  ;;  %2206 = vmatprep.subr.bf16.mxu1 %v5750_v47  ;;  %7000 = vst [vmem:[#allocation40_spill] sm:$0xff] %v5759_v12  ;;  %7001 = vst [vmem:[#allocation41_spill] sm:$0xff] %v5762_v14  ;;  %v5765_v39 = vld [vmem:[#allocation6 + $0x20] ss:$16 sps:$4 sm:$0xff]   ;;  %v5768_v47 = vld [vmem:[#allocation6 + $0x28] ss:$16 sps:$4 sm:$0xff]  }
 0x608   :  { %2166 = vmatpush1.bf16.msra.mxu0 %v5753_v33  ;;  %2207 = vmatpush1.bf16.msra.mxu1 %v5756_v13  ;;  %v5771_v33 = vld [vmem:[#allocation6 + $0x4] ss:$16 sps:$4 sm:$0xff]   ;;  %v5774_v13 = vld [vmem:[#allocation6 + $0xc] ss:$16 sps:$4 sm:$0xff]  }
 0x609   :  { %2167 = vmatprep.subr.bf16.mxu0 %v5759_v12  ;;  %2208 = vmatprep.subr.bf16.mxu1 %v5762_v14  ;;  %v5777_v12 = vld [vmem:[#allocation6] ss:$16 sps:$4 sm:$0xff]   ;;  %v5780_v14 = vld [vmem:[#allocation6 + $0x8] ss:$16 sps:$4 sm:$0xff]  }
 0x60c   :  { %2168 = vmatpush1.bf16.msra.mxu0 %v5765_v39  ;;  %2209 = vmatpush1.bf16.msra.mxu1 %v5768_v47 }
 0x60d   :  { %2169 = vmatprep.subr.bf16.mxu0 %v5771_v33  ;;  %2210 = vmatprep.subr.bf16.mxu1 %v5774_v13 }
 0x610   :  { %2170 = vmatpush1.bf16.msra.mxu0 %v5777_v12  ;;  %2211 = vmatpush1.bf16.msra.mxu1 %v5780_v14 }
 0x611   :  { %2267 = vmatprep.subr.bf16.mxu0 %v5359_v36  ;;  %2308 = vmatprep.subr.bf16.mxu1 %v5362_v40  ;;  %v7002_v36 = vld [vmem:[#allocation65_spill] sm:$0xff]  ;;  %v7003_v40 = vld [vmem:[#allocation66_spill] sm:$0xff] }
 0x613   :  { %2188 = vmatmul.mubr.bf16.vlgmr.msra.gmra.mxu0 %v5687_v16  ;;  %2229 = vmatmul.mubr.bf16.vlgmr.msra.gmra.mxu1 %v5687_v16  ;;  %v7030_v16 = vld [vmem:[#allocation28_spill] sm:$0xff] }
 0x614   :  { %2268 = vmatpush1.bf16.msra.mxu0 %v5365_v41  ;;  %2309 = vmatpush1.bf16.msra.mxu1 %v5368_v42  ;;  %v7004_v41 = vld [vmem:[#allocation67_spill] sm:$0xff]  ;;  %v7005_v42 = vld [vmem:[#allocation68_spill] sm:$0xff] }
 0x615   :  { %2269 = vmatprep.subr.bf16.mxu0 %v5371_v43  ;;  %2310 = vmatprep.subr.bf16.mxu1 %v5374_v44  ;;  %v7006_v43 = vld [vmem:[#allocation69_spill] sm:$0xff]  ;;  %v7007_v44 = vld [vmem:[#allocation70_spill] sm:$0xff] }
 0x618   :  { %2270 = vmatpush1.bf16.msra.mxu0 %v5377_v6  ;;  %2311 = vmatpush1.bf16.msra.mxu1 %v5380_v45  ;;  %v7008_v6 = vld [vmem:[#allocation71_spill] sm:$0xff]  ;;  %v7009_v45 = vld [vmem:[#allocation72_spill] sm:$0xff] }
 0x619   :  { %2271 = vmatprep.subr.bf16.mxu0 %v5383_v46  ;;  %2312 = vmatprep.subr.bf16.mxu1 %v5386_v3  ;;  %v7010_v46 = vld [vmem:[#allocation73_spill] sm:$0xff]  ;;  %v7011_v3 = vld [vmem:[#allocation74_spill] sm:$0xff] }
 0x61c   :  { %2272 = vmatpush1.bf16.msra.mxu0 %v6928_v29  ;;  %2313 = vmatpush1.bf16.msra.mxu1 %v6929_v7  ;;  %v7012_v29 = vld [vmem:[#allocation75_spill] sm:$0xff]  ;;  %v7013_v7 = vld [vmem:[#allocation76_spill] sm:$0xff] }
 0x61d   :  { %2273 = vmatprep.subr.bf16.mxu0 %v6930_v60  ;;  %2314 = vmatprep.subr.bf16.mxu1 %v6931_v58  ;;  %v7014_v60 = vld [vmem:[#allocation77_spill] sm:$0xff]  ;;  %v7015_v58 = vld [vmem:[#allocation78_spill] sm:$0xff] }
 0x620   :  { %2274 = vmatpush1.bf16.msra.mxu0 %v6932_v9  ;;  %2315 = vmatpush1.bf16.msra.mxu1 %v6933_v57  ;;  %v7016_v9 = vld [vmem:[#allocation24_spill] sm:$0xff]  ;;  %v7017_v57 = vld [vmem:[#allocation25_spill] sm:$0xff] }
 0x621   :  { %2275 = vmatprep.subr.bf16.mxu0 %v6934_v1  ;;  %2316 = vmatprep.subr.bf16.mxu1 %v6935_v4  ;;  %v7018_v1 = vld [vmem:[#allocation84_spill] sm:$0xff]  ;;  %v7019_v4 = vld [vmem:[#allocation86_spill] sm:$0xff] }
 0x624   :  { %2276 = vmatpush1.bf16.msra.mxu0 %v6936_v55  ;;  %2317 = vmatpush1.bf16.msra.mxu1 %v6937_v63  ;;  %v7020_v55 = vld [vmem:[#allocation87_spill] sm:$0xff]  ;;  %v7021_v63 = vld [vmem:[#allocation85_spill] sm:$0xff] }
 0x625   :  { %2277 = vmatprep.subr.bf16.mxu0 %v6938_v2  ;;  %2318 = vmatprep.subr.bf16.mxu1 %v6939_v10  ;;  %v7022_v2 = vld [vmem:[#allocation30_spill] sm:$0xff]  ;;  %v7023_v10 = vld [vmem:[#allocation31_spill] sm:$0xff] }
 0x628   :  { %2278 = vmatpush1.bf16.msra.mxu0 %v6940_v5  ;;  %2319 = vmatpush1.bf16.msra.mxu1 %v6941_v8  ;;  %v7024_v5 = vld [vmem:[#allocation32_spill] sm:$0xff]  ;;  %v7025_v8 = vld [vmem:[#allocation33_spill] sm:$0xff] }
 0x629   :  { %2279 = vmatprep.subr.bf16.mxu0 %v6942_v59  ;;  %2320 = vmatprep.subr.bf16.mxu1 %v6943_v56  ;;  %v7026_v59 = vld [vmem:[#allocation34_spill] sm:$0xff]  ;;  %v7027_v56 = vld [vmem:[#allocation35_spill] sm:$0xff] }
 0x62c   :  { %2280 = vmatpush1.bf16.msra.mxu0 %v6944_v0  ;;  %2321 = vmatpush1.bf16.msra.mxu1 %v6945_v61 }
 0x62d   :  { %2281 = vmatprep.subr.bf16.mxu0 %v6946_v38  ;;  %2322 = vmatprep.subr.bf16.mxu1 %v6947_v54  ;;  %v7028_v38 = vld [vmem:[#allocation26_spill] sm:$0xff] }
 0x630   :  { %2282 = vmatpush1.bf16.msra.mxu0 %v6948_v17  ;;  %2323 = vmatpush1.bf16.msra.mxu1 %v6949_v11 }
 0x631   :  { %2283 = vmatprep.subr.bf16.mxu0 %v6950_v23  ;;  %2324 = vmatprep.subr.bf16.mxu1 %v6951_v24  ;;  %v7029_v24 = vld [vmem:[#allocation27_spill] sm:$0xff] }
 0x634   :  { %2284 = vmatpush2.bf16.msra.mxu0 %v6952_v25  ;;  %2325 = vmatpush2.bf16.msra.mxu1 %v6953_v26 }
 0x635   :  { %2285 = vmatprep.subr.bf16.mxu0 %v6954_v27  ;;  %2326 = vmatprep.subr.bf16.mxu1 %v6955_v31 }
 0x638   :  { %2286 = vmatpush2.bf16.msra.mxu0 %v6956_v32  ;;  %2327 = vmatpush2.bf16.msra.mxu1 %v6957_v34 }
 0x639   :  { %2287 = vmatprep.subr.bf16.mxu0 %v7002_v36  ;;  %2328 = vmatprep.subr.bf16.mxu1 %v7003_v40 }
 0x63c   :  { %2288 = vmatpush2.bf16.msra.mxu0 %v7004_v41  ;;  %2329 = vmatpush2.bf16.msra.mxu1 %v7005_v42  ;;  %v7031_v42 = vld [vmem:[#allocation29_spill] sm:$0xff] }
 0x63d   :  { %2289 = vmatprep.subr.bf16.mxu0 %v7006_v43  ;;  %2330 = vmatprep.subr.bf16.mxu1 %v7007_v44 }
 0x640   :  { %2290 = vmatpush2.bf16.msra.mxu0 %v7008_v6  ;;  %2331 = vmatpush2.bf16.msra.mxu1 %v7009_v45 }
 0x641   :  { %2291 = vmatprep.subr.bf16.mxu0 %v7010_v46  ;;  %2332 = vmatprep.subr.bf16.mxu1 %v7011_v3 }
 0x644   :  { %2292 = vmatpush2.bf16.msra.mxu0 %v7012_v29  ;;  %2333 = vmatpush2.bf16.msra.mxu1 %v7013_v7  ;;  %v7032_v7 = vld [vmem:[#allocation96_spill] sm:$0xff] }
 0x645   :  { %2293 = vmatprep.subr.bf16.mxu0 %v7014_v60  ;;  %2334 = vmatprep.subr.bf16.mxu1 %v7015_v58 }
 0x648   :  { %2294 = vmatpush2.bf16.msra.mxu0 %v7016_v9  ;;  %2335 = vmatpush2.bf16.msra.mxu1 %v7017_v57 }
 0x649   :  { %2295 = vmatprep.subr.bf16.mxu0 %v7018_v1  ;;  %2336 = vmatprep.subr.bf16.mxu1 %v7019_v4 }
 0x64c   :  { %2296 = vmatpush2.bf16.msra.mxu0 %v7020_v55  ;;  %2337 = vmatpush2.bf16.msra.mxu1 %v7021_v63  ;;  %v7033_v55 = vld [vmem:[#allocation98_spill] sm:$0xff] }
 0x64d   :  { %2297 = vmatprep.subr.bf16.mxu0 %v7022_v2  ;;  %2338 = vmatprep.subr.bf16.mxu1 %v7023_v10 }
 0x650   :  { %2298 = vmatpush2.bf16.msra.mxu0 %v7024_v5  ;;  %2339 = vmatpush2.bf16.msra.mxu1 %v7025_v8 }
 0x651   :  { %2377 = vmatprep.subr.bf16.mxu0 %v7026_v59  ;;  %2418 = vmatprep.subr.bf16.mxu1 %v7027_v56 }
 0x6b3   :  { %v2079_v0 = vpop.f32.mrf.mxu0  ;;  %v2120_v61 = vpop.f32.mrf.mxu1 }
 0x6b4   :  { %v2080_v54 = vadd.f32 %v2079_v0, %v7028_v38  ;;  %v2121_v43 = vadd.f32 %v2120_v61, %v7031_v42 }
 0x6b5   :  { %v2081_v17 = vpop.f32.mrf.mxu0  ;;  %v2122_v11 = vpop.f32.mrf.mxu1 }
 0x6b6   :  { %v3431_v23 = vmul.f32 -1.442695, %v2080_v54  ;;  %v2082_v25 = vadd.f32 %v2081_v17, %v7029_v24  ;;  %v2123_v36 = vadd.f32 %v2122_v11, %v7030_v16 }
 0x6b7   :  { %v2083_v26 = vpop.f32.mrf.mxu0  ;;  %v2124_v27 = vpop.f32.mrf.mxu1 }
 0x6b8   :  { %3957 = vpow2.f32 %v3431_v23  ;;  %v3432_v31 = vmul.f32 -1.442695, %v2082_v25  ;;  %v3433_v40 = vmul.f32 -1.442695, %v2123_v36  ;;  %v7034_v25 = vld [vmem:[#allocation99_spill] sm:$0xff]  ;;  %v7035_v27 = vld [vmem:[#allocation97_spill] sm:$0xff] }
 0x6b9   :  { %v2084_v32 = vpop.f32.mrf.mxu0  ;;  %v2125_v34 = vpop.f32.mrf.mxu1 }
 0x6ba   :  { %3959 = vpow2.f32 %v3432_v31 }
 0x6bb   :  { %3961 = vpow2.f32 %v3433_v40 }
 0x6c5   :  { %v3958_v41 = vpop.eup %3957 }
 0x6c6   :  { %v2130_v44 = vadd.f32 1.0, %v3958_v41 }
 0x6c7   :  { %v3960_v6 = vpop.eup %3959 }
 0x6c8   :  { %3963 = vrcp.f32 %v2130_v44  ;;  %v2136_v45 = vadd.f32 1.0, %v3960_v6  ;;  %v3962_v29 = vpop.eup %3961 }
 0x6c9   :  { %3965 = vtanh.f32 %v2121_v43  ;;  %v2143_v10 = vadd.f32 1.0, %v3962_v29 }
 0x6ca   :  { %3967 = vrcp.f32 %v2136_v45 }
 0x6d3   :  { %v2189_v46 = vpop.f32.mrf.mxu0  ;;  %v2230_v3 = vpop.f32.mrf.mxu1 }
 0x6d4   :  { %v2237_v60 = vadd.f32 %v2189_v46, %v7032_v7  ;;  %v2239_v31 = vadd.f32 %v2230_v3, %v7035_v27  ;;  %v5908_v27 = vld [vmem:[#allocation9 + $0xe8] ss:$16 sps:$4 sm:$0xff]  }
 0x6d5   :  { %v3964_v58 = vpop.eup %3963  ;;  %v2191_v9 = vpop.f32.mrf.mxu0 }
 0x6d6   :  { %v2232_v57 = vpop.f32.mrf.mxu1  ;;  %v3966_v1 = vpop.eup %3965  ;;  %v3434_v4 = vmul.f32 -1.442695, %v2237_v60  ;;  %v2238_v63 = vadd.f32 %v2191_v9, %v7033_v55 }
 0x6d7   :  { %v3968_v2 = vpop.eup %3967  ;;  %v2193_v5 = vpop.f32.mrf.mxu0  ;;  %v2147_v0 = vmul.f32 %v3966_v1, %v3964_v58  ;;  %v2240_v26 = vadd.f32 %v2232_v57, %v7034_v25  ;;  %v5902_v25 = vld [vmem:[#allocation9 + $0xec] ss:$16 sps:$4 sm:$0xff]  }
 0x6d8   :  { %v2234_v8 = vpop.f32.mrf.mxu1  ;;  %v2146_v61 = vmul.f32 %v3968_v2, %v5678_v30  ;;  %3969 = vpow2.f32 %v3434_v4  ;;  %v3435_v54 = vmul.f32 -1.442695, %v2238_v63  ;;  %v7037_v63 = vld [vmem:[#allocation37_spill] sm:$0xff]  ;;  %v7038_v2 = vld [vmem:[#allocation38_spill] sm:$0xff]  ;;  %v7040_v5 = vld [vmem:[#allocation88_spill] sm:$0xff] }
 0x6d9   :  { %v2194_v17 = vpop.f32.mrf.mxu0  ;;  %v3436_v32 = vmul.f32 -1.442695, %v2240_v26  ;;  %v7041_v8 = vld [vmem:[#allocation90_spill] sm:$0xff] }
 0x6da   :  { %v2235_v11 = vpop.f32.mrf.mxu1  ;;  %3971 = vpow2.f32 %v3435_v54  ;;  %v5858_v23 = vadd.f32 %v2147_v0, %v2146_v61  ;;  %v7042_v0 = vld [vmem:[#allocation91_spill] sm:$0xff]  ;;  %v7043_v61 = vld [vmem:[#allocation89_spill] sm:$0xff]  ;;  %v7044_v54 = vld [vmem:[#allocation40_spill] sm:$0xff] }
 0x6db   :  { %3973 = vrcp.f32 %v2143_v10  ;;  %v7039_v10 = vld [vmem:[#allocation39_spill] sm:$0xff]  ;;  %v7045_v17 = vld [vmem:[#allocation41_spill] sm:$0xff]  ;;  %v5905_v26 = vld [vmem:[#allocation9 + $0xe0] ss:$16 sps:$4 sm:$0xff]  }
 0x6dc   :  { %3975 = vtanh.f32 %v5858_v23  ;;  %v5899_v11 = vld [vmem:[#allocation9 + $0xe4] ss:$16 sps:$4 sm:$0xff]  }
 0x6dd   :  { %3977 = vtanh.f32 %v2239_v31  ;;  %v5911_v31 = vld [vmem:[#allocation9 + $0xc4] ss:$16 sps:$4 sm:$0xff]  }
 0x6de   :  { %3979 = vpow2.f32 %v3436_v32  ;;  %v5914_v32 = vld [vmem:[#allocation9 + $0xcc] ss:$16 sps:$4 sm:$0xff]  }
 0x6e5   :  { %v3970_v34 = vpop.eup %3969 }
 0x6e6   :  { %v2244_v36 = vadd.f32 1.0, %v3970_v34  ;;  %v5917_v34 = vld [vmem:[#allocation9 + $0xc0] ss:$16 sps:$4 sm:$0xff]  }
 0x6e7   :  { %v3972_v40 = vpop.eup %3971 }
 0x6e8   :  { %v3974_v30 = vpop.eup %3973  ;;  %3981 = vrcp.f32 %v2244_v36  ;;  %v2250_v41 = vadd.f32 1.0, %v3972_v40  ;;  %v5920_v36 = vld [vmem:[#allocation9 + $0xc8] ss:$16 sps:$4 sm:$0xff]   ;;  %v5923_v40 = vld [vmem:[#allocation9 + $0xa4] ss:$16 sps:$4 sm:$0xff]  }
 0x6e9   :  { %v3976_v43 = vpop.eup %3975 }
 0x6ea   :  { %3983 = vrcp.f32 %v2250_v41  ;;  %v2150_v44 = vmul.f32 %v3976_v43, %v3974_v30  ;;  %v3978_v45 = vpop.eup %3977  ;;  %v5926_v30 = vld [vmem:[#allocation9 + $0xac] ss:$16 sps:$4 sm:$0xff]   ;;  %v5929_v41 = vld [vmem:[#allocation9 + $0xa0] ss:$16 sps:$4 sm:$0xff]   ;;  %v5932_v43 = vld [vmem:[#allocation9 + $0xa8] ss:$16 sps:$4 sm:$0xff]  }
 0x6eb   :  { %v3980_v46 = vpop.eup %3979  ;;  %7046 = vst [vmem:[#allocation42_spill] sm:$0xff] %v5929_v41  ;;  %7047 = vst [vmem:[#allocation43_spill] sm:$0xff] %v5932_v43 }
 0x6ec   :  { %v2266_v6 = vpack.c.bf16 %v2150_v44, %v2150_v44  ;;  %v2257_v60 = vadd.f32 1.0, %v3980_v46  ;;  %v5935_v44 = vld [vmem:[#allocation9 + $0x84] ss:$16 sps:$4 sm:$0xff]   ;;  %v5944_v46 = vld [vmem:[#allocation9 + $0x88] ss:$16 sps:$4 sm:$0xff]  }
 0x6ed   :  { %7048 = vst [vmem:[#allocation44_spill] sm:$0xff] %v5935_v44  ;;  %7051 = vst [vmem:[#allocation47_spill] sm:$0xff] %v5944_v46 }
 0x6ee   :  { %2299 = vmatprep.mubr.bf16.mxu0 %v2266_v6  ;;  %2340 = vmatprep.mubr.bf16.mxu1 %v2266_v6  ;;  %3985 = vrcp.f32 %v2257_v60  ;;  %v5938_v6 = vld [vmem:[#allocation9 + $0x8c] ss:$16 sps:$4 sm:$0xff]   ;;  %v5956_v60 = vld [vmem:[#allocation9 + $0x68] ss:$16 sps:$4 sm:$0xff]  }
 0x6ef   :  { %7049 = vst [vmem:[#allocation45_spill] sm:$0xff] %v5938_v6  ;;  %7055 = vst [vmem:[#allocation51_spill] sm:$0xff] %v5956_v60 }
 0x6f5   :  { %v3982_v29 = vpop.eup %3981 }
 0x6f6   :  { %v2261_v7 = vmul.f32 %v3982_v29, %v3978_v45  ;;  %v5941_v45 = vld [vmem:[#allocation9 + $0x80] ss:$16 sps:$4 sm:$0xff]   ;;  %v5947_v29 = vld [vmem:[#allocation9 + $0x64] ss:$16 sps:$4 sm:$0xff]  }
 0x6f7   :  { %v3984_v3 = vpop.eup %3983  ;;  %7050 = vst [vmem:[#allocation46_spill] sm:$0xff] %v5941_v45  ;;  %7052 = vst [vmem:[#allocation48_spill] sm:$0xff] %v5947_v29 }
 0x6f8   :  { %v2260_v58 = vmul.f32 %v3984_v3, %v5684_v62  ;;  %v7036_v62 = vld [vmem:[#allocation36_spill] sm:$0xff] }
 0x6f9   :  { %v5953_v3 = vld [vmem:[#allocation9 + $0x60] ss:$16 sps:$4 sm:$0xff]  }
 0x6fa   :  { %v5864_v9 = vadd.f32 %v2261_v7, %v2260_v58  ;;  %v5950_v7 = vld [vmem:[#allocation9 + $0x6c] ss:$16 sps:$4 sm:$0xff]   ;;  %7054 = vst [vmem:[#allocation50_spill] sm:$0xff] %v5953_v3  ;;  %v5959_v58 = vld [vmem:[#allocation9 + $0x44] ss:$16 sps:$4 sm:$0xff]  }
 0x6fb   :  { %v3986_v57 = vpop.eup %3985  ;;  %7053 = vst [vmem:[#allocation49_spill] sm:$0xff] %v5950_v7  ;;  %7056 = vst [vmem:[#allocation52_spill] sm:$0xff] %v5959_v58 }
 0x6fc   :  { %3987 = vtanh.f32 %v5864_v9 }
 0x709   :  { %v3988_v1 = vpop.eup %3987 }
 0x70a   :  { %v2264_v4 = vmul.f32 %v3988_v1, %v3986_v57  ;;  %v5962_v57 = vld [vmem:[#allocation9 + $0x4c] ss:$16 sps:$4 sm:$0xff]   ;;  %v5965_v1 = vld [vmem:[#allocation9 + $0x40] ss:$16 sps:$4 sm:$0xff]  }
 0x70b   :  { %7057 = vst [vmem:[#allocation53_spill] sm:$0xff] %v5962_v57  ;;  %7058 = vst [vmem:[#allocation54_spill] sm:$0xff] %v5965_v1 }
 0x70c   :  { %v2265_v55 = vpack.c.bf16 %v2264_v4, %v2264_v4  ;;  %v5968_v4 = vld [vmem:[#allocation9 + $0x48] ss:$16 sps:$4 sm:$0xff]  }
 0x70d   :  { %7059 = vst [vmem:[#allocation79_spill] sm:$0xff] %v5968_v4 }
 0x70e   :  { %2300 = vmatmul.mubr.bf16.vlgmr.msra.gmra.mxu0 %v2265_v55  ;;  %2341 = vmatmul.mubr.bf16.vlgmr.msra.gmra.mxu1 %v2265_v55 }
 0x70f   :  { %2378 = vmatpush1.bf16.msra.mxu0 %v5691_v28  ;;  %2419 = vmatpush1.bf16.msra.mxu1 %v5694_v48 }
 0x710   :  { %2379 = vmatprep.subr.bf16.mxu0 %v5697_v22  ;;  %2420 = vmatprep.subr.bf16.mxu1 %v5700_v18 }
 0x711   :  { %2409 = vmatprep.mubr.bf16.mxu0 %v6745_v19  ;;  %2450 = vmatprep.mubr.bf16.mxu1 %v6745_v19 }
 0x713   :  { %2380 = vmatpush1.bf16.msra.mxu0 %v5705_v37  ;;  %2421 = vmatpush1.bf16.msra.mxu1 %v5708_v53 }
 0x714   :  { %2381 = vmatprep.subr.bf16.mxu0 %v5711_v20  ;;  %2422 = vmatprep.subr.bf16.mxu1 %v5714_v21 }
 0x717   :  { %2382 = vmatpush1.bf16.msra.mxu0 %v5717_v15  ;;  %2423 = vmatpush1.bf16.msra.mxu1 %v5720_v50 }
 0x718   :  { %2383 = vmatprep.subr.bf16.mxu0 %v5723_v51  ;;  %2424 = vmatprep.subr.bf16.mxu1 %v5726_v49 }
 0x71b   :  { %2384 = vmatpush1.bf16.msra.mxu0 %v5729_v52  ;;  %2425 = vmatpush1.bf16.msra.mxu1 %v5732_v35 }
 0x71c   :  { %2385 = vmatprep.subr.bf16.mxu0 %v7036_v62  ;;  %2426 = vmatprep.subr.bf16.mxu1 %v7037_v63 }
 0x71f   :  { %2386 = vmatpush1.bf16.msra.mxu0 %v7038_v2  ;;  %2427 = vmatpush1.bf16.msra.mxu1 %v7039_v10 }
 0x720   :  { %2387 = vmatprep.subr.bf16.mxu0 %v7040_v5  ;;  %2428 = vmatprep.subr.bf16.mxu1 %v7041_v8 }
 0x723   :  { %2388 = vmatpush1.bf16.msra.mxu0 %v7042_v0  ;;  %2429 = vmatpush1.bf16.msra.mxu1 %v7043_v61 }
 0x724   :  { %2389 = vmatprep.subr.bf16.mxu0 %v7044_v54  ;;  %2430 = vmatprep.subr.bf16.mxu1 %v7045_v17 }
 0x727   :  { %2390 = vmatpush1.bf16.msra.mxu0 %v5765_v39  ;;  %2431 = vmatpush1.bf16.msra.mxu1 %v5768_v47 }
 0x728   :  { %2391 = vmatprep.subr.bf16.mxu0 %v5771_v33  ;;  %2432 = vmatprep.subr.bf16.mxu1 %v5774_v13 }
 0x72b   :  { %2392 = vmatpush1.bf16.msra.mxu0 %v5777_v12  ;;  %2433 = vmatpush1.bf16.msra.mxu1 %v5780_v14 }
 0x72c   :  { %2489 = vmatprep.subr.bf16.mxu0 %v5899_v11  ;;  %2530 = vmatprep.subr.bf16.mxu1 %v5902_v25 }
 0x72e   :  { %2410 = vmatmul.mubr.bf16.vlgmr.msra.gmra.mxu0 %v2265_v55  ;;  %2451 = vmatmul.mubr.bf16.vlgmr.msra.gmra.mxu1 %v2265_v55  ;;  %v5971_v55 = vld [vmem:[#allocation9 + $0x24] ss:$16 sps:$4 sm:$0xff]  }
 0x72f   :  { %2490 = vmatpush1.bf16.msra.mxu0 %v5905_v26  ;;  %2531 = vmatpush1.bf16.msra.mxu1 %v5908_v27  ;;  %7060 = vst [vmem:[#allocation80_spill] sm:$0xff] %v5971_v55 }
 0x730   :  { %2491 = vmatprep.subr.bf16.mxu0 %v5911_v31  ;;  %2532 = vmatprep.subr.bf16.mxu1 %v5914_v32 }
 0x733   :  { %2492 = vmatpush1.bf16.msra.mxu0 %v5917_v34  ;;  %2533 = vmatpush1.bf16.msra.mxu1 %v5920_v36 }
 0x734   :  { %2493 = vmatprep.subr.bf16.mxu0 %v5923_v40  ;;  %2534 = vmatprep.subr.bf16.mxu1 %v5926_v30 }
 0x737   :  { %2494 = vmatpush1.bf16.msra.mxu0 %v5929_v41  ;;  %2535 = vmatpush1.bf16.msra.mxu1 %v5932_v43 }
 0x738   :  { %2495 = vmatprep.subr.bf16.mxu0 %v5935_v44  ;;  %2536 = vmatprep.subr.bf16.mxu1 %v5938_v6 }
 0x73b   :  { %2496 = vmatpush1.bf16.msra.mxu0 %v5941_v45  ;;  %2537 = vmatpush1.bf16.msra.mxu1 %v5944_v46 }
 0x73c   :  { %2497 = vmatprep.subr.bf16.mxu0 %v5947_v29  ;;  %2538 = vmatprep.subr.bf16.mxu1 %v5950_v7 }
 0x73f   :  { %2498 = vmatpush1.bf16.msra.mxu0 %v5953_v3  ;;  %2539 = vmatpush1.bf16.msra.mxu1 %v5956_v60  ;;  %v5974_v60 = vld [vmem:[#allocation9 + $0x2c] ss:$16 sps:$4 sm:$0xff]  }
 0x740   :  { %2499 = vmatprep.subr.bf16.mxu0 %v5959_v58  ;;  %2540 = vmatprep.subr.bf16.mxu1 %v5962_v57  ;;  %7061 = vst [vmem:[#allocation82_spill] sm:$0xff] %v5974_v60  ;;  %v5977_v58 = vld [vmem:[#allocation9 + $0x20] ss:$16 sps:$4 sm:$0xff]   ;;  %v5980_v57 = vld [vmem:[#allocation9 + $0x28] ss:$16 sps:$4 sm:$0xff]  }
 0x741   :  { %7062 = vst [vmem:[#allocation83_spill] sm:$0xff] %v5977_v58  ;;  %7063 = vst [vmem:[#allocation81_spill] sm:$0xff] %v5980_v57 }
 0x743   :  { %2500 = vmatpush1.bf16.msra.mxu0 %v5965_v1  ;;  %2541 = vmatpush1.bf16.msra.mxu1 %v5968_v4  ;;  %v5983_v1 = vld [vmem:[#allocation9 + $0x4] ss:$16 sps:$4 sm:$0xff]   ;;  %v5986_v4 = vld [vmem:[#allocation9 + $0xc] ss:$16 sps:$4 sm:$0xff]  }
 0x744   :  { %2501 = vmatprep.subr.bf16.mxu0 %v5971_v55  ;;  %2542 = vmatprep.subr.bf16.mxu1 %v5974_v60  ;;  %7064 = vst [vmem:[#allocation55_spill] sm:$0xff] %v5983_v1  ;;  %7065 = vst [vmem:[#allocation56_spill] sm:$0xff] %v5986_v4  ;;  %v5989_v55 = vld [vmem:[#allocation9] ss:$16 sps:$4 sm:$0xff]   ;;  %v5992_v60 = vld [vmem:[#allocation9 + $0x8] ss:$16 sps:$4 sm:$0xff]  }
 0x745   :  { %7066 = vst [vmem:[#allocation57_spill] sm:$0xff] %v5989_v55  ;;  %7067 = vst [vmem:[#allocation58_spill] sm:$0xff] %v5992_v60 }
 0x747   :  { %2502 = vmatpush1.bf16.msra.mxu0 %v5977_v58  ;;  %2543 = vmatpush1.bf16.msra.mxu1 %v5980_v57  ;;  %v5995_v58 = vld [vmem:[#allocation9 + $0x1e4] ss:$16 sps:$4 sm:$0xff]   ;;  %v5998_v57 = vld [vmem:[#allocation9 + $0x1ec] ss:$16 sps:$4 sm:$0xff]  }
 0x748   :  { %2503 = vmatprep.subr.bf16.mxu0 %v5983_v1  ;;  %2544 = vmatprep.subr.bf16.mxu1 %v5986_v4  ;;  %7068 = vst [vmem:[#allocation59_spill] sm:$0xff] %v5995_v58  ;;  %7069 = vst [vmem:[#allocation60_spill] sm:$0xff] %v5998_v57  ;;  %v6001_v1 = vld [vmem:[#allocation9 + $0x1e0] ss:$16 sps:$4 sm:$0xff]   ;;  %v6004_v4 = vld [vmem:[#allocation9 + $0x1e8] ss:$16 sps:$4 sm:$0xff]  }
 0x749   :  { %7070 = vst [vmem:[#allocation61_spill] sm:$0xff] %v6001_v1  ;;  %7071 = vst [vmem:[#allocation62_spill] sm:$0xff] %v6004_v4 }
 0x74b   :  { %2504 = vmatpush1.bf16.msra.mxu0 %v5989_v55  ;;  %2545 = vmatpush1.bf16.msra.mxu1 %v5992_v60  ;;  %v6007_v55 = vld [vmem:[#allocation9 + $0x1c4] ss:$16 sps:$4 sm:$0xff]   ;;  %v6010_v60 = vld [vmem:[#allocation9 + $0x1cc] ss:$16 sps:$4 sm:$0xff]  }
 0x74c   :  { %2505 = vmatprep.subr.bf16.mxu0 %v5995_v58  ;;  %2546 = vmatprep.subr.bf16.mxu1 %v5998_v57  ;;  %7072 = vst [vmem:[#allocation63_spill] sm:$0xff] %v6007_v55  ;;  %7073 = vst [vmem:[#allocation64_spill] sm:$0xff] %v6010_v60  ;;  %v6013_v58 = vld [vmem:[#allocation9 + $0x1c0] ss:$16 sps:$4 sm:$0xff]   ;;  %v6016_v57 = vld [vmem:[#allocation9 + $0x1c8] ss:$16 sps:$4 sm:$0xff]  }
 0x74d   :  { %7074 = vst [vmem:[#allocation92_spill] sm:$0xff] %v6013_v58  ;;  %7075 = vst [vmem:[#allocation94_spill] sm:$0xff] %v6016_v57 }
 0x74f   :  { %2506 = vmatpush2.bf16.msra.mxu0 %v6001_v1  ;;  %2547 = vmatpush2.bf16.msra.mxu1 %v6004_v4  ;;  %v6019_v1 = vld [vmem:[#allocation9 + $0x1a4] ss:$16 sps:$4 sm:$0xff]   ;;  %v6022_v4 = vld [vmem:[#allocation9 + $0x1ac] ss:$16 sps:$4 sm:$0xff]  }
 0x750   :  { %2507 = vmatprep.subr.bf16.mxu0 %v6007_v55  ;;  %2548 = vmatprep.subr.bf16.mxu1 %v6010_v60  ;;  %7076 = vst [vmem:[#allocation95_spill] sm:$0xff] %v6019_v1  ;;  %7077 = vst [vmem:[#allocation93_spill] sm:$0xff] %v6022_v4  ;;  %v6025_v55 = vld [vmem:[#allocation9 + $0x1a0] ss:$16 sps:$4 sm:$0xff]   ;;  %v6028_v60 = vld [vmem:[#allocation9 + $0x1a8] ss:$16 sps:$4 sm:$0xff]  }
 0x751   :  { %7078 = vst [vmem:[#allocation65_spill] sm:$0xff] %v6025_v55  ;;  %7079 = vst [vmem:[#allocation66_spill] sm:$0xff] %v6028_v60 }
 0x753   :  { %2508 = vmatpush2.bf16.msra.mxu0 %v6013_v58  ;;  %2549 = vmatpush2.bf16.msra.mxu1 %v6016_v57  ;;  %v6031_v58 = vld [vmem:[#allocation9 + $0x184] ss:$16 sps:$4 sm:$0xff]   ;;  %v6034_v57 = vld [vmem:[#allocation9 + $0x18c] ss:$16 sps:$4 sm:$0xff]  }
 0x754   :  { %2509 = vmatprep.subr.bf16.mxu0 %v6019_v1  ;;  %2550 = vmatprep.subr.bf16.mxu1 %v6022_v4  ;;  %7080 = vst [vmem:[#allocation67_spill] sm:$0xff] %v6031_v58  ;;  %7081 = vst [vmem:[#allocation68_spill] sm:$0xff] %v6034_v57  ;;  %v6037_v1 = vld [vmem:[#allocation9 + $0x180] ss:$16 sps:$4 sm:$0xff]   ;;  %v6040_v4 = vld [vmem:[#allocation9 + $0x188] ss:$16 sps:$4 sm:$0xff]  }
 0x755   :  { %7082 = vst [vmem:[#allocation69_spill] sm:$0xff] %v6037_v1  ;;  %7083 = vst [vmem:[#allocation70_spill] sm:$0xff] %v6040_v4 }
 0x757   :  { %2510 = vmatpush2.bf16.msra.mxu0 %v6025_v55  ;;  %2551 = vmatpush2.bf16.msra.mxu1 %v6028_v60  ;;  %v6043_v55 = vld [vmem:[#allocation9 + $0x164] ss:$16 sps:$4 sm:$0xff]   ;;  %v6046_v60 = vld [vmem:[#allocation9 + $0x16c] ss:$16 sps:$4 sm:$0xff]  }
 0x758   :  { %2511 = vmatprep.subr.bf16.mxu0 %v6031_v58  ;;  %2552 = vmatprep.subr.bf16.mxu1 %v6034_v57  ;;  %7084 = vst [vmem:[#allocation71_spill] sm:$0xff] %v6043_v55  ;;  %7085 = vst [vmem:[#allocation72_spill] sm:$0xff] %v6046_v60  ;;  %v6049_v58 = vld [vmem:[#allocation9 + $0x160] ss:$16 sps:$4 sm:$0xff]   ;;  %v6052_v57 = vld [vmem:[#allocation9 + $0x168] ss:$16 sps:$4 sm:$0xff]  }
 0x759   :  { %7086 = vst [vmem:[#allocation73_spill] sm:$0xff] %v6049_v58  ;;  %7087 = vst [vmem:[#allocation74_spill] sm:$0xff] %v6052_v57 }
 0x75b   :  { %2512 = vmatpush2.bf16.msra.mxu0 %v6037_v1  ;;  %2553 = vmatpush2.bf16.msra.mxu1 %v6040_v4  ;;  %v6055_v1 = vld [vmem:[#allocation9 + $0x144] ss:$16 sps:$4 sm:$0xff]   ;;  %v6058_v4 = vld [vmem:[#allocation9 + $0x14c] ss:$16 sps:$4 sm:$0xff]  }
 0x75c   :  { %2513 = vmatprep.subr.bf16.mxu0 %v6043_v55  ;;  %2554 = vmatprep.subr.bf16.mxu1 %v6046_v60  ;;  %7088 = vst [vmem:[#allocation75_spill] sm:$0xff] %v6055_v1  ;;  %7089 = vst [vmem:[#allocation76_spill] sm:$0xff] %v6058_v4  ;;  %v6061_v55 = vld [vmem:[#allocation9 + $0x140] ss:$16 sps:$4 sm:$0xff]   ;;  %v6064_v60 = vld [vmem:[#allocation9 + $0x148] ss:$16 sps:$4 sm:$0xff]  }
 0x75d   :  { %7090 = vst [vmem:[#allocation77_spill] sm:$0xff] %v6061_v55  ;;  %7091 = vst [vmem:[#allocation78_spill] sm:$0xff] %v6064_v60 }
 0x75f   :  { %2514 = vmatpush2.bf16.msra.mxu0 %v6049_v58  ;;  %2555 = vmatpush2.bf16.msra.mxu1 %v6052_v57  ;;  %v6067_v58 = vld [vmem:[#allocation9 + $0x124] ss:$16 sps:$4 sm:$0xff]   ;;  %v6070_v57 = vld [vmem:[#allocation9 + $0x12c] ss:$16 sps:$4 sm:$0xff]  }
 0x760   :  { %2515 = vmatprep.subr.bf16.mxu0 %v6055_v1  ;;  %2556 = vmatprep.subr.bf16.mxu1 %v6058_v4  ;;  %7092 = vst [vmem:[#allocation24_spill] sm:$0xff] %v6067_v58  ;;  %7093 = vst [vmem:[#allocation25_spill] sm:$0xff] %v6070_v57  ;;  %v6073_v1 = vld [vmem:[#allocation9 + $0x120] ss:$16 sps:$4 sm:$0xff]   ;;  %v6076_v4 = vld [vmem:[#allocation9 + $0x128] ss:$16 sps:$4 sm:$0xff]  }
 0x761   :  { %7094 = vst [vmem:[#allocation84_spill] sm:$0xff] %v6073_v1  ;;  %7095 = vst [vmem:[#allocation86_spill] sm:$0xff] %v6076_v4 }
 0x763   :  { %2516 = vmatpush2.bf16.msra.mxu0 %v6061_v55  ;;  %2557 = vmatpush2.bf16.msra.mxu1 %v6064_v60  ;;  %v6079_v55 = vld [vmem:[#allocation9 + $0x104] ss:$16 sps:$4 sm:$0xff]   ;;  %v6082_v60 = vld [vmem:[#allocation9 + $0x10c] ss:$16 sps:$4 sm:$0xff]  }
 0x764   :  { %2517 = vmatprep.subr.bf16.mxu0 %v6067_v58  ;;  %2558 = vmatprep.subr.bf16.mxu1 %v6070_v57  ;;  %7096 = vst [vmem:[#allocation87_spill] sm:$0xff] %v6079_v55  ;;  %7097 = vst [vmem:[#allocation85_spill] sm:$0xff] %v6082_v60  ;;  %v6085_v58 = vld [vmem:[#allocation9 + $0x100] ss:$16 sps:$4 sm:$0xff]   ;;  %v6088_v57 = vld [vmem:[#allocation9 + $0x108] ss:$16 sps:$4 sm:$0xff]  }
 0x765   :  { %7098 = vst [vmem:[#allocation30_spill] sm:$0xff] %v6085_v58  ;;  %7099 = vst [vmem:[#allocation31_spill] sm:$0xff] %v6088_v57 }
 0x767   :  { %2518 = vmatpush2.bf16.msra.mxu0 %v6073_v1  ;;  %2559 = vmatpush2.bf16.msra.mxu1 %v6076_v4 }
 0x768   :  { %2519 = vmatprep.subr.bf16.mxu0 %v6079_v55  ;;  %2560 = vmatprep.subr.bf16.mxu1 %v6082_v60 }
 0x76b   :  { %2520 = vmatpush2.bf16.msra.mxu0 %v6085_v58  ;;  %2561 = vmatpush2.bf16.msra.mxu1 %v6088_v57 }
 0x76c   :  { %2599 = vmatprep.subr.bf16.mxu0 %v7026_v59  ;;  %2640 = vmatprep.subr.bf16.mxu1 %v7027_v56 }
 0x7ce   :  { %v2301_v4 = vpop.f32.mrf.mxu0  ;;  %v2342_v1 = vpop.f32.mrf.mxu1 }
 0x7cf   :  { %v2302_v55 = vadd.f32 %v2301_v4, %v7028_v38  ;;  %v2343_v43 = vadd.f32 %v2342_v1, %v7031_v42 }
 0x7d0   :  { %v2303_v3 = vpop.f32.mrf.mxu0  ;;  %v2344_v7 = vpop.f32.mrf.mxu1 }
 0x7d1   :  { %v3437_v29 = vmul.f32 -1.442695, %v2302_v55  ;;  %v2304_v60 = vadd.f32 %v2303_v3, %v7029_v24  ;;  %v2345_v59 = vadd.f32 %v2344_v7, %v7030_v16  ;;  %v7100_v3 = vld [vmem:[#allocation100_spill] sm:$0xff]  ;;  %v7101_v16 = vld [vmem:[#allocation102_spill] sm:$0xff] }
 0x7d2   :  { %v2305_v46 = vpop.f32.mrf.mxu0  ;;  %v2346_v45 = vpop.f32.mrf.mxu1 }
 0x7d3   :  { %3989 = vpow2.f32 %v3437_v29  ;;  %v3438_v58 = vmul.f32 -1.442695, %v2304_v60  ;;  %v3439_v57 = vmul.f32 -1.442695, %v2345_v59 }
 0x7d4   :  { %v2306_v6 = vpop.f32.mrf.mxu0  ;;  %v2347_v44 = vpop.f32.mrf.mxu1 }
 0x7d5   :  { %3991 = vpow2.f32 %v3438_v58 }
 0x7d6   :  { %3993 = vpow2.f32 %v3439_v57 }
 0x7e0   :  { %v3990_v56 = vpop.eup %3989 }
 0x7e1   :  { %v2352_v41 = vadd.f32 1.0, %v3990_v56 }
 0x7e2   :  { %v3992_v4 = vpop.eup %3991 }
 0x7e3   :  { %3995 = vrcp.f32 %v2352_v41  ;;  %v2358_v55 = vadd.f32 1.0, %v3992_v4  ;;  %v3994_v29 = vpop.eup %3993 }
 0x7e4   :  { %3997 = vtanh.f32 %v2343_v43  ;;  %v2365_v56 = vadd.f32 1.0, %v3994_v29 }
 0x7e5   :  { %3999 = vrcp.f32 %v2358_v55 }
 0x7ee   :  { %v2411_v46 = vpop.f32.mrf.mxu0  ;;  %v2452_v45 = vpop.f32.mrf.mxu1 }
 0x7ef   :  { %v2459_v6 = vadd.f32 %v2411_v46, %v7100_v3  ;;  %v7102_v3 = vld [vmem:[#allocation103_spill] sm:$0xff] }
 0x7f0   :  { %v3996_v44 = vpop.eup %3995  ;;  %v2413_v60 = vpop.f32.mrf.mxu0 }
 0x7f1   :  { %v2454_v58 = vpop.f32.mrf.mxu1  ;;  %v3998_v7 = vpop.eup %3997  ;;  %v3440_v59 = vmul.f32 -1.442695, %v2459_v6  ;;  %v2460_v24 = vadd.f32 %v2413_v60, %v7101_v16  ;;  %v7103_v16 = vld [vmem:[#allocation101_spill] sm:$0xff] }
 0x7f2   :  { %v4000_v1 = vpop.eup %3999  ;;  %v2415_v42 = vpop.f32.mrf.mxu0  ;;  %v2369_v41 = vmul.f32 %v3998_v7, %v3996_v44  ;;  %v2462_v6 = vadd.f32 %v2454_v58, %v7102_v3  ;;  %v2461_v60 = vadd.f32 %v2452_v45, %v7103_v16 }
 0x7f3   :  { %v2456_v57 = vpop.f32.mrf.mxu1  ;;  %v2368_v43 = vmul.f32 %v4000_v1, %v5858_v23  ;;  %4001 = vpow2.f32 %v3440_v59  ;;  %v3441_v4 = vmul.f32 -1.442695, %v2460_v24 }
 0x7f4   :  { %v2416_v55 = vpop.f32.mrf.mxu0  ;;  %v3442_v29 = vmul.f32 -1.442695, %v2462_v6 }
 0x7f5   :  { %v2457_v38 = vpop.f32.mrf.mxu1  ;;  %4003 = vpow2.f32 %v3441_v4  ;;  %v6100_v46 = vadd.f32 %v2369_v41, %v2368_v43 }
 0x7f6   :  { %4005 = vrcp.f32 %v2365_v56 }
 0x7f7   :  { %4007 = vtanh.f32 %v6100_v46 }
 0x7f8   :  { %4009 = vtanh.f32 %v2461_v60 }
 0x7f9   :  { %4011 = vpow2.f32 %v3442_v29  ;;  %v7146_v29 = vld [vmem:[#allocation75_spill] sm:$0xff] }
 0x800   :  { %v4002_v42 = vpop.eup %4001 }
 0x801   :  { %v2466_v57 = vadd.f32 1.0, %v4002_v42  ;;  %v7147_v42 = vld [vmem:[#allocation76_spill] sm:$0xff] }
 0x802   :  { %v4004_v44 = vpop.eup %4003 }
 0x803   :  { %v4006_v23 = vpop.eup %4005  ;;  %4013 = vrcp.f32 %v2466_v57  ;;  %v2472_v24 = vadd.f32 1.0, %v4004_v44  ;;  %v7148_v57 = vld [vmem:[#allocation77_spill] sm:$0xff]  ;;  %v7149_v44 = vld [vmem:[#allocation78_spill] sm:$0xff] }
 0x804   :  { %v4008_v38 = vpop.eup %4007 }
 0x805   :  { %4015 = vrcp.f32 %v2472_v24  ;;  %v2372_v7 = vmul.f32 %v4008_v38, %v4006_v23  ;;  %v4010_v1 = vpop.eup %4009  ;;  %v7150_v23 = vld [vmem:[#allocation24_spill] sm:$0xff]  ;;  %v7151_v24 = vld [vmem:[#allocation25_spill] sm:$0xff] }
 0x806   :  { %v4012_v56 = vpop.eup %4011  ;;  %v7152_v38 = vld [vmem:[#allocation84_spill] sm:$0xff] }
 0x807   :  { %v2488_v59 = vpack.c.bf16 %v2372_v7, %v2372_v7  ;;  %v2479_v43 = vadd.f32 1.0, %v4012_v56  ;;  %v7153_v7 = vld [vmem:[#allocation86_spill] sm:$0xff] }
 0x808   :  { %v7156_v56 = vld [vmem:[#allocation30_spill] sm:$0xff] }
 0x809   :  { %2521 = vmatprep.mubr.bf16.mxu0 %v2488_v59  ;;  %2562 = vmatprep.mubr.bf16.mxu1 %v2488_v59  ;;  %4017 = vrcp.f32 %v2479_v43  ;;  %v7154_v59 = vld [vmem:[#allocation87_spill] sm:$0xff]  ;;  %v7158_v43 = vld [vmem:[#allocation26_spill] sm:$0xff] }
 0x810   :  { %v4014_v58 = vpop.eup %4013 }
 0x811   :  { %v2483_v41 = vmul.f32 %v4014_v58, %v4010_v1  ;;  %v7155_v1 = vld [vmem:[#allocation85_spill] sm:$0xff]  ;;  %v7157_v58 = vld [vmem:[#allocation31_spill] sm:$0xff] }
 0x812   :  { %v4016_v45 = vpop.eup %4015 }
 0x813   :  { %v2482_v4 = vmul.f32 %v4016_v45, %v5864_v9  ;;  %v7125_v9 = vld [vmem:[#allocation58_spill] sm:$0xff] }
 0x815   :  { %v6106_v55 = vadd.f32 %v2483_v41, %v2482_v4 }
 0x816   :  { %v4018_v3 = vpop.eup %4017 }
 0x817   :  { %4019 = vtanh.f32 %v6106_v55 }
 0x824   :  { %v4020_v6 = vpop.eup %4019 }
 0x825   :  { %v2486_v16 = vmul.f32 %v4020_v6, %v4018_v3 }
 0x827   :  { %v2487_v60 = vpack.c.bf16 %v2486_v16, %v2486_v16 }
 0x829   :  { %2522 = vmatmul.mubr.bf16.vlgmr.msra.gmra.mxu0 %v2487_v60  ;;  %2563 = vmatmul.mubr.bf16.vlgmr.msra.gmra.mxu1 %v2487_v60 }
 0x82a   :  { %2600 = vmatpush1.bf16.msra.mxu0 %v5691_v28  ;;  %2641 = vmatpush1.bf16.msra.mxu1 %v5694_v48  ;;  %v7105_v28 = vld [vmem:[#allocation43_spill] sm:$0xff]  ;;  %v7106_v48 = vld [vmem:[#allocation44_spill] sm:$0xff] }
 0x82b   :  { %2601 = vmatprep.subr.bf16.mxu0 %v5697_v22  ;;  %2642 = vmatprep.subr.bf16.mxu1 %v5700_v18  ;;  %v7107_v22 = vld [vmem:[#allocation45_spill] sm:$0xff]  ;;  %v7108_v18 = vld [vmem:[#allocation46_spill] sm:$0xff] }
 0x82c   :  { %2631 = vmatprep.mubr.bf16.mxu0 %v6745_v19  ;;  %2672 = vmatprep.mubr.bf16.mxu1 %v6745_v19  ;;  %v7104_v19 = vld [vmem:[#allocation42_spill] sm:$0xff] }
 0x82e   :  { %2602 = vmatpush1.bf16.msra.mxu0 %v5705_v37  ;;  %2643 = vmatpush1.bf16.msra.mxu1 %v5708_v53  ;;  %v7109_v37 = vld [vmem:[#allocation47_spill] sm:$0xff]  ;;  %v7110_v53 = vld [vmem:[#allocation48_spill] sm:$0xff] }
 0x82f   :  { %2603 = vmatprep.subr.bf16.mxu0 %v5711_v20  ;;  %2644 = vmatprep.subr.bf16.mxu1 %v5714_v21  ;;  %v7111_v20 = vld [vmem:[#allocation49_spill] sm:$0xff]  ;;  %v7112_v21 = vld [vmem:[#allocation50_spill] sm:$0xff] }
 0x832   :  { %2604 = vmatpush1.bf16.msra.mxu0 %v5717_v15  ;;  %2645 = vmatpush1.bf16.msra.mxu1 %v5720_v50  ;;  %v7113_v15 = vld [vmem:[#allocation51_spill] sm:$0xff]  ;;  %v7114_v50 = vld [vmem:[#allocation52_spill] sm:$0xff] }
 0x833   :  { %2605 = vmatprep.subr.bf16.mxu0 %v5723_v51  ;;  %2646 = vmatprep.subr.bf16.mxu1 %v5726_v49  ;;  %v7115_v51 = vld [vmem:[#allocation53_spill] sm:$0xff]  ;;  %v7116_v49 = vld [vmem:[#allocation54_spill] sm:$0xff] }
 0x836   :  { %2606 = vmatpush1.bf16.msra.mxu0 %v5729_v52  ;;  %2647 = vmatpush1.bf16.msra.mxu1 %v5732_v35  ;;  %v7117_v52 = vld [vmem:[#allocation79_spill] sm:$0xff]  ;;  %v7118_v35 = vld [vmem:[#allocation80_spill] sm:$0xff] }
 0x837   :  { %2607 = vmatprep.subr.bf16.mxu0 %v7036_v62  ;;  %2648 = vmatprep.subr.bf16.mxu1 %v7037_v63  ;;  %v7126_v62 = vld [vmem:[#allocation59_spill] sm:$0xff]  ;;  %v7127_v63 = vld [vmem:[#allocation60_spill] sm:$0xff] }
 0x83a   :  { %2608 = vmatpush1.bf16.msra.mxu0 %v7038_v2  ;;  %2649 = vmatpush1.bf16.msra.mxu1 %v7039_v10  ;;  %v7128_v2 = vld [vmem:[#allocation61_spill] sm:$0xff]  ;;  %v7129_v10 = vld [vmem:[#allocation62_spill] sm:$0xff] }
 0x83b   :  { %2609 = vmatprep.subr.bf16.mxu0 %v7040_v5  ;;  %2650 = vmatprep.subr.bf16.mxu1 %v7041_v8  ;;  %v7130_v5 = vld [vmem:[#allocation63_spill] sm:$0xff]  ;;  %v7131_v8 = vld [vmem:[#allocation64_spill] sm:$0xff] }
 0x83e   :  { %2610 = vmatpush1.bf16.msra.mxu0 %v7042_v0  ;;  %2651 = vmatpush1.bf16.msra.mxu1 %v7043_v61  ;;  %v7132_v0 = vld [vmem:[#allocation92_spill] sm:$0xff]  ;;  %v7133_v61 = vld [vmem:[#allocation94_spill] sm:$0xff] }
 0x83f   :  { %2611 = vmatprep.subr.bf16.mxu0 %v7044_v54  ;;  %2652 = vmatprep.subr.bf16.mxu1 %v7045_v17  ;;  %v7134_v54 = vld [vmem:[#allocation95_spill] sm:$0xff]  ;;  %v7135_v17 = vld [vmem:[#allocation93_spill] sm:$0xff] }
 0x842   :  { %2612 = vmatpush1.bf16.msra.mxu0 %v5765_v39  ;;  %2653 = vmatpush1.bf16.msra.mxu1 %v5768_v47  ;;  %v7123_v39 = vld [vmem:[#allocation56_spill] sm:$0xff]  ;;  %v7124_v47 = vld [vmem:[#allocation57_spill] sm:$0xff] }
 0x843   :  { %2613 = vmatprep.subr.bf16.mxu0 %v5771_v33  ;;  %2654 = vmatprep.subr.bf16.mxu1 %v5774_v13  ;;  %v7119_v33 = vld [vmem:[#allocation82_spill] sm:$0xff]  ;;  %v7120_v13 = vld [vmem:[#allocation83_spill] sm:$0xff] }
 0x846   :  { %2614 = vmatpush1.bf16.msra.mxu0 %v5777_v12  ;;  %2655 = vmatpush1.bf16.msra.mxu1 %v5780_v14  ;;  %v7121_v12 = vld [vmem:[#allocation81_spill] sm:$0xff]  ;;  %v7122_v14 = vld [vmem:[#allocation55_spill] sm:$0xff] }
 0x847   :  { %2711 = vmatprep.subr.bf16.mxu0 %v5899_v11  ;;  %2752 = vmatprep.subr.bf16.mxu1 %v5902_v25  ;;  %v7136_v11 = vld [vmem:[#allocation65_spill] sm:$0xff]  ;;  %v7137_v25 = vld [vmem:[#allocation66_spill] sm:$0xff] }
 0x849   :  { %2632 = vmatmul.mubr.bf16.vlgmr.msra.gmra.mxu0 %v2487_v60  ;;  %2673 = vmatmul.mubr.bf16.vlgmr.msra.gmra.mxu1 %v2487_v60  ;;  %v7159_v60 = vld [vmem:[#allocation27_spill] sm:$0xff] }
 0x84a   :  { %2712 = vmatpush1.bf16.msra.mxu0 %v5905_v26  ;;  %2753 = vmatpush1.bf16.msra.mxu1 %v5908_v27  ;;  %v7138_v26 = vld [vmem:[#allocation67_spill] sm:$0xff]  ;;  %v7139_v27 = vld [vmem:[#allocation68_spill] sm:$0xff] }
 0x84b   :  { %2713 = vmatprep.subr.bf16.mxu0 %v5911_v31  ;;  %2754 = vmatprep.subr.bf16.mxu1 %v5914_v32  ;;  %v7140_v31 = vld [vmem:[#allocation69_spill] sm:$0xff]  ;;  %v7141_v32 = vld [vmem:[#allocation70_spill] sm:$0xff] }
 0x84e   :  { %2714 = vmatpush1.bf16.msra.mxu0 %v5917_v34  ;;  %2755 = vmatpush1.bf16.msra.mxu1 %v5920_v36  ;;  %v7142_v34 = vld [vmem:[#allocation71_spill] sm:$0xff]  ;;  %v7143_v36 = vld [vmem:[#allocation72_spill] sm:$0xff] }
 0x84f   :  { %2715 = vmatprep.subr.bf16.mxu0 %v5923_v40  ;;  %2756 = vmatprep.subr.bf16.mxu1 %v5926_v30  ;;  %v7144_v40 = vld [vmem:[#allocation73_spill] sm:$0xff]  ;;  %v7145_v30 = vld [vmem:[#allocation74_spill] sm:$0xff] }
 0x852   :  { %2716 = vmatpush1.bf16.msra.mxu0 %v7104_v19  ;;  %2757 = vmatpush1.bf16.msra.mxu1 %v7105_v28 }
 0x853   :  { %2717 = vmatprep.subr.bf16.mxu0 %v7106_v48  ;;  %2758 = vmatprep.subr.bf16.mxu1 %v7107_v22 }
 0x856   :  { %2718 = vmatpush1.bf16.msra.mxu0 %v7108_v18  ;;  %2759 = vmatpush1.bf16.msra.mxu1 %v7109_v37 }
 0x857   :  { %2719 = vmatprep.subr.bf16.mxu0 %v7110_v53  ;;  %2760 = vmatprep.subr.bf16.mxu1 %v7111_v20  ;;  %v7160_v53 = vld [vmem:[#allocation28_spill] sm:$0xff] }
 0x85a   :  { %2720 = vmatpush1.bf16.msra.mxu0 %v7112_v21  ;;  %2761 = vmatpush1.bf16.msra.mxu1 %v7113_v15 }
 0x85b   :  { %2721 = vmatprep.subr.bf16.mxu0 %v7114_v50  ;;  %2762 = vmatprep.subr.bf16.mxu1 %v7115_v51  ;;  %v7161_v50 = vld [vmem:[#allocation29_spill] sm:$0xff] }
 0x85e   :  { %2722 = vmatpush1.bf16.msra.mxu0 %v7116_v49  ;;  %2763 = vmatpush1.bf16.msra.mxu1 %v7117_v52 }
 0x85f   :  { %2723 = vmatprep.subr.bf16.mxu0 %v7118_v35  ;;  %2764 = vmatprep.subr.bf16.mxu1 %v7119_v33 }
 0x862   :  { %2724 = vmatpush1.bf16.msra.mxu0 %v7120_v13  ;;  %2765 = vmatpush1.bf16.msra.mxu1 %v7121_v12 }
 0x863   :  { %2725 = vmatprep.subr.bf16.mxu0 %v7122_v14  ;;  %2766 = vmatprep.subr.bf16.mxu1 %v7123_v39  ;;  %v7162_v14 = vld [vmem:[#allocation104_spill] sm:$0xff] }
 0x866   :  { %2726 = vmatpush1.bf16.msra.mxu0 %v7124_v47  ;;  %2767 = vmatpush1.bf16.msra.mxu1 %v7125_v9 }
 0x867   :  { %2727 = vmatprep.subr.bf16.mxu0 %v7126_v62  ;;  %2768 = vmatprep.subr.bf16.mxu1 %v7127_v63 }
 0x86a   :  { %2728 = vmatpush2.bf16.msra.mxu0 %v7128_v2  ;;  %2769 = vmatpush2.bf16.msra.mxu1 %v7129_v10  ;;  %v7163_v10 = vld [vmem:[#allocation106_spill] sm:$0xff] }
 0x86b   :  { %2729 = vmatprep.subr.bf16.mxu0 %v7130_v5  ;;  %2770 = vmatprep.subr.bf16.mxu1 %v7131_v8 }
 0x86e   :  { %2730 = vmatpush2.bf16.msra.mxu0 %v7132_v0  ;;  %2771 = vmatpush2.bf16.msra.mxu1 %v7133_v61 }
 0x86f   :  { %2731 = vmatprep.subr.bf16.mxu0 %v7134_v54  ;;  %2772 = vmatprep.subr.bf16.mxu1 %v7135_v17 }
 0x872   :  { %2732 = vmatpush2.bf16.msra.mxu0 %v7136_v11  ;;  %2773 = vmatpush2.bf16.msra.mxu1 %v7137_v25 }
 0x873   :  { %2733 = vmatprep.subr.bf16.mxu0 %v7138_v26  ;;  %2774 = vmatprep.subr.bf16.mxu1 %v7139_v27 }
 0x876   :  { %2734 = vmatpush2.bf16.msra.mxu0 %v7140_v31  ;;  %2775 = vmatpush2.bf16.msra.mxu1 %v7141_v32  ;;  %v7164_v32 = vld [vmem:[#allocation107_spill] sm:$0xff] }
 0x877   :  { %2735 = vmatprep.subr.bf16.mxu0 %v7142_v34  ;;  %2776 = vmatprep.subr.bf16.mxu1 %v7143_v36  ;;  %v7165_v36 = vld [vmem:[#allocation105_spill] sm:$0xff] }
 0x87a   :  { %2736 = vmatpush2.bf16.msra.mxu0 %v7144_v40  ;;  %2777 = vmatpush2.bf16.msra.mxu1 %v7145_v30 }
 0x87b   :  { %2737 = vmatprep.subr.bf16.mxu0 %v7146_v29  ;;  %2778 = vmatprep.subr.bf16.mxu1 %v7147_v42 }
 0x87e   :  { %2738 = vmatpush2.bf16.msra.mxu0 %v7148_v57  ;;  %2779 = vmatpush2.bf16.msra.mxu1 %v7149_v44 }
 0x87f   :  { %2739 = vmatprep.subr.bf16.mxu0 %v7150_v23  ;;  %2780 = vmatprep.subr.bf16.mxu1 %v7151_v24 }
 0x882   :  { %2740 = vmatpush2.bf16.msra.mxu0 %v7152_v38  ;;  %2781 = vmatpush2.bf16.msra.mxu1 %v7153_v7 }
 0x883   :  { %2741 = vmatprep.subr.bf16.mxu0 %v7154_v59  ;;  %2782 = vmatprep.subr.bf16.mxu1 %v7155_v1 }
 0x886   :  { %2742 = vmatpush2.bf16.msra.mxu0 %v7156_v56  ;;  %2783 = vmatpush2.bf16.msra.mxu1 %v7157_v58 }
 0x8e9   :  { %v2523_v41 = vpop.f32.mrf.mxu0  ;;  %v2564_v45 = vpop.f32.mrf.mxu1 }
 0x8ea   :  { %v2524_v4 = vadd.f32 %v2523_v41, %v7158_v43  ;;  %v2565_v51 = vadd.f32 %v2564_v45, %v7161_v50 }
 0x8eb   :  { %v2525_v3 = vpop.f32.mrf.mxu0  ;;  %v2566_v6 = vpop.f32.mrf.mxu1 }
 0x8ec   :  { %v3443_v16 = vmul.f32 -1.442695, %v2524_v4  ;;  %v2526_v19 = vadd.f32 %v2525_v3, %v7159_v60  ;;  %v2567_v20 = vadd.f32 %v2566_v6, %v7160_v53 }
 0x8ed   :  { %v2527_v28 = vpop.f32.mrf.mxu0  ;;  %v2568_v48 = vpop.f32.mrf.mxu1 }
 0x8ee   :  { %4021 = vpow2.f32 %v3443_v16  ;;  %v3444_v22 = vmul.f32 -1.442695, %v2526_v19  ;;  %v3445_v21 = vmul.f32 -1.442695, %v2567_v20  ;;  %v3781_v28 = vld [vmem:[#allocation12 + $0x38] sm:$0xff]   ;;  %v4467_v48 = vmov 0.0  }
 0x8ef   :  { %v2528_v18 = vpop.f32.mrf.mxu0  ;;  %v2569_v37 = vpop.f32.mrf.mxu1  ;;  %3524 = vmatprep.subr.bf16.mxu0 %v4467_v48  ;;  %3544 = vmatprep.subr.bf16.mxu1 %v4467_v48  ;;  %v3786_v20 = vld [vmem:[#allocation12 + $0x10] sm:$0xff]  }
 0x8f0   :  { %4023 = vpow2.f32 %v3444_v22  ;;  %v3782_v22 = vld [vmem:[#allocation12 + $0x30] sm:$0xff]   ;;  %v3784_v18 = vld [vmem:[#allocation12 + $0x20] sm:$0xff]   ;;  %v3785_v37 = vld [vmem:[#allocation12 + $0x18] sm:$0xff]  }
 0x8f1   :  { %4025 = vpow2.f32 %v3445_v21  ;;  %v3787_v21 = vld [vmem:[#allocation12 + $0x8] sm:$0xff]  }
 0x8fb   :  { %v4022_v15 = vpop.eup %4021 }
 0x8fc   :  { %v2574_v49 = vadd.f32 1.0, %v4022_v15  ;;  %v3788_v15 = vld [vmem:[#allocation12] sm:$0xff]  }
 0x8fd   :  { %v4024_v52 = vpop.eup %4023 }
 0x8fe   :  { %4027 = vrcp.f32 %v2574_v49  ;;  %v2580_v35 = vadd.f32 1.0, %v4024_v52  ;;  %v4026_v12 = vpop.eup %4025  ;;  %v3790_v49 = vld [vmem:[#allocation14 + $0x30] sm:$0xff]   ;;  %v3791_v52 = vld [vmem:[#allocation14 + $0x28] sm:$0xff]  }
 0x8ff   :  { %4029 = vtanh.f32 %v2565_v51  ;;  %v2587_v0 = vadd.f32 1.0, %v4026_v12  ;;  %v3789_v51 = vld [vmem:[#allocation14 + $0x38] sm:$0xff]  }
 0x900   :  { %4031 = vrcp.f32 %v2580_v35  ;;  %v3792_v35 = vld [vmem:[#allocation14 + $0x20] sm:$0xff]  }
 0x909   :  { %v2633_v33 = vpop.f32.mrf.mxu0  ;;  %v2674_v13 = vpop.f32.mrf.mxu1 }
 0x90a   :  { %v2681_v39 = vadd.f32 %v2633_v33, %v7162_v14  ;;  %v2683_v40 = vadd.f32 %v2674_v13, %v7165_v36  ;;  %v3793_v33 = vld [vmem:[#allocation14 + $0x18] sm:$0xff]   ;;  %v3794_v13 = vld [vmem:[#allocation14 + $0x10] sm:$0xff]  }
 0x90b   :  { %v4028_v47 = vpop.eup %4027  ;;  %v2635_v9 = vpop.f32.mrf.mxu0 }
 0x90c   :  { %v2676_v62 = vpop.f32.mrf.mxu1  ;;  %v4030_v63 = vpop.eup %4029  ;;  %v3446_v2 = vmul.f32 -1.442695, %v2681_v39  ;;  %v2682_v5 = vadd.f32 %v2635_v9, %v7163_v10 }
 0x90d   :  { %v4032_v8 = vpop.eup %4031  ;;  %v2637_v61 = vpop.f32.mrf.mxu0  ;;  %v2591_v17 = vmul.f32 %v4030_v63, %v4028_v47  ;;  %v2684_v34 = vadd.f32 %v2676_v62, %v7164_v32 }
 0x90e   :  { %v2678_v54 = vpop.f32.mrf.mxu1  ;;  %v2590_v11 = vmul.f32 %v4032_v8, %v6100_v46  ;;  %4033 = vpow2.f32 %v3446_v2  ;;  %v3447_v25 = vmul.f32 -1.442695, %v2682_v5 }
 0x90f   :  { %v2638_v26 = vpop.f32.mrf.mxu0  ;;  %v3448_v30 = vmul.f32 -1.442695, %v2684_v34 }
 0x910   :  { %v2679_v27 = vpop.f32.mrf.mxu1  ;;  %4035 = vpow2.f32 %v3447_v25  ;;  %v6212_v31 = vadd.f32 %v2591_v17, %v2590_v11 }
 0x911   :  { %4037 = vrcp.f32 %v2587_v0 }
 0x912   :  { %4039 = vtanh.f32 %v6212_v31 }
 0x913   :  { %4041 = vtanh.f32 %v2683_v40 }
 0x914   :  { %4043 = vpow2.f32 %v3448_v30 }
 0x91b   :  { %v4034_v29 = vpop.eup %4033 }
 0x91c   :  { %v2688_v42 = vadd.f32 1.0, %v4034_v29 }
 0x91d   :  { %v4036_v57 = vpop.eup %4035 }
 0x91e   :  { %v4038_v46 = vpop.eup %4037  ;;  %4045 = vrcp.f32 %v2688_v42  ;;  %v2694_v44 = vadd.f32 1.0, %v4036_v57 }
 0x91f   :  { %v4040_v23 = vpop.eup %4039 }
 0x920   :  { %4047 = vrcp.f32 %v2694_v44  ;;  %v2594_v24 = vmul.f32 %v4040_v23, %v4038_v46  ;;  %v4042_v7 = vpop.eup %4041  ;;  %v3795_v46 = vld [vmem:[#allocation14 + $0x8] sm:$0xff]   ;;  %v3796_v44 = vld [vmem:[#allocation14] sm:$0xff]  }
 0x921   :  { %v4044_v59 = vpop.eup %4043  ;;  %v3798_v23 = vld [vmem:[%s6312_s10 + $0x30] sm:$0xff]  }
 0x922   :  { %v2710_v38 = vpack.c.bf16 %v2594_v24, %v2594_v24  ;;  %v2701_v41 = vadd.f32 1.0, %v4044_v59  ;;  %v3799_v24 = vld [vmem:[%s6312_s10 + $0x28] sm:$0xff]   ;;  %v3802_v59 = vld [vmem:[%s6312_s10 + $0x10] sm:$0xff]  }
 0x924   :  { %2743 = vmatprep.mubr.bf16.mxu0 %v2710_v38  ;;  %2784 = vmatprep.mubr.bf16.mxu1 %v2710_v38  ;;  %4049 = vrcp.f32 %v2701_v41  ;;  %v3800_v38 = vld [vmem:[%s6312_s10 + $0x20] sm:$0xff]  }
 0x92b   :  { %v4046_v1 = vpop.eup %4045 }
 0x92c   :  { %v2705_v56 = vmul.f32 %v4046_v1, %v4042_v7  ;;  %v3801_v7 = vld [vmem:[%s6312_s10 + $0x18] sm:$0xff]   ;;  %v3452_v1 = vld [vmem:[%s6309_s7] ss:$0 sm:$0xff] }
 0x92d   :  { %v4048_v58 = vpop.eup %4047 }
 0x92e   :  { %v2704_v45 = vmul.f32 %v4048_v58, %v6106_v55  ;;  %v3783_v55 = vld [vmem:[#allocation12 + $0x28] sm:$0xff]  }
 0x930   :  { %v2706_v4 = vadd.f32 %v2705_v56, %v2704_v45 }
 0x931   :  { %v4050_v3 = vpop.eup %4049 }
 0x932   :  { %4051 = vtanh.f32 %v2706_v4 }
 0x93f   :  { %v4052_v6 = vpop.eup %4051 }
 0x940   :  { %v2708_v16 = vmul.f32 %v4052_v6, %v4050_v3 }
 0x942   :  { %v2709_v19 = vpack.c.bf16 %v2708_v16, %v2708_v16  ;;  %v3803_v16 = vld [vmem:[%s6312_s10 + $0x8] sm:$0xff]  }
 0x944   :  { %2744 = vmatmul.mubr.bf16.vlgmr.msra.gmra.mxu0 %v2709_v19  ;;  %2785 = vmatmul.mubr.bf16.vlgmr.msra.gmra.mxu1 %v2709_v19  ;;  %v3804_v19 = vld [vmem:[%s6312_s10] sm:$0xff]  }
 0x945   :  { %3525 = vmatpush3.bf16.msra.mxu0 %v3781_v28  ;;  %3540 = vmatprep.mubr.msk.bf16.mxu0 %vm4468_vm1, %v4467_v48  ;;  %v3805_v28 = vld [vmem:[#allocation15 + $0x38] sm:$0xff]  }
 0x946   :  { %3526 = vmatprep.subr.bf16.mxu0 %v4467_v48  ;;  %3560 = vmatprep.mubr.msk.bf16.mxu1 %vm4468_vm1, %v4467_v48 }
 0x947   :  { %3545 = vmatpush3.bf16.msra.mxu1 %v3789_v51 }
 0x948   :  { %3546 = vmatprep.subr.bf16.mxu1 %v4467_v48 }
 0x949   :  { %3527 = vmatpush3.bf16.msra.mxu0 %v3782_v22  ;;  %v3806_v22 = vld [vmem:[#allocation15 + $0x30] sm:$0xff]  }
 0x94a   :  { %3528 = vmatprep.subr.bf16.mxu0 %v4467_v48 }
 0x94b   :  { %3547 = vmatpush3.bf16.msra.mxu1 %v3790_v49 }
 0x94c   :  { %3548 = vmatprep.subr.bf16.mxu1 %v4467_v48 }
 0x94d   :  { %3529 = vmatpush3.bf16.msra.mxu0 %v3783_v55  ;;  %v3807_v55 = vld [vmem:[#allocation15 + $0x28] sm:$0xff]  }
 0x94e   :  { %3530 = vmatprep.subr.bf16.mxu0 %v4467_v48 }
 0x94f   :  { %3549 = vmatpush3.bf16.msra.mxu1 %v3791_v52 }
 0x950   :  { %3550 = vmatprep.subr.bf16.mxu1 %v4467_v48 }
 0x951   :  { %3531 = vmatpush3.bf16.msra.mxu0 %v3784_v18  ;;  %v3808_v18 = vld [vmem:[#allocation15 + $0x20] sm:$0xff]  }
 0x952   :  { %3532 = vmatprep.subr.bf16.mxu0 %v4467_v48 }
 0x953   :  { %3551 = vmatpush3.bf16.msra.mxu1 %v3792_v35 }
 0x954   :  { %3552 = vmatprep.subr.bf16.mxu1 %v4467_v48 }
 0x955   :  { %3533 = vmatpush3.bf16.msra.mxu0 %v3785_v37  ;;  %v3809_v37 = vld [vmem:[#allocation15 + $0x18] sm:$0xff]  }
 0x956   :  { %3534 = vmatprep.subr.bf16.mxu0 %v4467_v48 }
 0x957   :  { %3553 = vmatpush3.bf16.msra.mxu1 %v3793_v33 }
 0x958   :  { %3554 = vmatprep.subr.bf16.mxu1 %v4467_v48 }
 0x959   :  { %3535 = vmatpush3.bf16.msra.mxu0 %v3786_v20  ;;  %v3810_v20 = vld [vmem:[#allocation15 + $0x10] sm:$0xff]  }
 0x95a   :  { %3536 = vmatprep.subr.bf16.mxu0 %v4467_v48 }
 0x95b   :  { %3555 = vmatpush3.bf16.msra.mxu1 %v3794_v13 }
 0x95c   :  { %3556 = vmatprep.subr.bf16.mxu1 %v4467_v48 }
 0x95d   :  { %3537 = vmatpush3.bf16.msra.mxu0 %v3787_v21  ;;  %v3461_v21 = vld [vmem:[%s6311_s9] ss:$0 sm:$0xff] }
 0x95e   :  { %3538 = vmatprep.subr.bf16.mxu0 %v4467_v48 }
 0x95f   :  { %3557 = vmatpush3.bf16.msra.mxu1 %v3795_v46 }
 0x960   :  { %3558 = vmatprep.subr.bf16.mxu1 %v4467_v48 }
 0x961   :  { %3539 = vmatpush3.bf16.msra.mxu0 %v3788_v15 }
 0x962   :  { %3564 = vmatprep.subr.bf16.mxu0 %v4467_v48 }
 0x963   :  { %3559 = vmatpush3.bf16.msra.mxu1 %v3796_v44 }
 0x964   :  { %3584 = vmatprep.subr.bf16.mxu1 %v4467_v48 }
 0xa04   :  { %v2745_v12 = vpop.f32.mrf.mxu0  ;;  %v2786_v14 = vpop.f32.mrf.mxu1 }
 0xa05   :  { %v2746_v39 = vadd.f32 %v2745_v12, %v7158_v43  ;;  %v2787_v11 = vadd.f32 %v2786_v14, %v7161_v50  ;;  %v3811_v12 = vld [vmem:[#allocation15 + $0x8] sm:$0xff]   ;;  %v3812_v14 = vld [vmem:[#allocation15] sm:$0xff]  }
 0xa06   :  { %v2747_v47 = vpop.f32.mrf.mxu0  ;;  %v2788_v9 = vpop.f32.mrf.mxu1 }
 0xa07   :  { %v3449_v62 = vmul.f32 -1.442695, %v2746_v39  ;;  %v2748_v63 = vadd.f32 %v2747_v47, %v7159_v60  ;;  %v2789_v61 = vadd.f32 %v2788_v9, %v7160_v53  ;;  %v3470_v39 = vld [vmem:[%s6313_s11] ss:$0 sm:$0xff]  ;;  %s4421_s11 = scalar_lea.vmem %s3276_s22, 128 }
 0xa08   :  { %v2749_v2 = vpop.f32.mrf.mxu0  ;;  %v2790_v10 = vpop.f32.mrf.mxu1  ;;  %p4422_p12 = scmp.ne.s32.totalorder %s3276_s22, %s4421_s11  ;;  %p4427_p0 = scmp.lt.s32.totalorder %s4421_s11, %s4421_s11 }
 0xa09   :  { %4053 = vpow2.f32 %v3449_v62  ;;  %v3450_v5 = vmul.f32 -1.442695, %v2748_v63  ;;  %v3451_v54 = vmul.f32 -1.442695, %v2789_v61 }
 0xa0a   :  { %v2750_v8 = vpop.f32.mrf.mxu0  ;;  %v2791_v0 = vpop.f32.mrf.mxu1  ;;  %p4428_p1 = por %p4427_p0, %p4426_p13 }
 0xa0b   :  { %4055 = vpow2.f32 %v3450_v5  ;;  %v3479_v8 = vld [vmem:[%s6315_s13] ss:$0 sm:$0xff] }
 0xa0c   :  { %4057 = vpow2.f32 %v3451_v54  ;;  %p4429_p2 = pnand %p4428_p1, %p4422_p12 }
 0xa16   :  { %v4054_v17 = vpop.eup %4053 }
 0xa17   :  { %v2796_v25 = vadd.f32 1.0, %v4054_v17 }
 0xa18   :  { %v4056_v43 = vpop.eup %4055 }
 0xa19   :  { %4059 = vrcp.f32 %v2796_v25  ;;  %v2802_v26 = vadd.f32 1.0, %v4056_v43  ;;  %v4058_v60 = vpop.eup %4057 }
 0xa1a   :  { %4061 = vtanh.f32 %v2787_v11  ;;  %v2809_v36 = vadd.f32 1.0, %v4058_v60 }
 0xa1b   :  { %4063 = vrcp.f32 %v2802_v26 }
 0xa1c   :  { %4065 = vrcp.f32 %v2809_v36 }
 0xa26   :  { %v4060_v27 = vpop.eup %4059 }
 0xa27   :  { %v4062_v32 = vpop.eup %4061 }
 0xa28   :  { %v4064_v34 = vpop.eup %4063  ;;  %v2813_v40 = vmul.f32 %v4062_v32, %v4060_v27 }
 0xa29   :  { %v2812_v30 = vmul.f32 %v4064_v34, %v6212_v31  ;;  %v4066_v29 = vpop.eup %4065  ;;  %v3797_v31 = vld [vmem:[%s6312_s10 + $0x38] sm:$0xff]  }
 0xa2b   :  { %v2814_v53 = vadd.f32 %v2813_v40, %v2812_v30 }
 0xa2d   :  { %4067 = vtanh.f32 %v2814_v53 }
 0xa3a   :  { %v4068_v50 = vpop.eup %4067 }
 0xa3b   :  { %v2816_v42 = vmul.f32 %v4068_v50, %v4066_v29 }
 0xa3d   :  { %v2817_v57 = vpack.c.bf16 %v2816_v42, %v2816_v42 }
 0xa3f   :  { %3541 = vmatmul.mubr.bf16.vlgmr.msra.gmra.mxu0 %v2817_v57 }
 0xa40   :  { %3580 = vmatprep.mubr.msk.bf16.mxu0 %vm4468_vm1, %v4467_v48  ;;  %3565 = vmatpush3.bf16.msra.mxu0 %v3797_v31 }
 0xa41   :  { %3566 = vmatprep.subr.bf16.mxu0 %v4467_v48 }
 0xa44   :  { %3567 = vmatpush3.bf16.msra.mxu0 %v3798_v23 }
 0xa45   :  { %3568 = vmatprep.subr.bf16.mxu0 %v4467_v48 }
 0xa48   :  { %3569 = vmatpush3.bf16.msra.mxu0 %v3799_v24 }
 0xa49   :  { %3570 = vmatprep.subr.bf16.mxu0 %v4467_v48 }
 0xa4c   :  { %3571 = vmatpush3.bf16.msra.mxu0 %v3800_v38 }
 0xa4d   :  { %3572 = vmatprep.subr.bf16.mxu0 %v4467_v48 }
 0xa50   :  { %3573 = vmatpush3.bf16.msra.mxu0 %v3801_v7 }
 0xa51   :  { %3574 = vmatprep.subr.bf16.mxu0 %v4467_v48 }
 0xa54   :  { %3575 = vmatpush3.bf16.msra.mxu0 %v3802_v59 }
 0xa55   :  { %3576 = vmatprep.subr.bf16.mxu0 %v4467_v48 }
 0xa58   :  { %3577 = vmatpush3.bf16.msra.mxu0 %v3803_v16 }
 0xa59   :  { %3578 = vmatprep.subr.bf16.mxu0 %v4467_v48 }
 0xa5c   :  { %3579 = vmatpush3.bf16.msra.mxu0 %v3804_v19 }
 0xaff   :  { %v2923_v56 = vpop.f32.mrf.mxu0 }
 0xb00   :  { %v2924_v58 = vadd.f32 %v3452_v1, %v2923_v56 }
 0xb01   :  { %v3542_v41 = vpop.f32.mrf.mxu0 }
 0xb02   :  { %v2929_v45 = vmax.f32 %v2924_v58, 0.0 }
 0xb03   :  { %v2926_v4 = vpop.f32.mrf.mxu0 }
 0xb04   :  { %v2930_v3 = vpack.c.bf16 %v2929_v45, %v2929_v45 }
 0xb05   :  { %v3543_v6 = vpop.f32.mrf.mxu0 }
 0xb06   :  { %3561 = vmatmul.mubr.bf16.vlgmr.msra.gmra.mxu1 %v2930_v3 }
 0xb07   :  { %3600 = vmatprep.mubr.msk.bf16.mxu1 %vm4468_vm1, %v4467_v48  ;;  %3585 = vmatpush3.bf16.msra.mxu1 %v3805_v28 }
 0xb08   :  { %3586 = vmatprep.subr.bf16.mxu1 %v4467_v48 }
 0xb0b   :  { %3587 = vmatpush3.bf16.msra.mxu1 %v3806_v22 }
 0xb0c   :  { %3588 = vmatprep.subr.bf16.mxu1 %v4467_v48 }
 0xb0f   :  { %3589 = vmatpush3.bf16.msra.mxu1 %v3807_v55 }
 0xb10   :  { %3590 = vmatprep.subr.bf16.mxu1 %v4467_v48 }
 0xb13   :  { %3591 = vmatpush3.bf16.msra.mxu1 %v3808_v18 }
 0xb14   :  { %3592 = vmatprep.subr.bf16.mxu1 %v4467_v48 }
 0xb17   :  { %3593 = vmatpush3.bf16.msra.mxu1 %v3809_v37 }
 0xb18   :  { %3594 = vmatprep.subr.bf16.mxu1 %v4467_v48 }
 0xb1b   :  { %3595 = vmatpush3.bf16.msra.mxu1 %v3810_v20 }
 0xb1c   :  { %3596 = vmatprep.subr.bf16.mxu1 %v4467_v48 }
 0xb1f   :  { %3597 = vmatpush3.bf16.msra.mxu1 %v3811_v12 }
 0xb20   :  { %3598 = vmatprep.subr.bf16.mxu1 %v4467_v48 }
 0xb23   :  { %3599 = vmatpush3.bf16.msra.mxu1 %v3812_v14 }
 0xbc6   :  { %v3036_v15 = vpop.f32.mrf.mxu1 }
 0xbc7   :  { %v3037_v51 = vadd.f32 %v3461_v21, %v3036_v15 }
 0xbc8   :  { %v3562_v49 = vpop.f32.mrf.mxu1 }
 0xbc9   :  { %v3042_v52 = vmax.f32 %v3037_v51, 0.0 }
 0xbca   :  { %v3039_v35 = vpop.f32.mrf.mxu1 }
 0xbcb   :  { %v3043_v33 = vpack.c.bf16 %v3042_v52, %v3042_v52 }
 0xbcc   :  { %v3563_v13 = vpop.f32.mrf.mxu1 }
 0xbcd   :  { %3581 = vmatmul.mubr.bf16.vlgmr.msra.gmra.mxu0 %v3043_v33 }
 0xc8d   :  { %v3149_v47 = vpop.f32.mrf.mxu0 }
 0xc8e   :  { %v3150_v9 = vadd.f32 %v3470_v39, %v3149_v47 }
 0xc8f   :  { %v3582_v62 = vpop.f32.mrf.mxu0 }
 0xc90   :  { %v3155_v63 = vmax.f32 %v3150_v9, 0.0 }
 0xc91   :  { %v3152_v2 = vpop.f32.mrf.mxu0 }
 0xc92   :  { %v3156_v10 = vpack.c.bf16 %v3155_v63, %v3155_v63 }
 0xc93   :  { %v3583_v5 = vpop.f32.mrf.mxu0 }
 0xc94   :  { %3601 = vmatmul.mubr.bf16.vlgmr.msra.gmra.mxu1 %v3156_v10 }
 0xd54   :  { %v3262_v48 = vpop.f32.mrf.mxu1 }
 0xd55   :  { %v3263_v0 = vadd.f32 %v3479_v8, %v3262_v48 }
 0xd56   :  { %v3602_v61 = vpop.f32.mrf.mxu1 }
 0xd57   :  { %3268 = vst [vmem:[#allocation17] sm:$0xff] %v3263_v0 }
 0xd58   :  { %v3265_v54 = vpop.f32.mrf.mxu1 }
 0xd59   :  { %4432 = shalt.err (!%p4429_p2)
}
 0xd5a   :  { %3278 = dma.vmem_to_hbm [thread:$0]  %s3276_s22, 128, %s6316_s14, [#allocation5]   ;;  %v3603_v17 = vpop.f32.mrf.mxu1 }
 0xd5b   :  { %4451 = dma.done.wait [#allocation5], 128  }
 0xd5c   :  { %4452 = vsyncadd [#allocation5], 4294967168 }
 0xd5d   :  { %3282 = vsyncpa [#allocation4], 1 }
 0xd5e   :  { %3283 = vsyncpa [#allocation7], 1 }
 0xd5f   :  { %3284 = vsyncpa [#allocation10], 1 }
 0xd60   :  { %3285 = vsyncpa [#allocation13], 1 }
 0xd61   :  { %3286 = vsyncpa [#allocation16], 1 }
 0xd62   :  { %3287 = vsyncpa [#allocation5], 1 }

</bundles_post_ra>
